<compile_context>
chip_gen: v7x
topology: tpu7x:2x2x1
jax: 0.10.0
libtpu: 0.0.40
codegen_flags: <defaults>
</compile_context>

<pallas_src>
import numpy as np

import jax
import jax.numpy as jnp
from jax.experimental import pallas as pl
from jax.experimental.pallas import tpu as pltpu


# ------------------------------- config -------------------------------------

N_BATCH = 2
IN_C = 4
OUT_C = 4
H = W = 16
CH = (8, 16)           # encoder channels
LATENT = 32
ENC_HW = 4 * 4         # encoded spatial size (16 -> 8 -> 4)
FLAT = CH[1] * ENC_HW  # 256 = Linear in_features


# ----------------------- tap-selection matrices -----------------------------

def _make_selectors(hin, win, hout, wout, transposed):
    """0/1 gather matrices S_k of shape (Hin*Win, Hout*Wout), one per 3x3 tap.

    Column m of S_k selects the input pixel feeding kernel tap k at output
    pixel m (an all-zero column encodes zero-padding / a transposed-conv
    dilation hole), so  x(Cin, Min) @ S_k  gathers tap k for every output
    position at once. Hardcoded for stride 2, padding 1 (and output_padding 1
    via the output size) which is what every layer of this module uses.
    """
    sels = np.zeros((9, hin * win, hout * wout), np.float32)
    for ki in range(3):
        for kj in range(3):
            k = ki * 3 + kj
            for oy in range(hout):
                for ox in range(wout):
                    if transposed:
                        d, e = oy + ki - 1, ox + kj - 1
                        if d < 0 or e < 0 or (d % 2) or (e % 2):
                            continue
                        r, c = d // 2, e // 2
                    else:
                        r, c = 2 * oy + ki - 1, 2 * ox + kj - 1
                    if 0 <= r < hin and 0 <= c < win:
                        sels[k, r * win + c, oy * wout + ox] = 1.0
    return jnp.asarray(sels, dtype=jnp.bfloat16)   # 0/1: exact in bf16


# ------------------------------ the kernel ----------------------------------

def _vae_kernel(alpha_ref, x_ref,
                s0_ref, w0_ref, b0_ref,
                s1_ref, w1_ref, b1_ref,
                wmu_ref, bmu_ref, wlv_ref, blv_ref, wdl_ref, bdl_ref,
                s2_ref, w2_ref, b2_ref,
                s3_ref, w3_ref, b3_ref,
                recon_ref, mu_ref, lv_ref, z_ref):
    """Entire VarAutoEncoder forward for ONE batch sample (grid step)."""

    def conv_taps(a, s_ref, w_ref, b_ref):
        # a: (Cin, Min) f32. Returns (Cout, Mout) f32 = conv(a) + bias.
        a16 = a.astype(jnp.bfloat16)
        cout = w_ref.shape[1]
        mout = s_ref.shape[2]
        acc = jnp.zeros((cout, mout), jnp.float32)
        for k in range(9):
            g = jnp.dot(a16, s_ref[k], preferred_element_type=jnp.float32)
            acc = acc + jnp.dot(w_ref[k], g.astype(jnp.bfloat16),
                                preferred_element_type=jnp.float32)
        return acc + b_ref[...]

    def inorm_prelu(y, alpha):
        # InstanceNorm2d defaults (affine=False, eps=1e-5, biased var) + PReLU.
        mean = jnp.mean(y, axis=1, keepdims=True)
        var = jnp.mean(jnp.square(y - mean), axis=1, keepdims=True)
        y = (y - mean) * jax.lax.rsqrt(var + 1e-5)
        return jnp.where(y >= 0.0, y, alpha * y)

    # ------------------------------ encode -----------------------------------
    a = x_ref[0]                                                       # (4, 256)
    a = inorm_prelu(conv_taps(a, s0_ref, w0_ref, b0_ref), alpha_ref[0])  # (8, 64)
    a = inorm_prelu(conv_taps(a, s1_ref, w1_ref, b1_ref), alpha_ref[1])  # (16, 16)

    # ---------------------- latent bottleneck (f32) --------------------------
    # Flatten in PyTorch (C, H, W) order: concat channel rows along lanes.
    feat = jnp.concatenate([a[c:c + 1, :] for c in range(CH[1])], axis=1)  # (1, 256)
    mu = jnp.dot(feat, wmu_ref[...], preferred_element_type=jnp.float32) + bmu_ref[...]
    lv = jnp.dot(feat, wlv_ref[...], preferred_element_type=jnp.float32) + blv_ref[...]
    # TODO(synk): training-mode reparameterize multiplies std by randn_like;
    # eval-mode path (deterministic): z = mu + exp(0.5 * logvar).
    z = mu + jnp.exp(0.5 * lv)

    hid = jnp.dot(z, wdl_ref[...], preferred_element_type=jnp.float32) + bdl_ref[...]
    hid = jnp.maximum(hid, 0.0)                                        # (1, 256)
    # Unflatten back to channel-major (C, H*W), matching x.view(N, 16, 4, 4).
    a = jnp.concatenate([hid[:, c * ENC_HW:(c + 1) * ENC_HW]
                         for c in range(CH[1])], axis=0)               # (16, 16)

    # ------------------------------ decode -----------------------------------
    a = inorm_prelu(conv_taps(a, s2_ref, w2_ref, b2_ref), alpha_ref[2])  # (8, 64)
    y = conv_taps(a, s3_ref, w3_ref, b3_ref)                             # (4, 256)

    # sigmoid, lane-dense (4, 256) store.
    recon_ref[0] = 1.0 / (1.0 + jnp.exp(-y))
    mu_ref[0] = mu
    lv_ref[0] = lv
    z_ref[0] = z


# ----------------------------- host wrappers ---------------------------------

def _prep_conv(w, b):
    """(kh,kw,Cin,Cout) f32 -> (9, Cout, Cin) bf16 tap weights + (Cout,1) bias."""
    cin, cout = w.shape[2], w.shape[3]
    wt = jnp.transpose(w.reshape(9, cin, cout), (0, 2, 1)).astype(jnp.bfloat16)
    return wt, b.reshape(cout, 1).astype(jnp.float32)


def _resident_spec(a):
    """Full-array VMEM block whose index does not change across grid steps."""
    zeros = (0,) * a.ndim
    return pl.BlockSpec(a.shape, lambda i, _z=zeros: _z)


def var_autoencoder_forward(x_nchw, params):
    """Returns (reconstruction NCHW, mu, logvar, z) like VarAutoEncoder.forward."""
    n = x_nchw.shape[0]
    hw = H * W
    x3 = x_nchw.reshape(n, IN_C, hw).astype(jnp.float32)     # free NCHW reinterpret

    sel_e0 = _make_selectors(16, 16, 8, 8, transposed=False)
    sel_e1 = _make_selectors(8, 8, 4, 4, transposed=False)
    sel_d0 = _make_selectors(4, 4, 8, 8, transposed=True)
    sel_d1 = _make_selectors(8, 8, 16, 16, transposed=True)

    w_e0, b_e0 = _prep_conv(params["enc0_w"], params["enc0_b"])
    w_e1, b_e1 = _prep_conv(params["enc1_w"], params["enc1_b"])
    w_d0, b_d0 = _prep_conv(params["dec0_w"], params["dec0_b"])
    w_d1, b_d1 = _prep_conv(params["dec1_w"], params["dec1_b"])

    alphas = jnp.concatenate(
        [params["enc0_a"], params["enc1_a"], params["dec0_a"]]).astype(jnp.float32)

    operands = [
        alphas, x3,
        sel_e0, w_e0, b_e0,
        sel_e1, w_e1, b_e1,
        params["mu_w"], params["mu_b"].reshape(1, LATENT),
        params["lv_w"], params["lv_b"].reshape(1, LATENT),
        params["dl_w"], params["dl_b"].reshape(1, FLAT),
        sel_d0, w_d0, b_d0,
        sel_d1, w_d1, b_d1,
    ]

    in_specs = [pl.BlockSpec(memory_space=pltpu.SMEM),               # PReLU alphas
                pl.BlockSpec((1, IN_C, hw), lambda i: (i, 0, 0))]    # input sample i
    in_specs += [_resident_spec(a) for a in operands[2:]]            # weights/selectors

    out_shape = (
        jax.ShapeDtypeStruct((n, OUT_C, hw), jnp.float32),
        jax.ShapeDtypeStruct((n, 1, LATENT), jnp.float32),
        jax.ShapeDtypeStruct((n, 1, LATENT), jnp.float32),
        jax.ShapeDtypeStruct((n, 1, LATENT), jnp.float32),
    )
    out_specs = (
        pl.BlockSpec((1, OUT_C, hw), lambda i: (i, 0, 0)),
        pl.BlockSpec((1, 1, LATENT), lambda i: (i, 0, 0)),
        pl.BlockSpec((1, 1, LATENT), lambda i: (i, 0, 0)),
        pl.BlockSpec((1, 1, LATENT), lambda i: (i, 0, 0)),
    )

    recon3, mu3, lv3, z3 = pl.pallas_call(
        _vae_kernel,
        grid=(n,),
        out_shape=out_shape,
        in_specs=in_specs,
        out_specs=out_specs,
        compiler_params=pltpu.CompilerParams(
            dimension_semantics=("parallel",)),
    )(*operands)

    recon = recon3.reshape(n, OUT_C, H, W)                   # free NCHW reinterpret
    return recon, mu3.reshape(n, LATENT), lv3.reshape(n, LATENT), z3.reshape(n, LATENT)


# ------------------------------- parameters ----------------------------------

def init_params(key):
    ks = jax.random.split(key, 14)

    def conv_w(k, cin, cout):
        return jax.random.normal(k, (3, 3, cin, cout), jnp.float32) / np.sqrt(9.0 * cin)

    def lin_w(k, fin, fout):
        return jax.random.normal(k, (fin, fout), jnp.float32) / np.sqrt(float(fin))

    def bias(k, nfeat):
        return 0.01 * jax.random.normal(k, (nfeat,), jnp.float32)

    return {
        # encode
        "enc0_w": conv_w(ks[0], IN_C, CH[0]),   "enc0_b": bias(ks[1], CH[0]),
        "enc1_w": conv_w(ks[2], CH[0], CH[1]),  "enc1_b": bias(ks[3], CH[1]),
        # latent linears (stored as (in, out), in-index in (C,H,W) flatten order)
        "mu_w": lin_w(ks[4], FLAT, LATENT),     "mu_b": bias(ks[5], LATENT),
        "lv_w": lin_w(ks[6], FLAT, LATENT),     "lv_b": bias(ks[7], LATENT),
        "dl_w": lin_w(ks[8], LATENT, FLAT),     "dl_b": bias(ks[9], FLAT),
        # decode (transposed-conv weights in equivalent-forward-conv layout)
        "dec0_w": conv_w(ks[10], CH[1], CH[0]), "dec0_b": bias(ks[11], CH[0]),
        "dec1_w": conv_w(ks[12], CH[0], OUT_C), "dec1_b": bias(ks[13], OUT_C),
        # PReLU (num_parameters=1, default init 0.25)
        "enc0_a": jnp.full((1,), 0.25, jnp.float32),
        "enc1_a": jnp.full((1,), 0.25, jnp.float32),
        "dec0_a": jnp.full((1,), 0.25, jnp.float32),
    }


if __name__ == "__main__":
    key = jax.random.PRNGKey(0)
    pkey, xkey = jax.random.split(key)
    params = init_params(pkey)
    x = jax.random.normal(xkey, (N_BATCH, IN_C, H, W), jnp.float32)   # NCHW

    fwd = jax.jit(lambda a: var_autoencoder_forward(a, params))
    recon, mu, logvar, z = fwd(x)
    jax.block_until_ready((recon, mu, logvar, z))

    assert recon.shape == (N_BATCH, OUT_C, H, W), recon.shape
    assert recon.dtype == jnp.float32
    assert mu.shape == (N_BATCH, LATENT) and logvar.shape == (N_BATCH, LATENT)
    assert z.shape == (N_BATCH, LATENT)
    assert bool(jnp.all(jnp.isfinite(recon)))
    assert bool(jnp.all((recon >= 0.0) & (recon <= 1.0)))
    assert bool(jnp.all(jnp.isfinite(mu))) and bool(jnp.all(jnp.isfinite(z)))
    print("KERNEL_OK")
</pallas_src>

<mosaic_0001>
module attributes {stable_mosaic.version = 11 : i64} {
  func.func @_vae_kernel(%arg0: i32, %arg1: memref<3xf32, #tpu.memory_space<smem>>, %arg2: memref<1x4x256xf32, #tpu.memory_space<vmem>>, %arg3: memref<9x256x64xbf16, #tpu.memory_space<vmem>>, %arg4: memref<9x8x4xbf16, #tpu.memory_space<vmem>>, %arg5: memref<8x1xf32, #tpu.memory_space<vmem>>, %arg6: memref<9x64x16xbf16, #tpu.memory_space<vmem>>, %arg7: memref<9x16x8xbf16, #tpu.memory_space<vmem>>, %arg8: memref<16x1xf32, #tpu.memory_space<vmem>>, %arg9: memref<256x32xf32, #tpu.memory_space<vmem>>, %arg10: memref<1x32xf32, #tpu.memory_space<vmem>>, %arg11: memref<256x32xf32, #tpu.memory_space<vmem>>, %arg12: memref<1x32xf32, #tpu.memory_space<vmem>>, %arg13: memref<32x256xf32, #tpu.memory_space<vmem>>, %arg14: memref<1x256xf32, #tpu.memory_space<vmem>>, %arg15: memref<9x16x64xbf16, #tpu.memory_space<vmem>>, %arg16: memref<9x8x16xbf16, #tpu.memory_space<vmem>>, %arg17: memref<8x1xf32, #tpu.memory_space<vmem>>, %arg18: memref<9x64x256xbf16, #tpu.memory_space<vmem>>, %arg19: memref<9x4x8xbf16, #tpu.memory_space<vmem>>, %arg20: memref<4x1xf32, #tpu.memory_space<vmem>>, %arg21: memref<1x4x256xf32, #tpu.memory_space<vmem>>, %arg22: memref<1x1x32xf32, #tpu.memory_space<vmem>>, %arg23: memref<1x1x32xf32, #tpu.memory_space<vmem>>, %arg24: memref<1x1x32xf32, #tpu.memory_space<vmem>>) attributes {dimension_semantics = [#tpu.dimension_semantics<parallel>], iteration_bounds = array<i64: 2>, scalar_prefetch = 0 : i64, scratch_operands = 0 : i64, tpu.core_type = #tpu.core_type<tc>, window_params = [{transform_indices = @transform_0, window_bounds = array<i64: 3>}, {transform_indices = @transform_1, window_bounds = array<i64: 1, 4, 256>}, {pipeline_mode = #tpu.pipeline_mode<synchronous>, transform_indices = @transform_2, window_bounds = array<i64: 9, 256, 64>}, {pipeline_mode = #tpu.pipeline_mode<synchronous>, transform_indices = @transform_3, window_bounds = array<i64: 9, 8, 4>}, {pipeline_mode = #tpu.pipeline_mode<synchronous>, transform_indices = @transform_4, window_bounds = array<i64: 8, 1>}, {pipeline_mode = #tpu.pipeline_mode<synchronous>, transform_indices = @transform_5, window_bounds = array<i64: 9, 64, 16>}, {pipeline_mode = #tpu.pipeline_mode<synchronous>, transform_indices = @transform_6, window_bounds = array<i64: 9, 16, 8>}, {pipeline_mode = #tpu.pipeline_mode<synchronous>, transform_indices = @transform_7, window_bounds = array<i64: 16, 1>}, {pipeline_mode = #tpu.pipeline_mode<synchronous>, transform_indices = @transform_8, window_bounds = array<i64: 256, 32>}, {pipeline_mode = #tpu.pipeline_mode<synchronous>, transform_indices = @transform_9, window_bounds = array<i64: 1, 32>}, {pipeline_mode = #tpu.pipeline_mode<synchronous>, transform_indices = @transform_10, window_bounds = array<i64: 256, 32>}, {pipeline_mode = #tpu.pipeline_mode<synchronous>, transform_indices = @transform_11, window_bounds = array<i64: 1, 32>}, {pipeline_mode = #tpu.pipeline_mode<synchronous>, transform_indices = @transform_12, window_bounds = array<i64: 32, 256>}, {pipeline_mode = #tpu.pipeline_mode<synchronous>, transform_indices = @transform_13, window_bounds = array<i64: 1, 256>}, {pipeline_mode = #tpu.pipeline_mode<synchronous>, transform_indices = @transform_14, window_bounds = array<i64: 9, 16, 64>}, {pipeline_mode = #tpu.pipeline_mode<synchronous>, transform_indices = @transform_15, window_bounds = array<i64: 9, 8, 16>}, {pipeline_mode = #tpu.pipeline_mode<synchronous>, transform_indices = @transform_16, window_bounds = array<i64: 8, 1>}, {pipeline_mode = #tpu.pipeline_mode<synchronous>, transform_indices = @transform_17, window_bounds = array<i64: 9, 64, 256>}, {pipeline_mode = #tpu.pipeline_mode<synchronous>, transform_indices = @transform_18, window_bounds = array<i64: 9, 4, 8>}, {pipeline_mode = #tpu.pipeline_mode<synchronous>, transform_indices = @transform_19, window_bounds = array<i64: 4, 1>}, {transform_indices = @transform_20, window_bounds = array<i64: 1, 4, 256>}, {transform_indices = @transform_21, window_bounds = array<i64: 1, 1, 32>}, {transform_indices = @transform_22, window_bounds = array<i64: 1, 1, 32>}, {transform_indices = @transform_23, window_bounds = array<i64: 1, 1, 32>}]} {
    %c0 = arith.constant 0 : index
    %c0_0 = arith.constant 0 : index
    %c0_1 = arith.constant 0 : index
    %0 = vector.load %arg2[%c0, %c0_0, %c0_1] : memref<1x4x256xf32, #tpu.memory_space<vmem>>, vector<1x4x256xf32>
    %1 = vector.shape_cast %0 : vector<1x4x256xf32> to vector<4x256xf32>
    %2 = arith.truncf %1 : vector<4x256xf32> to vector<4x256xbf16>
    %cst = arith.constant 0.000000e+00 : f32
    %3 = vector.broadcast %cst : f32 to vector<8x64xf32>
    %c0_2 = arith.constant 0 : index
    %c0_3 = arith.constant 0 : index
    %c0_4 = arith.constant 0 : index
    %4 = vector.load %arg3[%c0_2, %c0_3, %c0_4] : memref<9x256x64xbf16, #tpu.memory_space<vmem>>, vector<1x256x64xbf16>
    %5 = vector.shape_cast %4 : vector<1x256x64xbf16> to vector<256x64xbf16>
    %cst_5 = arith.constant dense<0.000000e+00> : vector<4x64xf32>
    %6 = tpu.matmul %2, %5, %cst_5 {dimension_numbers = #tpu.dot_dimension_numbers<[1], [0], [0], [1], [0, 0, 1, 1], [], []>} : vector<4x256xbf16>, vector<256x64xbf16>, vector<4x64xf32> -> vector<4x64xf32>
    %c0_6 = arith.constant 0 : index
    %c0_7 = arith.constant 0 : index
    %c0_8 = arith.constant 0 : index
    %7 = vector.load %arg4[%c0_6, %c0_7, %c0_8] : memref<9x8x4xbf16, #tpu.memory_space<vmem>>, vector<1x8x4xbf16>
    %8 = vector.shape_cast %7 : vector<1x8x4xbf16> to vector<8x4xbf16>
    %9 = arith.truncf %6 : vector<4x64xf32> to vector<4x64xbf16>
    %cst_9 = arith.constant dense<0.000000e+00> : vector<8x64xf32>
    %10 = tpu.matmul %8, %9, %cst_9 {dimension_numbers = #tpu.dot_dimension_numbers<[1], [0], [0], [1], [0, 0, 1, 1], [], []>} : vector<8x4xbf16>, vector<4x64xbf16>, vector<8x64xf32> -> vector<8x64xf32>
    %11 = arith.addf %3, %10 : vector<8x64xf32>
    %c1 = arith.constant 1 : index
    %c0_10 = arith.constant 0 : index
    %c0_11 = arith.constant 0 : index
    %12 = vector.load %arg3[%c1, %c0_10, %c0_11] : memref<9x256x64xbf16, #tpu.memory_space<vmem>>, vector<1x256x64xbf16>
    %13 = vector.shape_cast %12 : vector<1x256x64xbf16> to vector<256x64xbf16>
    %cst_12 = arith.constant dense<0.000000e+00> : vector<4x64xf32>
    %14 = tpu.matmul %2, %13, %cst_12 {dimension_numbers = #tpu.dot_dimension_numbers<[1], [0], [0], [1], [0, 0, 1, 1], [], []>} : vector<4x256xbf16>, vector<256x64xbf16>, vector<4x64xf32> -> vector<4x64xf32>
    %c1_13 = arith.constant 1 : index
    %c0_14 = arith.constant 0 : index
    %c0_15 = arith.constant 0 : index
    %15 = vector.load %arg4[%c1_13, %c0_14, %c0_15] : memref<9x8x4xbf16, #tpu.memory_space<vmem>>, vector<1x8x4xbf16>
    %16 = vector.shape_cast %15 : vector<1x8x4xbf16> to vector<8x4xbf16>
    %17 = arith.truncf %14 : vector<4x64xf32> to vector<4x64xbf16>
    %cst_16 = arith.constant dense<0.000000e+00> : vector<8x64xf32>
    %18 = tpu.matmul %16, %17, %cst_16 {dimension_numbers = #tpu.dot_dimension_numbers<[1], [0], [0], [1], [0, 0, 1, 1], [], []>} : vector<8x4xbf16>, vector<4x64xbf16>, vector<8x64xf32> -> vector<8x64xf32>
    %19 = arith.addf %11, %18 : vector<8x64xf32>
    %c2 = arith.constant 2 : index
    %c0_17 = arith.constant 0 : index
    %c0_18 = arith.constant 0 : index
    %20 = vector.load %arg3[%c2, %c0_17, %c0_18] : memref<9x256x64xbf16, #tpu.memory_space<vmem>>, vector<1x256x64xbf16>
    %21 = vector.shape_cast %20 : vector<1x256x64xbf16> to vector<256x64xbf16>
    %cst_19 = arith.constant dense<0.000000e+00> : vector<4x64xf32>
    %22 = tpu.matmul %2, %21, %cst_19 {dimension_numbers = #tpu.dot_dimension_numbers<[1], [0], [0], [1], [0, 0, 1, 1], [], []>} : vector<4x256xbf16>, vector<256x64xbf16>, vector<4x64xf32> -> vector<4x64xf32>
    %c2_20 = arith.constant 2 : index
    %c0_21 = arith.constant 0 : index
    %c0_22 = arith.constant 0 : index
    %23 = vector.load %arg4[%c2_20, %c0_21, %c0_22] : memref<9x8x4xbf16, #tpu.memory_space<vmem>>, vector<1x8x4xbf16>
    %24 = vector.shape_cast %23 : vector<1x8x4xbf16> to vector<8x4xbf16>
    %25 = arith.truncf %22 : vector<4x64xf32> to vector<4x64xbf16>
    %cst_23 = arith.constant dense<0.000000e+00> : vector<8x64xf32>
    %26 = tpu.matmul %24, %25, %cst_23 {dimension_numbers = #tpu.dot_dimension_numbers<[1], [0], [0], [1], [0, 0, 1, 1], [], []>} : vector<8x4xbf16>, vector<4x64xbf16>, vector<8x64xf32> -> vector<8x64xf32>
    %27 = arith.addf %19, %26 : vector<8x64xf32>
    %c3 = arith.constant 3 : index
    %c0_24 = arith.constant 0 : index
    %c0_25 = arith.constant 0 : index
    %28 = vector.load %arg3[%c3, %c0_24, %c0_25] : memref<9x256x64xbf16, #tpu.memory_space<vmem>>, vector<1x256x64xbf16>
    %29 = vector.shape_cast %28 : vector<1x256x64xbf16> to vector<256x64xbf16>
    %cst_26 = arith.constant dense<0.000000e+00> : vector<4x64xf32>
    %30 = tpu.matmul %2, %29, %cst_26 {dimension_numbers = #tpu.dot_dimension_numbers<[1], [0], [0], [1], [0, 0, 1, 1], [], []>} : vector<4x256xbf16>, vector<256x64xbf16>, vector<4x64xf32> -> vector<4x64xf32>
    %c3_27 = arith.constant 3 : index
    %c0_28 = arith.constant 0 : index
    %c0_29 = arith.constant 0 : index
    %31 = vector.load %arg4[%c3_27, %c0_28, %c0_29] : memref<9x8x4xbf16, #tpu.memory_space<vmem>>, vector<1x8x4xbf16>
    %32 = vector.shape_cast %31 : vector<1x8x4xbf16> to vector<8x4xbf16>
    %33 = arith.truncf %30 : vector<4x64xf32> to vector<4x64xbf16>
    %cst_30 = arith.constant dense<0.000000e+00> : vector<8x64xf32>
    %34 = tpu.matmul %32, %33, %cst_30 {dimension_numbers = #tpu.dot_dimension_numbers<[1], [0], [0], [1], [0, 0, 1, 1], [], []>} : vector<8x4xbf16>, vector<4x64xbf16>, vector<8x64xf32> -> vector<8x64xf32>
    %35 = arith.addf %27, %34 : vector<8x64xf32>
    %c4 = arith.constant 4 : index
    %c0_31 = arith.constant 0 : index
    %c0_32 = arith.constant 0 : index
    %36 = vector.load %arg3[%c4, %c0_31, %c0_32] : memref<9x256x64xbf16, #tpu.memory_space<vmem>>, vector<1x256x64xbf16>
    %37 = vector.shape_cast %36 : vector<1x256x64xbf16> to vector<256x64xbf16>
    %cst_33 = arith.constant dense<0.000000e+00> : vector<4x64xf32>
    %38 = tpu.matmul %2, %37, %cst_33 {dimension_numbers = #tpu.dot_dimension_numbers<[1], [0], [0], [1], [0, 0, 1, 1], [], []>} : vector<4x256xbf16>, vector<256x64xbf16>, vector<4x64xf32> -> vector<4x64xf32>
    %c4_34 = arith.constant 4 : index
    %c0_35 = arith.constant 0 : index
    %c0_36 = arith.constant 0 : index
    %39 = vector.load %arg4[%c4_34, %c0_35, %c0_36] : memref<9x8x4xbf16, #tpu.memory_space<vmem>>, vector<1x8x4xbf16>
    %40 = vector.shape_cast %39 : vector<1x8x4xbf16> to vector<8x4xbf16>
    %41 = arith.truncf %38 : vector<4x64xf32> to vector<4x64xbf16>
    %cst_37 = arith.constant dense<0.000000e+00> : vector<8x64xf32>
    %42 = tpu.matmul %40, %41, %cst_37 {dimension_numbers = #tpu.dot_dimension_numbers<[1], [0], [0], [1], [0, 0, 1, 1], [], []>} : vector<8x4xbf16>, vector<4x64xbf16>, vector<8x64xf32> -> vector<8x64xf32>
    %43 = arith.addf %35, %42 : vector<8x64xf32>
    %c5 = arith.constant 5 : index
    %c0_38 = arith.constant 0 : index
    %c0_39 = arith.constant 0 : index
    %44 = vector.load %arg3[%c5, %c0_38, %c0_39] : memref<9x256x64xbf16, #tpu.memory_space<vmem>>, vector<1x256x64xbf16>
    %45 = vector.shape_cast %44 : vector<1x256x64xbf16> to vector<256x64xbf16>
    %cst_40 = arith.constant dense<0.000000e+00> : vector<4x64xf32>
    %46 = tpu.matmul %2, %45, %cst_40 {dimension_numbers = #tpu.dot_dimension_numbers<[1], [0], [0], [1], [0, 0, 1, 1], [], []>} : vector<4x256xbf16>, vector<256x64xbf16>, vector<4x64xf32> -> vector<4x64xf32>
    %c5_41 = arith.constant 5 : index
    %c0_42 = arith.constant 0 : index
    %c0_43 = arith.constant 0 : index
    %47 = vector.load %arg4[%c5_41, %c0_42, %c0_43] : memref<9x8x4xbf16, #tpu.memory_space<vmem>>, vector<1x8x4xbf16>
    %48 = vector.shape_cast %47 : vector<1x8x4xbf16> to vector<8x4xbf16>
    %49 = arith.truncf %46 : vector<4x64xf32> to vector<4x64xbf16>
    %cst_44 = arith.constant dense<0.000000e+00> : vector<8x64xf32>
    %50 = tpu.matmul %48, %49, %cst_44 {dimension_numbers = #tpu.dot_dimension_numbers<[1], [0], [0], [1], [0, 0, 1, 1], [], []>} : vector<8x4xbf16>, vector<4x64xbf16>, vector<8x64xf32> -> vector<8x64xf32>
    %51 = arith.addf %43, %50 : vector<8x64xf32>
    %c6 = arith.constant 6 : index
    %c0_45 = arith.constant 0 : index
    %c0_46 = arith.constant 0 : index
    %52 = vector.load %arg3[%c6, %c0_45, %c0_46] : memref<9x256x64xbf16, #tpu.memory_space<vmem>>, vector<1x256x64xbf16>
    %53 = vector.shape_cast %52 : vector<1x256x64xbf16> to vector<256x64xbf16>
    %cst_47 = arith.constant dense<0.000000e+00> : vector<4x64xf32>
    %54 = tpu.matmul %2, %53, %cst_47 {dimension_numbers = #tpu.dot_dimension_numbers<[1], [0], [0], [1], [0, 0, 1, 1], [], []>} : vector<4x256xbf16>, vector<256x64xbf16>, vector<4x64xf32> -> vector<4x64xf32>
    %c6_48 = arith.constant 6 : index
    %c0_49 = arith.constant 0 : index
    %c0_50 = arith.constant 0 : index
    %55 = vector.load %arg4[%c6_48, %c0_49, %c0_50] : memref<9x8x4xbf16, #tpu.memory_space<vmem>>, vector<1x8x4xbf16>
    %56 = vector.shape_cast %55 : vector<1x8x4xbf16> to vector<8x4xbf16>
    %57 = arith.truncf %54 : vector<4x64xf32> to vector<4x64xbf16>
    %cst_51 = arith.constant dense<0.000000e+00> : vector<8x64xf32>
    %58 = tpu.matmul %56, %57, %cst_51 {dimension_numbers = #tpu.dot_dimension_numbers<[1], [0], [0], [1], [0, 0, 1, 1], [], []>} : vector<8x4xbf16>, vector<4x64xbf16>, vector<8x64xf32> -> vector<8x64xf32>
    %59 = arith.addf %51, %58 : vector<8x64xf32>
    %c7 = arith.constant 7 : index
    %c0_52 = arith.constant 0 : index
    %c0_53 = arith.constant 0 : index
    %60 = vector.load %arg3[%c7, %c0_52, %c0_53] : memref<9x256x64xbf16, #tpu.memory_space<vmem>>, vector<1x256x64xbf16>
    %61 = vector.shape_cast %60 : vector<1x256x64xbf16> to vector<256x64xbf16>
    %cst_54 = arith.constant dense<0.000000e+00> : vector<4x64xf32>
    %62 = tpu.matmul %2, %61, %cst_54 {dimension_numbers = #tpu.dot_dimension_numbers<[1], [0], [0], [1], [0, 0, 1, 1], [], []>} : vector<4x256xbf16>, vector<256x64xbf16>, vector<4x64xf32> -> vector<4x64xf32>
    %c7_55 = arith.constant 7 : index
    %c0_56 = arith.constant 0 : index
    %c0_57 = arith.constant 0 : index
    %63 = vector.load %arg4[%c7_55, %c0_56, %c0_57] : memref<9x8x4xbf16, #tpu.memory_space<vmem>>, vector<1x8x4xbf16>
    %64 = vector.shape_cast %63 : vector<1x8x4xbf16> to vector<8x4xbf16>
    %65 = arith.truncf %62 : vector<4x64xf32> to vector<4x64xbf16>
    %cst_58 = arith.constant dense<0.000000e+00> : vector<8x64xf32>
    %66 = tpu.matmul %64, %65, %cst_58 {dimension_numbers = #tpu.dot_dimension_numbers<[1], [0], [0], [1], [0, 0, 1, 1], [], []>} : vector<8x4xbf16>, vector<4x64xbf16>, vector<8x64xf32> -> vector<8x64xf32>
    %67 = arith.addf %59, %66 : vector<8x64xf32>
    %c8 = arith.constant 8 : index
    %c0_59 = arith.constant 0 : index
    %c0_60 = arith.constant 0 : index
    %68 = vector.load %arg3[%c8, %c0_59, %c0_60] : memref<9x256x64xbf16, #tpu.memory_space<vmem>>, vector<1x256x64xbf16>
    %69 = vector.shape_cast %68 : vector<1x256x64xbf16> to vector<256x64xbf16>
    %cst_61 = arith.constant dense<0.000000e+00> : vector<4x64xf32>
    %70 = tpu.matmul %2, %69, %cst_61 {dimension_numbers = #tpu.dot_dimension_numbers<[1], [0], [0], [1], [0, 0, 1, 1], [], []>} : vector<4x256xbf16>, vector<256x64xbf16>, vector<4x64xf32> -> vector<4x64xf32>
    %c8_62 = arith.constant 8 : index
    %c0_63 = arith.constant 0 : index
    %c0_64 = arith.constant 0 : index
    %71 = vector.load %arg4[%c8_62, %c0_63, %c0_64] : memref<9x8x4xbf16, #tpu.memory_space<vmem>>, vector<1x8x4xbf16>
    %72 = vector.shape_cast %71 : vector<1x8x4xbf16> to vector<8x4xbf16>
    %73 = arith.truncf %70 : vector<4x64xf32> to vector<4x64xbf16>
    %cst_65 = arith.constant dense<0.000000e+00> : vector<8x64xf32>
    %74 = tpu.matmul %72, %73, %cst_65 {dimension_numbers = #tpu.dot_dimension_numbers<[1], [0], [0], [1], [0, 0, 1, 1], [], []>} : vector<8x4xbf16>, vector<4x64xbf16>, vector<8x64xf32> -> vector<8x64xf32>
    %75 = arith.addf %67, %74 : vector<8x64xf32>
    %c0_66 = arith.constant 0 : index
    %c0_67 = arith.constant 0 : index
    %76 = vector.load %arg5[%c0_66, %c0_67] : memref<8x1xf32, #tpu.memory_space<vmem>>, vector<8x1xf32>
    %77 = vector.broadcast %76 : vector<8x1xf32> to vector<8x64xf32>
    %78 = arith.addf %75, %77 : vector<8x64xf32>
    %c0_68 = arith.constant 0 : index
    %79 = memref.load %arg1[%c0_68] : memref<3xf32, #tpu.memory_space<smem>>
    %cst_69 = arith.constant dense<0.000000e+00> : vector<8xf32>
    %80 = vector.multi_reduction <add>, %78, %cst_69 [1] : vector<8x64xf32> to vector<8xf32>
    %81 = vector.shape_cast %80 : vector<8xf32> to vector<8x1xf32>
    %cst_70 = arith.constant 6.400000e+01 : f32
    %82 = vector.broadcast %cst_70 : f32 to vector<8x1xf32>
    %83 = arith.divf %81, %82 : vector<8x1xf32>
    %84 = vector.broadcast %83 : vector<8x1xf32> to vector<8x64xf32>
    %85 = arith.subf %78, %84 : vector<8x64xf32>
    %86 = arith.mulf %85, %85 : vector<8x64xf32>
    %cst_71 = arith.constant dense<0.000000e+00> : vector<8xf32>
    %87 = vector.multi_reduction <add>, %86, %cst_71 [1] : vector<8x64xf32> to vector<8xf32>
    %88 = vector.shape_cast %87 : vector<8xf32> to vector<8x1xf32>
    %cst_72 = arith.constant 6.400000e+01 : f32
    %89 = vector.broadcast %cst_72 : f32 to vector<8x1xf32>
    %90 = arith.divf %88, %89 : vector<8x1xf32>
    %91 = vector.broadcast %83 : vector<8x1xf32> to vector<8x64xf32>
    %92 = arith.subf %78, %91 : vector<8x64xf32>
    %cst_73 = arith.constant 9.99999974E-6 : f32
    %93 = vector.broadcast %cst_73 : f32 to vector<8x1xf32>
    %94 = arith.addf %90, %93 : vector<8x1xf32>
    %95 = math.rsqrt %94 : vector<8x1xf32>
    %96 = vector.broadcast %95 : vector<8x1xf32> to vector<8x64xf32>
    %97 = arith.mulf %92, %96 : vector<8x64xf32>
    %cst_74 = arith.constant 0.000000e+00 : f32
    %98 = vector.broadcast %cst_74 : f32 to vector<8x64xf32>
    %99 = arith.cmpf oge, %97, %98 : vector<8x64xf32>
    %100 = vector.broadcast %79 : f32 to vector<8x64xf32>
    %101 = arith.mulf %100, %97 : vector<8x64xf32>
    %102 = arith.select %99, %97, %101 : vector<8x64xi1>, vector<8x64xf32>
    %103 = arith.truncf %102 : vector<8x64xf32> to vector<8x64xbf16>
    %cst_75 = arith.constant 0.000000e+00 : f32
    %104 = vector.broadcast %cst_75 : f32 to vector<16x16xf32>
    %c0_76 = arith.constant 0 : index
    %c0_77 = arith.constant 0 : index
    %c0_78 = arith.constant 0 : index
    %105 = vector.load %arg6[%c0_76, %c0_77, %c0_78] : memref<9x64x16xbf16, #tpu.memory_space<vmem>>, vector<1x64x16xbf16>
    %106 = vector.shape_cast %105 : vector<1x64x16xbf16> to vector<64x16xbf16>
    %cst_79 = arith.constant dense<0.000000e+00> : vector<8x16xf32>
    %107 = tpu.matmul %103, %106, %cst_79 {dimension_numbers = #tpu.dot_dimension_numbers<[1], [0], [0], [1], [0, 0, 1, 1], [], []>} : vector<8x64xbf16>, vector<64x16xbf16>, vector<8x16xf32> -> vector<8x16xf32>
    %c0_80 = arith.constant 0 : index
    %c0_81 = arith.constant 0 : index
    %c0_82 = arith.constant 0 : index
    %108 = vector.load %arg7[%c0_80, %c0_81, %c0_82] : memref<9x16x8xbf16, #tpu.memory_space<vmem>>, vector<1x16x8xbf16>
    %109 = vector.shape_cast %108 : vector<1x16x8xbf16> to vector<16x8xbf16>
    %110 = arith.truncf %107 : vector<8x16xf32> to vector<8x16xbf16>
    %cst_83 = arith.constant dense<0.000000e+00> : vector<16x16xf32>
    %111 = tpu.matmul %109, %110, %cst_83 {dimension_numbers = #tpu.dot_dimension_numbers<[1], [0], [0], [1], [0, 0, 1, 1], [], []>} : vector<16x8xbf16>, vector<8x16xbf16>, vector<16x16xf32> -> vector<16x16xf32>
    %112 = arith.addf %104, %111 : vector<16x16xf32>
    %c1_84 = arith.constant 1 : index
    %c0_85 = arith.constant 0 : index
    %c0_86 = arith.constant 0 : index
    %113 = vector.load %arg6[%c1_84, %c0_85, %c0_86] : memref<9x64x16xbf16, #tpu.memory_space<vmem>>, vector<1x64x16xbf16>
    %114 = vector.shape_cast %113 : vector<1x64x16xbf16> to vector<64x16xbf16>
    %cst_87 = arith.constant dense<0.000000e+00> : vector<8x16xf32>
    %115 = tpu.matmul %103, %114, %cst_87 {dimension_numbers = #tpu.dot_dimension_numbers<[1], [0], [0], [1], [0, 0, 1, 1], [], []>} : vector<8x64xbf16>, vector<64x16xbf16>, vector<8x16xf32> -> vector<8x16xf32>
    %c1_88 = arith.constant 1 : index
    %c0_89 = arith.constant 0 : index
    %c0_90 = arith.constant 0 : index
    %116 = vector.load %arg7[%c1_88, %c0_89, %c0_90] : memref<9x16x8xbf16, #tpu.memory_space<vmem>>, vector<1x16x8xbf16>
    %117 = vector.shape_cast %116 : vector<1x16x8xbf16> to vector<16x8xbf16>
    %118 = arith.truncf %115 : vector<8x16xf32> to vector<8x16xbf16>
    %cst_91 = arith.constant dense<0.000000e+00> : vector<16x16xf32>
    %119 = tpu.matmul %117, %118, %cst_91 {dimension_numbers = #tpu.dot_dimension_numbers<[1], [0], [0], [1], [0, 0, 1, 1], [], []>} : vector<16x8xbf16>, vector<8x16xbf16>, vector<16x16xf32> -> vector<16x16xf32>
    %120 = arith.addf %112, %119 : vector<16x16xf32>
    %c2_92 = arith.constant 2 : index
    %c0_93 = arith.constant 0 : index
    %c0_94 = arith.constant 0 : index
    %121 = vector.load %arg6[%c2_92, %c0_93, %c0_94] : memref<9x64x16xbf16, #tpu.memory_space<vmem>>, vector<1x64x16xbf16>
    %122 = vector.shape_cast %121 : vector<1x64x16xbf16> to vector<64x16xbf16>
    %cst_95 = arith.constant dense<0.000000e+00> : vector<8x16xf32>
    %123 = tpu.matmul %103, %122, %cst_95 {dimension_numbers = #tpu.dot_dimension_numbers<[1], [0], [0], [1], [0, 0, 1, 1], [], []>} : vector<8x64xbf16>, vector<64x16xbf16>, vector<8x16xf32> -> vector<8x16xf32>
    %c2_96 = arith.constant 2 : index
    %c0_97 = arith.constant 0 : index
    %c0_98 = arith.constant 0 : index
    %124 = vector.load %arg7[%c2_96, %c0_97, %c0_98] : memref<9x16x8xbf16, #tpu.memory_space<vmem>>, vector<1x16x8xbf16>
    %125 = vector.shape_cast %124 : vector<1x16x8xbf16> to vector<16x8xbf16>
    %126 = arith.truncf %123 : vector<8x16xf32> to vector<8x16xbf16>
    %cst_99 = arith.constant dense<0.000000e+00> : vector<16x16xf32>
    %127 = tpu.matmul %125, %126, %cst_99 {dimension_numbers = #tpu.dot_dimension_numbers<[1], [0], [0], [1], [0, 0, 1, 1], [], []>} : vector<16x8xbf16>, vector<8x16xbf16>, vector<16x16xf32> -> vector<16x16xf32>
    %128 = arith.addf %120, %127 : vector<16x16xf32>
    %c3_100 = arith.constant 3 : index
    %c0_101 = arith.constant 0 : index
    %c0_102 = arith.constant 0 : index
    %129 = vector.load %arg6[%c3_100, %c0_101, %c0_102] : memref<9x64x16xbf16, #tpu.memory_space<vmem>>, vector<1x64x16xbf16>
    %130 = vector.shape_cast %129 : vector<1x64x16xbf16> to vector<64x16xbf16>
    %cst_103 = arith.constant dense<0.000000e+00> : vector<8x16xf32>
    %131 = tpu.matmul %103, %130, %cst_103 {dimension_numbers = #tpu.dot_dimension_numbers<[1], [0], [0], [1], [0, 0, 1, 1], [], []>} : vector<8x64xbf16>, vector<64x16xbf16>, vector<8x16xf32> -> vector<8x16xf32>
    %c3_104 = arith.constant 3 : index
    %c0_105 = arith.constant 0 : index
    %c0_106 = arith.constant 0 : index
    %132 = vector.load %arg7[%c3_104, %c0_105, %c0_106] : memref<9x16x8xbf16, #tpu.memory_space<vmem>>, vector<1x16x8xbf16>
    %133 = vector.shape_cast %132 : vector<1x16x8xbf16> to vector<16x8xbf16>
    %134 = arith.truncf %131 : vector<8x16xf32> to vector<8x16xbf16>
    %cst_107 = arith.constant dense<0.000000e+00> : vector<16x16xf32>
    %135 = tpu.matmul %133, %134, %cst_107 {dimension_numbers = #tpu.dot_dimension_numbers<[1], [0], [0], [1], [0, 0, 1, 1], [], []>} : vector<16x8xbf16>, vector<8x16xbf16>, vector<16x16xf32> -> vector<16x16xf32>
    %136 = arith.addf %128, %135 : vector<16x16xf32>
    %c4_108 = arith.constant 4 : index
    %c0_109 = arith.constant 0 : index
    %c0_110 = arith.constant 0 : index
    %137 = vector.load %arg6[%c4_108, %c0_109, %c0_110] : memref<9x64x16xbf16, #tpu.memory_space<vmem>>, vector<1x64x16xbf16>
    %138 = vector.shape_cast %137 : vector<1x64x16xbf16> to vector<64x16xbf16>
    %cst_111 = arith.constant dense<0.000000e+00> : vector<8x16xf32>
    %139 = tpu.matmul %103, %138, %cst_111 {dimension_numbers = #tpu.dot_dimension_numbers<[1], [0], [0], [1], [0, 0, 1, 1], [], []>} : vector<8x64xbf16>, vector<64x16xbf16>, vector<8x16xf32> -> vector<8x16xf32>
    %c4_112 = arith.constant 4 : index
    %c0_113 = arith.constant 0 : index
    %c0_114 = arith.constant 0 : index
    %140 = vector.load %arg7[%c4_112, %c0_113, %c0_114] : memref<9x16x8xbf16, #tpu.memory_space<vmem>>, vector<1x16x8xbf16>
    %141 = vector.shape_cast %140 : vector<1x16x8xbf16> to vector<16x8xbf16>
    %142 = arith.truncf %139 : vector<8x16xf32> to vector<8x16xbf16>
    %cst_115 = arith.constant dense<0.000000e+00> : vector<16x16xf32>
    %143 = tpu.matmul %141, %142, %cst_115 {dimension_numbers = #tpu.dot_dimension_numbers<[1], [0], [0], [1], [0, 0, 1, 1], [], []>} : vector<16x8xbf16>, vector<8x16xbf16>, vector<16x16xf32> -> vector<16x16xf32>
    %144 = arith.addf %136, %143 : vector<16x16xf32>
    %c5_116 = arith.constant 5 : index
    %c0_117 = arith.constant 0 : index
    %c0_118 = arith.constant 0 : index
    %145 = vector.load %arg6[%c5_116, %c0_117, %c0_118] : memref<9x64x16xbf16, #tpu.memory_space<vmem>>, vector<1x64x16xbf16>
    %146 = vector.shape_cast %145 : vector<1x64x16xbf16> to vector<64x16xbf16>
    %cst_119 = arith.constant dense<0.000000e+00> : vector<8x16xf32>
    %147 = tpu.matmul %103, %146, %cst_119 {dimension_numbers = #tpu.dot_dimension_numbers<[1], [0], [0], [1], [0, 0, 1, 1], [], []>} : vector<8x64xbf16>, vector<64x16xbf16>, vector<8x16xf32> -> vector<8x16xf32>
    %c5_120 = arith.constant 5 : index
    %c0_121 = arith.constant 0 : index
    %c0_122 = arith.constant 0 : index
    %148 = vector.load %arg7[%c5_120, %c0_121, %c0_122] : memref<9x16x8xbf16, #tpu.memory_space<vmem>>, vector<1x16x8xbf16>
    %149 = vector.shape_cast %148 : vector<1x16x8xbf16> to vector<16x8xbf16>
    %150 = arith.truncf %147 : vector<8x16xf32> to vector<8x16xbf16>
    %cst_123 = arith.constant dense<0.000000e+00> : vector<16x16xf32>
    %151 = tpu.matmul %149, %150, %cst_123 {dimension_numbers = #tpu.dot_dimension_numbers<[1], [0], [0], [1], [0, 0, 1, 1], [], []>} : vector<16x8xbf16>, vector<8x16xbf16>, vector<16x16xf32> -> vector<16x16xf32>
    %152 = arith.addf %144, %151 : vector<16x16xf32>
    %c6_124 = arith.constant 6 : index
    %c0_125 = arith.constant 0 : index
    %c0_126 = arith.constant 0 : index
    %153 = vector.load %arg6[%c6_124, %c0_125, %c0_126] : memref<9x64x16xbf16, #tpu.memory_space<vmem>>, vector<1x64x16xbf16>
    %154 = vector.shape_cast %153 : vector<1x64x16xbf16> to vector<64x16xbf16>
    %cst_127 = arith.constant dense<0.000000e+00> : vector<8x16xf32>
    %155 = tpu.matmul %103, %154, %cst_127 {dimension_numbers = #tpu.dot_dimension_numbers<[1], [0], [0], [1], [0, 0, 1, 1], [], []>} : vector<8x64xbf16>, vector<64x16xbf16>, vector<8x16xf32> -> vector<8x16xf32>
    %c6_128 = arith.constant 6 : index
    %c0_129 = arith.constant 0 : index
    %c0_130 = arith.constant 0 : index
    %156 = vector.load %arg7[%c6_128, %c0_129, %c0_130] : memref<9x16x8xbf16, #tpu.memory_space<vmem>>, vector<1x16x8xbf16>
    %157 = vector.shape_cast %156 : vector<1x16x8xbf16> to vector<16x8xbf16>
    %158 = arith.truncf %155 : vector<8x16xf32> to vector<8x16xbf16>
    %cst_131 = arith.constant dense<0.000000e+00> : vector<16x16xf32>
    %159 = tpu.matmul %157, %158, %cst_131 {dimension_numbers = #tpu.dot_dimension_numbers<[1], [0], [0], [1], [0, 0, 1, 1], [], []>} : vector<16x8xbf16>, vector<8x16xbf16>, vector<16x16xf32> -> vector<16x16xf32>
    %160 = arith.addf %152, %159 : vector<16x16xf32>
    %c7_132 = arith.constant 7 : index
    %c0_133 = arith.constant 0 : index
    %c0_134 = arith.constant 0 : index
    %161 = vector.load %arg6[%c7_132, %c0_133, %c0_134] : memref<9x64x16xbf16, #tpu.memory_space<vmem>>, vector<1x64x16xbf16>
    %162 = vector.shape_cast %161 : vector<1x64x16xbf16> to vector<64x16xbf16>
    %cst_135 = arith.constant dense<0.000000e+00> : vector<8x16xf32>
    %163 = tpu.matmul %103, %162, %cst_135 {dimension_numbers = #tpu.dot_dimension_numbers<[1], [0], [0], [1], [0, 0, 1, 1], [], []>} : vector<8x64xbf16>, vector<64x16xbf16>, vector<8x16xf32> -> vector<8x16xf32>
    %c7_136 = arith.constant 7 : index
    %c0_137 = arith.constant 0 : index
    %c0_138 = arith.constant 0 : index
    %164 = vector.load %arg7[%c7_136, %c0_137, %c0_138] : memref<9x16x8xbf16, #tpu.memory_space<vmem>>, vector<1x16x8xbf16>
    %165 = vector.shape_cast %164 : vector<1x16x8xbf16> to vector<16x8xbf16>
    %166 = arith.truncf %163 : vector<8x16xf32> to vector<8x16xbf16>
    %cst_139 = arith.constant dense<0.000000e+00> : vector<16x16xf32>
    %167 = tpu.matmul %165, %166, %cst_139 {dimension_numbers = #tpu.dot_dimension_numbers<[1], [0], [0], [1], [0, 0, 1, 1], [], []>} : vector<16x8xbf16>, vector<8x16xbf16>, vector<16x16xf32> -> vector<16x16xf32>
    %168 = arith.addf %160, %167 : vector<16x16xf32>
    %c8_140 = arith.constant 8 : index
    %c0_141 = arith.constant 0 : index
    %c0_142 = arith.constant 0 : index
    %169 = vector.load %arg6[%c8_140, %c0_141, %c0_142] : memref<9x64x16xbf16, #tpu.memory_space<vmem>>, vector<1x64x16xbf16>
    %170 = vector.shape_cast %169 : vector<1x64x16xbf16> to vector<64x16xbf16>
    %cst_143 = arith.constant dense<0.000000e+00> : vector<8x16xf32>
    %171 = tpu.matmul %103, %170, %cst_143 {dimension_numbers = #tpu.dot_dimension_numbers<[1], [0], [0], [1], [0, 0, 1, 1], [], []>} : vector<8x64xbf16>, vector<64x16xbf16>, vector<8x16xf32> -> vector<8x16xf32>
    %c8_144 = arith.constant 8 : index
    %c0_145 = arith.constant 0 : index
    %c0_146 = arith.constant 0 : index
    %172 = vector.load %arg7[%c8_144, %c0_145, %c0_146] : memref<9x16x8xbf16, #tpu.memory_space<vmem>>, vector<1x16x8xbf16>
    %173 = vector.shape_cast %172 : vector<1x16x8xbf16> to vector<16x8xbf16>
    %174 = arith.truncf %171 : vector<8x16xf32> to vector<8x16xbf16>
    %cst_147 = arith.constant dense<0.000000e+00> : vector<16x16xf32>
    %175 = tpu.matmul %173, %174, %cst_147 {dimension_numbers = #tpu.dot_dimension_numbers<[1], [0], [0], [1], [0, 0, 1, 1], [], []>} : vector<16x8xbf16>, vector<8x16xbf16>, vector<16x16xf32> -> vector<16x16xf32>
    %176 = arith.addf %168, %175 : vector<16x16xf32>
    %c0_148 = arith.constant 0 : index
    %c0_149 = arith.constant 0 : index
    %177 = vector.load %arg8[%c0_148, %c0_149] : memref<16x1xf32, #tpu.memory_space<vmem>>, vector<16x1xf32>
    %178 = vector.broadcast %177 : vector<16x1xf32> to vector<16x16xf32>
    %179 = arith.addf %176, %178 : vector<16x16xf32>
    %c1_150 = arith.constant 1 : index
    %180 = memref.load %arg1[%c1_150] : memref<3xf32, #tpu.memory_space<smem>>
    %cst_151 = arith.constant dense<0.000000e+00> : vector<16xf32>
    %181 = vector.multi_reduction <add>, %179, %cst_151 [1] : vector<16x16xf32> to vector<16xf32>
    %182 = vector.shape_cast %181 : vector<16xf32> to vector<16x1xf32>
    %cst_152 = arith.constant 1.600000e+01 : f32
    %183 = vector.broadcast %cst_152 : f32 to vector<16x1xf32>
    %184 = arith.divf %182, %183 : vector<16x1xf32>
    %185 = vector.broadcast %184 : vector<16x1xf32> to vector<16x16xf32>
    %186 = arith.subf %179, %185 : vector<16x16xf32>
    %187 = arith.mulf %186, %186 : vector<16x16xf32>
    %cst_153 = arith.constant dense<0.000000e+00> : vector<16xf32>
    %188 = vector.multi_reduction <add>, %187, %cst_153 [1] : vector<16x16xf32> to vector<16xf32>
    %189 = vector.shape_cast %188 : vector<16xf32> to vector<16x1xf32>
    %cst_154 = arith.constant 1.600000e+01 : f32
    %190 = vector.broadcast %cst_154 : f32 to vector<16x1xf32>
    %191 = arith.divf %189, %190 : vector<16x1xf32>
    %192 = vector.broadcast %184 : vector<16x1xf32> to vector<16x16xf32>
    %193 = arith.subf %179, %192 : vector<16x16xf32>
    %cst_155 = arith.constant 9.99999974E-6 : f32
    %194 = vector.broadcast %cst_155 : f32 to vector<16x1xf32>
    %195 = arith.addf %191, %194 : vector<16x1xf32>
    %196 = math.rsqrt %195 : vector<16x1xf32>
    %197 = vector.broadcast %196 : vector<16x1xf32> to vector<16x16xf32>
    %198 = arith.mulf %193, %197 : vector<16x16xf32>
    %cst_156 = arith.constant 0.000000e+00 : f32
    %199 = vector.broadcast %cst_156 : f32 to vector<16x16xf32>
    %200 = arith.cmpf oge, %198, %199 : vector<16x16xf32>
    %201 = vector.broadcast %180 : f32 to vector<16x16xf32>
    %202 = arith.mulf %201, %198 : vector<16x16xf32>
    %203 = arith.select %200, %198, %202 : vector<16x16xi1>, vector<16x16xf32>
    %204 = vector.extract_strided_slice %203 {offsets = [0, 0], sizes = [1, 16], strides = [1, 1]} : vector<16x16xf32> to vector<1x16xf32>
    %205 = vector.extract_strided_slice %203 {offsets = [1, 0], sizes = [1, 16], strides = [1, 1]} : vector<16x16xf32> to vector<1x16xf32>
    %206 = vector.extract_strided_slice %203 {offsets = [2, 0], sizes = [1, 16], strides = [1, 1]} : vector<16x16xf32> to vector<1x16xf32>
    %207 = vector.extract_strided_slice %203 {offsets = [3, 0], sizes = [1, 16], strides = [1, 1]} : vector<16x16xf32> to vector<1x16xf32>
    %208 = vector.extract_strided_slice %203 {offsets = [4, 0], sizes = [1, 16], strides = [1, 1]} : vector<16x16xf32> to vector<1x16xf32>
    %209 = vector.extract_strided_slice %203 {offsets = [5, 0], sizes = [1, 16], strides = [1, 1]} : vector<16x16xf32> to vector<1x16xf32>
    %210 = vector.extract_strided_slice %203 {offsets = [6, 0], sizes = [1, 16], strides = [1, 1]} : vector<16x16xf32> to vector<1x16xf32>
    %211 = vector.extract_strided_slice %203 {offsets = [7, 0], sizes = [1, 16], strides = [1, 1]} : vector<16x16xf32> to vector<1x16xf32>
    %212 = vector.extract_strided_slice %203 {offsets = [8, 0], sizes = [1, 16], strides = [1, 1]} : vector<16x16xf32> to vector<1x16xf32>
    %213 = vector.extract_strided_slice %203 {offsets = [9, 0], sizes = [1, 16], strides = [1, 1]} : vector<16x16xf32> to vector<1x16xf32>
    %214 = vector.extract_strided_slice %203 {offsets = [10, 0], sizes = [1, 16], strides = [1, 1]} : vector<16x16xf32> to vector<1x16xf32>
    %215 = vector.extract_strided_slice %203 {offsets = [11, 0], sizes = [1, 16], strides = [1, 1]} : vector<16x16xf32> to vector<1x16xf32>
    %216 = vector.extract_strided_slice %203 {offsets = [12, 0], sizes = [1, 16], strides = [1, 1]} : vector<16x16xf32> to vector<1x16xf32>
    %217 = vector.extract_strided_slice %203 {offsets = [13, 0], sizes = [1, 16], strides = [1, 1]} : vector<16x16xf32> to vector<1x16xf32>
    %218 = vector.extract_strided_slice %203 {offsets = [14, 0], sizes = [1, 16], strides = [1, 1]} : vector<16x16xf32> to vector<1x16xf32>
    %219 = vector.extract_strided_slice %203 {offsets = [15, 0], sizes = [1, 16], strides = [1, 1]} : vector<16x16xf32> to vector<1x16xf32>
    %220 = tpu.concatenate %204, %205, %206, %207, %208, %209, %210, %211, %212, %213, %214, %215, %216, %217, %218, %219 in 1 : vector<1x16xf32>, vector<1x16xf32>, vector<1x16xf32>, vector<1x16xf32>, vector<1x16xf32>, vector<1x16xf32>, vector<1x16xf32>, vector<1x16xf32>, vector<1x16xf32>, vector<1x16xf32>, vector<1x16xf32>, vector<1x16xf32>, vector<1x16xf32>, vector<1x16xf32>, vector<1x16xf32>, vector<1x16xf32> -> vector<1x256xf32>
    %c0_157 = arith.constant 0 : index
    %c0_158 = arith.constant 0 : index
    %221 = vector.load %arg9[%c0_157, %c0_158] : memref<256x32xf32, #tpu.memory_space<vmem>>, vector<256x32xf32>
    %cst_159 = arith.constant dense<0.000000e+00> : vector<1x32xf32>
    %222 = tpu.matmul %220, %221, %cst_159 {dimension_numbers = #tpu.dot_dimension_numbers<[1], [0], [0], [1], [0, 0, 1, 1], [], []>} : vector<1x256xf32>, vector<256x32xf32>, vector<1x32xf32> -> vector<1x32xf32>
    %c0_160 = arith.constant 0 : index
    %c0_161 = arith.constant 0 : index
    %223 = vector.load %arg10[%c0_160, %c0_161] : memref<1x32xf32, #tpu.memory_space<vmem>>, vector<1x32xf32>
    %224 = arith.addf %222, %223 : vector<1x32xf32>
    %c0_162 = arith.constant 0 : index
    %c0_163 = arith.constant 0 : index
    %225 = vector.load %arg11[%c0_162, %c0_163] : memref<256x32xf32, #tpu.memory_space<vmem>>, vector<256x32xf32>
    %cst_164 = arith.constant dense<0.000000e+00> : vector<1x32xf32>
    %226 = tpu.matmul %220, %225, %cst_164 {dimension_numbers = #tpu.dot_dimension_numbers<[1], [0], [0], [1], [0, 0, 1, 1], [], []>} : vector<1x256xf32>, vector<256x32xf32>, vector<1x32xf32> -> vector<1x32xf32>
    %c0_165 = arith.constant 0 : index
    %c0_166 = arith.constant 0 : index
    %227 = vector.load %arg12[%c0_165, %c0_166] : memref<1x32xf32, #tpu.memory_space<vmem>>, vector<1x32xf32>
    %228 = arith.addf %226, %227 : vector<1x32xf32>
    %cst_167 = arith.constant 5.000000e-01 : f32
    %229 = vector.broadcast %cst_167 : f32 to vector<1x32xf32>
    %230 = arith.mulf %229, %228 : vector<1x32xf32>
    %231 = math.exp %230 : vector<1x32xf32>
    %232 = arith.addf %224, %231 : vector<1x32xf32>
    %c0_168 = arith.constant 0 : index
    %c0_169 = arith.constant 0 : index
    %233 = vector.load %arg13[%c0_168, %c0_169] : memref<32x256xf32, #tpu.memory_space<vmem>>, vector<32x256xf32>
    %cst_170 = arith.constant dense<0.000000e+00> : vector<1x256xf32>
    %234 = tpu.matmul %232, %233, %cst_170 {dimension_numbers = #tpu.dot_dimension_numbers<[1], [0], [0], [1], [0, 0, 1, 1], [], []>} : vector<1x32xf32>, vector<32x256xf32>, vector<1x256xf32> -> vector<1x256xf32>
    %c0_171 = arith.constant 0 : index
    %c0_172 = arith.constant 0 : index
    %235 = vector.load %arg14[%c0_171, %c0_172] : memref<1x256xf32, #tpu.memory_space<vmem>>, vector<1x256xf32>
    %236 = arith.addf %234, %235 : vector<1x256xf32>
    %cst_173 = arith.constant 0.000000e+00 : f32
    %237 = vector.broadcast %cst_173 : f32 to vector<1x256xf32>
    %238 = arith.maximumf %236, %237 : vector<1x256xf32>
    %239 = vector.extract_strided_slice %238 {offsets = [0, 0], sizes = [1, 16], strides = [1, 1]} : vector<1x256xf32> to vector<1x16xf32>
    %240 = vector.extract_strided_slice %238 {offsets = [0, 16], sizes = [1, 16], strides = [1, 1]} : vector<1x256xf32> to vector<1x16xf32>
    %241 = vector.extract_strided_slice %238 {offsets = [0, 32], sizes = [1, 16], strides = [1, 1]} : vector<1x256xf32> to vector<1x16xf32>
    %242 = vector.extract_strided_slice %238 {offsets = [0, 48], sizes = [1, 16], strides = [1, 1]} : vector<1x256xf32> to vector<1x16xf32>
    %243 = vector.extract_strided_slice %238 {offsets = [0, 64], sizes = [1, 16], strides = [1, 1]} : vector<1x256xf32> to vector<1x16xf32>
    %244 = vector.extract_strided_slice %238 {offsets = [0, 80], sizes = [1, 16], strides = [1, 1]} : vector<1x256xf32> to vector<1x16xf32>
    %245 = vector.extract_strided_slice %238 {offsets = [0, 96], sizes = [1, 16], strides = [1, 1]} : vector<1x256xf32> to vector<1x16xf32>
    %246 = vector.extract_strided_slice %238 {offsets = [0, 112], sizes = [1, 16], strides = [1, 1]} : vector<1x256xf32> to vector<1x16xf32>
    %247 = vector.extract_strided_slice %238 {offsets = [0, 128], sizes = [1, 16], strides = [1, 1]} : vector<1x256xf32> to vector<1x16xf32>
    %248 = vector.extract_strided_slice %238 {offsets = [0, 144], sizes = [1, 16], strides = [1, 1]} : vector<1x256xf32> to vector<1x16xf32>
    %249 = vector.extract_strided_slice %238 {offsets = [0, 160], sizes = [1, 16], strides = [1, 1]} : vector<1x256xf32> to vector<1x16xf32>
    %250 = vector.extract_strided_slice %238 {offsets = [0, 176], sizes = [1, 16], strides = [1, 1]} : vector<1x256xf32> to vector<1x16xf32>
    %251 = vector.extract_strided_slice %238 {offsets = [0, 192], sizes = [1, 16], strides = [1, 1]} : vector<1x256xf32> to vector<1x16xf32>
    %252 = vector.extract_strided_slice %238 {offsets = [0, 208], sizes = [1, 16], strides = [1, 1]} : vector<1x256xf32> to vector<1x16xf32>
    %253 = vector.extract_strided_slice %238 {offsets = [0, 224], sizes = [1, 16], strides = [1, 1]} : vector<1x256xf32> to vector<1x16xf32>
    %254 = vector.extract_strided_slice %238 {offsets = [0, 240], sizes = [1, 16], strides = [1, 1]} : vector<1x256xf32> to vector<1x16xf32>
    %255 = tpu.concatenate %239, %240, %241, %242, %243, %244, %245, %246, %247, %248, %249, %250, %251, %252, %253, %254 in 0 : vector<1x16xf32>, vector<1x16xf32>, vector<1x16xf32>, vector<1x16xf32>, vector<1x16xf32>, vector<1x16xf32>, vector<1x16xf32>, vector<1x16xf32>, vector<1x16xf32>, vector<1x16xf32>, vector<1x16xf32>, vector<1x16xf32>, vector<1x16xf32>, vector<1x16xf32>, vector<1x16xf32>, vector<1x16xf32> -> vector<16x16xf32>
    %256 = arith.truncf %255 : vector<16x16xf32> to vector<16x16xbf16>
    %cst_174 = arith.constant 0.000000e+00 : f32
    %257 = vector.broadcast %cst_174 : f32 to vector<8x64xf32>
    %c0_175 = arith.constant 0 : index
    %c0_176 = arith.constant 0 : index
    %c0_177 = arith.constant 0 : index
    %258 = vector.load %arg15[%c0_175, %c0_176, %c0_177] : memref<9x16x64xbf16, #tpu.memory_space<vmem>>, vector<1x16x64xbf16>
    %259 = vector.shape_cast %258 : vector<1x16x64xbf16> to vector<16x64xbf16>
    %cst_178 = arith.constant dense<0.000000e+00> : vector<16x64xf32>
    %260 = tpu.matmul %256, %259, %cst_178 {dimension_numbers = #tpu.dot_dimension_numbers<[1], [0], [0], [1], [0, 0, 1, 1], [], []>} : vector<16x16xbf16>, vector<16x64xbf16>, vector<16x64xf32> -> vector<16x64xf32>
    %c0_179 = arith.constant 0 : index
    %c0_180 = arith.constant 0 : index
    %c0_181 = arith.constant 0 : index
    %261 = vector.load %arg16[%c0_179, %c0_180, %c0_181] : memref<9x8x16xbf16, #tpu.memory_space<vmem>>, vector<1x8x16xbf16>
    %262 = vector.shape_cast %261 : vector<1x8x16xbf16> to vector<8x16xbf16>
    %263 = arith.truncf %260 : vector<16x64xf32> to vector<16x64xbf16>
    %cst_182 = arith.constant dense<0.000000e+00> : vector<8x64xf32>
    %264 = tpu.matmul %262, %263, %cst_182 {dimension_numbers = #tpu.dot_dimension_numbers<[1], [0], [0], [1], [0, 0, 1, 1], [], []>} : vector<8x16xbf16>, vector<16x64xbf16>, vector<8x64xf32> -> vector<8x64xf32>
    %265 = arith.addf %257, %264 : vector<8x64xf32>
    %c1_183 = arith.constant 1 : index
    %c0_184 = arith.constant 0 : index
    %c0_185 = arith.constant 0 : index
    %266 = vector.load %arg15[%c1_183, %c0_184, %c0_185] : memref<9x16x64xbf16, #tpu.memory_space<vmem>>, vector<1x16x64xbf16>
    %267 = vector.shape_cast %266 : vector<1x16x64xbf16> to vector<16x64xbf16>
    %cst_186 = arith.constant dense<0.000000e+00> : vector<16x64xf32>
    %268 = tpu.matmul %256, %267, %cst_186 {dimension_numbers = #tpu.dot_dimension_numbers<[1], [0], [0], [1], [0, 0, 1, 1], [], []>} : vector<16x16xbf16>, vector<16x64xbf16>, vector<16x64xf32> -> vector<16x64xf32>
    %c1_187 = arith.constant 1 : index
    %c0_188 = arith.constant 0 : index
    %c0_189 = arith.constant 0 : index
    %269 = vector.load %arg16[%c1_187, %c0_188, %c0_189] : memref<9x8x16xbf16, #tpu.memory_space<vmem>>, vector<1x8x16xbf16>
    %270 = vector.shape_cast %269 : vector<1x8x16xbf16> to vector<8x16xbf16>
    %271 = arith.truncf %268 : vector<16x64xf32> to vector<16x64xbf16>
    %cst_190 = arith.constant dense<0.000000e+00> : vector<8x64xf32>
    %272 = tpu.matmul %270, %271, %cst_190 {dimension_numbers = #tpu.dot_dimension_numbers<[1], [0], [0], [1], [0, 0, 1, 1], [], []>} : vector<8x16xbf16>, vector<16x64xbf16>, vector<8x64xf32> -> vector<8x64xf32>
    %273 = arith.addf %265, %272 : vector<8x64xf32>
    %c2_191 = arith.constant 2 : index
    %c0_192 = arith.constant 0 : index
    %c0_193 = arith.constant 0 : index
    %274 = vector.load %arg15[%c2_191, %c0_192, %c0_193] : memref<9x16x64xbf16, #tpu.memory_space<vmem>>, vector<1x16x64xbf16>
    %275 = vector.shape_cast %274 : vector<1x16x64xbf16> to vector<16x64xbf16>
    %cst_194 = arith.constant dense<0.000000e+00> : vector<16x64xf32>
    %276 = tpu.matmul %256, %275, %cst_194 {dimension_numbers = #tpu.dot_dimension_numbers<[1], [0], [0], [1], [0, 0, 1, 1], [], []>} : vector<16x16xbf16>, vector<16x64xbf16>, vector<16x64xf32> -> vector<16x64xf32>
    %c2_195 = arith.constant 2 : index
    %c0_196 = arith.constant 0 : index
    %c0_197 = arith.constant 0 : index
    %277 = vector.load %arg16[%c2_195, %c0_196, %c0_197] : memref<9x8x16xbf16, #tpu.memory_space<vmem>>, vector<1x8x16xbf16>
    %278 = vector.shape_cast %277 : vector<1x8x16xbf16> to vector<8x16xbf16>
    %279 = arith.truncf %276 : vector<16x64xf32> to vector<16x64xbf16>
    %cst_198 = arith.constant dense<0.000000e+00> : vector<8x64xf32>
    %280 = tpu.matmul %278, %279, %cst_198 {dimension_numbers = #tpu.dot_dimension_numbers<[1], [0], [0], [1], [0, 0, 1, 1], [], []>} : vector<8x16xbf16>, vector<16x64xbf16>, vector<8x64xf32> -> vector<8x64xf32>
    %281 = arith.addf %273, %280 : vector<8x64xf32>
    %c3_199 = arith.constant 3 : index
    %c0_200 = arith.constant 0 : index
    %c0_201 = arith.constant 0 : index
    %282 = vector.load %arg15[%c3_199, %c0_200, %c0_201] : memref<9x16x64xbf16, #tpu.memory_space<vmem>>, vector<1x16x64xbf16>
    %283 = vector.shape_cast %282 : vector<1x16x64xbf16> to vector<16x64xbf16>
    %cst_202 = arith.constant dense<0.000000e+00> : vector<16x64xf32>
    %284 = tpu.matmul %256, %283, %cst_202 {dimension_numbers = #tpu.dot_dimension_numbers<[1], [0], [0], [1], [0, 0, 1, 1], [], []>} : vector<16x16xbf16>, vector<16x64xbf16>, vector<16x64xf32> -> vector<16x64xf32>
    %c3_203 = arith.constant 3 : index
    %c0_204 = arith.constant 0 : index
    %c0_205 = arith.constant 0 : index
    %285 = vector.load %arg16[%c3_203, %c0_204, %c0_205] : memref<9x8x16xbf16, #tpu.memory_space<vmem>>, vector<1x8x16xbf16>
    %286 = vector.shape_cast %285 : vector<1x8x16xbf16> to vector<8x16xbf16>
    %287 = arith.truncf %284 : vector<16x64xf32> to vector<16x64xbf16>
    %cst_206 = arith.constant dense<0.000000e+00> : vector<8x64xf32>
    %288 = tpu.matmul %286, %287, %cst_206 {dimension_numbers = #tpu.dot_dimension_numbers<[1], [0], [0], [1], [0, 0, 1, 1], [], []>} : vector<8x16xbf16>, vector<16x64xbf16>, vector<8x64xf32> -> vector<8x64xf32>
    %289 = arith.addf %281, %288 : vector<8x64xf32>
    %c4_207 = arith.constant 4 : index
    %c0_208 = arith.constant 0 : index
    %c0_209 = arith.constant 0 : index
    %290 = vector.load %arg15[%c4_207, %c0_208, %c0_209] : memref<9x16x64xbf16, #tpu.memory_space<vmem>>, vector<1x16x64xbf16>
    %291 = vector.shape_cast %290 : vector<1x16x64xbf16> to vector<16x64xbf16>
    %cst_210 = arith.constant dense<0.000000e+00> : vector<16x64xf32>
    %292 = tpu.matmul %256, %291, %cst_210 {dimension_numbers = #tpu.dot_dimension_numbers<[1], [0], [0], [1], [0, 0, 1, 1], [], []>} : vector<16x16xbf16>, vector<16x64xbf16>, vector<16x64xf32> -> vector<16x64xf32>
    %c4_211 = arith.constant 4 : index
    %c0_212 = arith.constant 0 : index
    %c0_213 = arith.constant 0 : index
    %293 = vector.load %arg16[%c4_211, %c0_212, %c0_213] : memref<9x8x16xbf16, #tpu.memory_space<vmem>>, vector<1x8x16xbf16>
    %294 = vector.shape_cast %293 : vector<1x8x16xbf16> to vector<8x16xbf16>
    %295 = arith.truncf %292 : vector<16x64xf32> to vector<16x64xbf16>
    %cst_214 = arith.constant dense<0.000000e+00> : vector<8x64xf32>
    %296 = tpu.matmul %294, %295, %cst_214 {dimension_numbers = #tpu.dot_dimension_numbers<[1], [0], [0], [1], [0, 0, 1, 1], [], []>} : vector<8x16xbf16>, vector<16x64xbf16>, vector<8x64xf32> -> vector<8x64xf32>
    %297 = arith.addf %289, %296 : vector<8x64xf32>
    %c5_215 = arith.constant 5 : index
    %c0_216 = arith.constant 0 : index
    %c0_217 = arith.constant 0 : index
    %298 = vector.load %arg15[%c5_215, %c0_216, %c0_217] : memref<9x16x64xbf16, #tpu.memory_space<vmem>>, vector<1x16x64xbf16>
    %299 = vector.shape_cast %298 : vector<1x16x64xbf16> to vector<16x64xbf16>
    %cst_218 = arith.constant dense<0.000000e+00> : vector<16x64xf32>
    %300 = tpu.matmul %256, %299, %cst_218 {dimension_numbers = #tpu.dot_dimension_numbers<[1], [0], [0], [1], [0, 0, 1, 1], [], []>} : vector<16x16xbf16>, vector<16x64xbf16>, vector<16x64xf32> -> vector<16x64xf32>
    %c5_219 = arith.constant 5 : index
    %c0_220 = arith.constant 0 : index
    %c0_221 = arith.constant 0 : index
    %301 = vector.load %arg16[%c5_219, %c0_220, %c0_221] : memref<9x8x16xbf16, #tpu.memory_space<vmem>>, vector<1x8x16xbf16>
    %302 = vector.shape_cast %301 : vector<1x8x16xbf16> to vector<8x16xbf16>
    %303 = arith.truncf %300 : vector<16x64xf32> to vector<16x64xbf16>
    %cst_222 = arith.constant dense<0.000000e+00> : vector<8x64xf32>
    %304 = tpu.matmul %302, %303, %cst_222 {dimension_numbers = #tpu.dot_dimension_numbers<[1], [0], [0], [1], [0, 0, 1, 1], [], []>} : vector<8x16xbf16>, vector<16x64xbf16>, vector<8x64xf32> -> vector<8x64xf32>
    %305 = arith.addf %297, %304 : vector<8x64xf32>
    %c6_223 = arith.constant 6 : index
    %c0_224 = arith.constant 0 : index
    %c0_225 = arith.constant 0 : index
    %306 = vector.load %arg15[%c6_223, %c0_224, %c0_225] : memref<9x16x64xbf16, #tpu.memory_space<vmem>>, vector<1x16x64xbf16>
    %307 = vector.shape_cast %306 : vector<1x16x64xbf16> to vector<16x64xbf16>
    %cst_226 = arith.constant dense<0.000000e+00> : vector<16x64xf32>
    %308 = tpu.matmul %256, %307, %cst_226 {dimension_numbers = #tpu.dot_dimension_numbers<[1], [0], [0], [1], [0, 0, 1, 1], [], []>} : vector<16x16xbf16>, vector<16x64xbf16>, vector<16x64xf32> -> vector<16x64xf32>
    %c6_227 = arith.constant 6 : index
    %c0_228 = arith.constant 0 : index
    %c0_229 = arith.constant 0 : index
    %309 = vector.load %arg16[%c6_227, %c0_228, %c0_229] : memref<9x8x16xbf16, #tpu.memory_space<vmem>>, vector<1x8x16xbf16>
    %310 = vector.shape_cast %309 : vector<1x8x16xbf16> to vector<8x16xbf16>
    %311 = arith.truncf %308 : vector<16x64xf32> to vector<16x64xbf16>
    %cst_230 = arith.constant dense<0.000000e+00> : vector<8x64xf32>
    %312 = tpu.matmul %310, %311, %cst_230 {dimension_numbers = #tpu.dot_dimension_numbers<[1], [0], [0], [1], [0, 0, 1, 1], [], []>} : vector<8x16xbf16>, vector<16x64xbf16>, vector<8x64xf32> -> vector<8x64xf32>
    %313 = arith.addf %305, %312 : vector<8x64xf32>
    %c7_231 = arith.constant 7 : index
    %c0_232 = arith.constant 0 : index
    %c0_233 = arith.constant 0 : index
    %314 = vector.load %arg15[%c7_231, %c0_232, %c0_233] : memref<9x16x64xbf16, #tpu.memory_space<vmem>>, vector<1x16x64xbf16>
    %315 = vector.shape_cast %314 : vector<1x16x64xbf16> to vector<16x64xbf16>
    %cst_234 = arith.constant dense<0.000000e+00> : vector<16x64xf32>
    %316 = tpu.matmul %256, %315, %cst_234 {dimension_numbers = #tpu.dot_dimension_numbers<[1], [0], [0], [1], [0, 0, 1, 1], [], []>} : vector<16x16xbf16>, vector<16x64xbf16>, vector<16x64xf32> -> vector<16x64xf32>
    %c7_235 = arith.constant 7 : index
    %c0_236 = arith.constant 0 : index
    %c0_237 = arith.constant 0 : index
    %317 = vector.load %arg16[%c7_235, %c0_236, %c0_237] : memref<9x8x16xbf16, #tpu.memory_space<vmem>>, vector<1x8x16xbf16>
    %318 = vector.shape_cast %317 : vector<1x8x16xbf16> to vector<8x16xbf16>
    %319 = arith.truncf %316 : vector<16x64xf32> to vector<16x64xbf16>
    %cst_238 = arith.constant dense<0.000000e+00> : vector<8x64xf32>
    %320 = tpu.matmul %318, %319, %cst_238 {dimension_numbers = #tpu.dot_dimension_numbers<[1], [0], [0], [1], [0, 0, 1, 1], [], []>} : vector<8x16xbf16>, vector<16x64xbf16>, vector<8x64xf32> -> vector<8x64xf32>
    %321 = arith.addf %313, %320 : vector<8x64xf32>
    %c8_239 = arith.constant 8 : index
    %c0_240 = arith.constant 0 : index
    %c0_241 = arith.constant 0 : index
    %322 = vector.load %arg15[%c8_239, %c0_240, %c0_241] : memref<9x16x64xbf16, #tpu.memory_space<vmem>>, vector<1x16x64xbf16>
    %323 = vector.shape_cast %322 : vector<1x16x64xbf16> to vector<16x64xbf16>
    %cst_242 = arith.constant dense<0.000000e+00> : vector<16x64xf32>
    %324 = tpu.matmul %256, %323, %cst_242 {dimension_numbers = #tpu.dot_dimension_numbers<[1], [0], [0], [1], [0, 0, 1, 1], [], []>} : vector<16x16xbf16>, vector<16x64xbf16>, vector<16x64xf32> -> vector<16x64xf32>
    %c8_243 = arith.constant 8 : index
    %c0_244 = arith.constant 0 : index
    %c0_245 = arith.constant 0 : index
    %325 = vector.load %arg16[%c8_243, %c0_244, %c0_245] : memref<9x8x16xbf16, #tpu.memory_space<vmem>>, vector<1x8x16xbf16>
    %326 = vector.shape_cast %325 : vector<1x8x16xbf16> to vector<8x16xbf16>
    %327 = arith.truncf %324 : vector<16x64xf32> to vector<16x64xbf16>
    %cst_246 = arith.constant dense<0.000000e+00> : vector<8x64xf32>
    %328 = tpu.matmul %326, %327, %cst_246 {dimension_numbers = #tpu.dot_dimension_numbers<[1], [0], [0], [1], [0, 0, 1, 1], [], []>} : vector<8x16xbf16>, vector<16x64xbf16>, vector<8x64xf32> -> vector<8x64xf32>
    %329 = arith.addf %321, %328 : vector<8x64xf32>
    %c0_247 = arith.constant 0 : index
    %c0_248 = arith.constant 0 : index
    %330 = vector.load %arg17[%c0_247, %c0_248] : memref<8x1xf32, #tpu.memory_space<vmem>>, vector<8x1xf32>
    %331 = vector.broadcast %330 : vector<8x1xf32> to vector<8x64xf32>
    %332 = arith.addf %329, %331 : vector<8x64xf32>
    %c2_249 = arith.constant 2 : index
    %333 = memref.load %arg1[%c2_249] : memref<3xf32, #tpu.memory_space<smem>>
    %cst_250 = arith.constant dense<0.000000e+00> : vector<8xf32>
    %334 = vector.multi_reduction <add>, %332, %cst_250 [1] : vector<8x64xf32> to vector<8xf32>
    %335 = vector.shape_cast %334 : vector<8xf32> to vector<8x1xf32>
    %cst_251 = arith.constant 6.400000e+01 : f32
    %336 = vector.broadcast %cst_251 : f32 to vector<8x1xf32>
    %337 = arith.divf %335, %336 : vector<8x1xf32>
    %338 = vector.broadcast %337 : vector<8x1xf32> to vector<8x64xf32>
    %339 = arith.subf %332, %338 : vector<8x64xf32>
    %340 = arith.mulf %339, %339 : vector<8x64xf32>
    %cst_252 = arith.constant dense<0.000000e+00> : vector<8xf32>
    %341 = vector.multi_reduction <add>, %340, %cst_252 [1] : vector<8x64xf32> to vector<8xf32>
    %342 = vector.shape_cast %341 : vector<8xf32> to vector<8x1xf32>
    %cst_253 = arith.constant 6.400000e+01 : f32
    %343 = vector.broadcast %cst_253 : f32 to vector<8x1xf32>
    %344 = arith.divf %342, %343 : vector<8x1xf32>
    %345 = vector.broadcast %337 : vector<8x1xf32> to vector<8x64xf32>
    %346 = arith.subf %332, %345 : vector<8x64xf32>
    %cst_254 = arith.constant 9.99999974E-6 : f32
    %347 = vector.broadcast %cst_254 : f32 to vector<8x1xf32>
    %348 = arith.addf %344, %347 : vector<8x1xf32>
    %349 = math.rsqrt %348 : vector<8x1xf32>
    %350 = vector.broadcast %349 : vector<8x1xf32> to vector<8x64xf32>
    %351 = arith.mulf %346, %350 : vector<8x64xf32>
    %cst_255 = arith.constant 0.000000e+00 : f32
    %352 = vector.broadcast %cst_255 : f32 to vector<8x64xf32>
    %353 = arith.cmpf oge, %351, %352 : vector<8x64xf32>
    %354 = vector.broadcast %333 : f32 to vector<8x64xf32>
    %355 = arith.mulf %354, %351 : vector<8x64xf32>
    %356 = arith.select %353, %351, %355 : vector<8x64xi1>, vector<8x64xf32>
    %357 = arith.truncf %356 : vector<8x64xf32> to vector<8x64xbf16>
    %cst_256 = arith.constant 0.000000e+00 : f32
    %358 = vector.broadcast %cst_256 : f32 to vector<4x256xf32>
    %c0_257 = arith.constant 0 : index
    %c0_258 = arith.constant 0 : index
    %c0_259 = arith.constant 0 : index
    %359 = vector.load %arg18[%c0_257, %c0_258, %c0_259] : memref<9x64x256xbf16, #tpu.memory_space<vmem>>, vector<1x64x256xbf16>
    %360 = vector.shape_cast %359 : vector<1x64x256xbf16> to vector<64x256xbf16>
    %cst_260 = arith.constant dense<0.000000e+00> : vector<8x256xf32>
    %361 = tpu.matmul %357, %360, %cst_260 {dimension_numbers = #tpu.dot_dimension_numbers<[1], [0], [0], [1], [0, 0, 1, 1], [], []>} : vector<8x64xbf16>, vector<64x256xbf16>, vector<8x256xf32> -> vector<8x256xf32>
    %c0_261 = arith.constant 0 : index
    %c0_262 = arith.constant 0 : index
    %c0_263 = arith.constant 0 : index
    %362 = vector.load %arg19[%c0_261, %c0_262, %c0_263] : memref<9x4x8xbf16, #tpu.memory_space<vmem>>, vector<1x4x8xbf16>
    %363 = vector.shape_cast %362 : vector<1x4x8xbf16> to vector<4x8xbf16>
    %364 = arith.truncf %361 : vector<8x256xf32> to vector<8x256xbf16>
    %cst_264 = arith.constant dense<0.000000e+00> : vector<4x256xf32>
    %365 = tpu.matmul %363, %364, %cst_264 {dimension_numbers = #tpu.dot_dimension_numbers<[1], [0], [0], [1], [0, 0, 1, 1], [], []>} : vector<4x8xbf16>, vector<8x256xbf16>, vector<4x256xf32> -> vector<4x256xf32>
    %366 = arith.addf %358, %365 : vector<4x256xf32>
    %c1_265 = arith.constant 1 : index
    %c0_266 = arith.constant 0 : index
    %c0_267 = arith.constant 0 : index
    %367 = vector.load %arg18[%c1_265, %c0_266, %c0_267] : memref<9x64x256xbf16, #tpu.memory_space<vmem>>, vector<1x64x256xbf16>
    %368 = vector.shape_cast %367 : vector<1x64x256xbf16> to vector<64x256xbf16>
    %cst_268 = arith.constant dense<0.000000e+00> : vector<8x256xf32>
    %369 = tpu.matmul %357, %368, %cst_268 {dimension_numbers = #tpu.dot_dimension_numbers<[1], [0], [0], [1], [0, 0, 1, 1], [], []>} : vector<8x64xbf16>, vector<64x256xbf16>, vector<8x256xf32> -> vector<8x256xf32>
    %c1_269 = arith.constant 1 : index
    %c0_270 = arith.constant 0 : index
    %c0_271 = arith.constant 0 : index
    %370 = vector.load %arg19[%c1_269, %c0_270, %c0_271] : memref<9x4x8xbf16, #tpu.memory_space<vmem>>, vector<1x4x8xbf16>
    %371 = vector.shape_cast %370 : vector<1x4x8xbf16> to vector<4x8xbf16>
    %372 = arith.truncf %369 : vector<8x256xf32> to vector<8x256xbf16>
    %cst_272 = arith.constant dense<0.000000e+00> : vector<4x256xf32>
    %373 = tpu.matmul %371, %372, %cst_272 {dimension_numbers = #tpu.dot_dimension_numbers<[1], [0], [0], [1], [0, 0, 1, 1], [], []>} : vector<4x8xbf16>, vector<8x256xbf16>, vector<4x256xf32> -> vector<4x256xf32>
    %374 = arith.addf %366, %373 : vector<4x256xf32>
    %c2_273 = arith.constant 2 : index
    %c0_274 = arith.constant 0 : index
    %c0_275 = arith.constant 0 : index
    %375 = vector.load %arg18[%c2_273, %c0_274, %c0_275] : memref<9x64x256xbf16, #tpu.memory_space<vmem>>, vector<1x64x256xbf16>
    %376 = vector.shape_cast %375 : vector<1x64x256xbf16> to vector<64x256xbf16>
    %cst_276 = arith.constant dense<0.000000e+00> : vector<8x256xf32>
    %377 = tpu.matmul %357, %376, %cst_276 {dimension_numbers = #tpu.dot_dimension_numbers<[1], [0], [0], [1], [0, 0, 1, 1], [], []>} : vector<8x64xbf16>, vector<64x256xbf16>, vector<8x256xf32> -> vector<8x256xf32>
    %c2_277 = arith.constant 2 : index
    %c0_278 = arith.constant 0 : index
    %c0_279 = arith.constant 0 : index
    %378 = vector.load %arg19[%c2_277, %c0_278, %c0_279] : memref<9x4x8xbf16, #tpu.memory_space<vmem>>, vector<1x4x8xbf16>
    %379 = vector.shape_cast %378 : vector<1x4x8xbf16> to vector<4x8xbf16>
    %380 = arith.truncf %377 : vector<8x256xf32> to vector<8x256xbf16>
    %cst_280 = arith.constant dense<0.000000e+00> : vector<4x256xf32>
    %381 = tpu.matmul %379, %380, %cst_280 {dimension_numbers = #tpu.dot_dimension_numbers<[1], [0], [0], [1], [0, 0, 1, 1], [], []>} : vector<4x8xbf16>, vector<8x256xbf16>, vector<4x256xf32> -> vector<4x256xf32>
    %382 = arith.addf %374, %381 : vector<4x256xf32>
    %c3_281 = arith.constant 3 : index
    %c0_282 = arith.constant 0 : index
    %c0_283 = arith.constant 0 : index
    %383 = vector.load %arg18[%c3_281, %c0_282, %c0_283] : memref<9x64x256xbf16, #tpu.memory_space<vmem>>, vector<1x64x256xbf16>
    %384 = vector.shape_cast %383 : vector<1x64x256xbf16> to vector<64x256xbf16>
    %cst_284 = arith.constant dense<0.000000e+00> : vector<8x256xf32>
    %385 = tpu.matmul %357, %384, %cst_284 {dimension_numbers = #tpu.dot_dimension_numbers<[1], [0], [0], [1], [0, 0, 1, 1], [], []>} : vector<8x64xbf16>, vector<64x256xbf16>, vector<8x256xf32> -> vector<8x256xf32>
    %c3_285 = arith.constant 3 : index
    %c0_286 = arith.constant 0 : index
    %c0_287 = arith.constant 0 : index
    %386 = vector.load %arg19[%c3_285, %c0_286, %c0_287] : memref<9x4x8xbf16, #tpu.memory_space<vmem>>, vector<1x4x8xbf16>
    %387 = vector.shape_cast %386 : vector<1x4x8xbf16> to vector<4x8xbf16>
    %388 = arith.truncf %385 : vector<8x256xf32> to vector<8x256xbf16>
    %cst_288 = arith.constant dense<0.000000e+00> : vector<4x256xf32>
    %389 = tpu.matmul %387, %388, %cst_288 {dimension_numbers = #tpu.dot_dimension_numbers<[1], [0], [0], [1], [0, 0, 1, 1], [], []>} : vector<4x8xbf16>, vector<8x256xbf16>, vector<4x256xf32> -> vector<4x256xf32>
    %390 = arith.addf %382, %389 : vector<4x256xf32>
    %c4_289 = arith.constant 4 : index
    %c0_290 = arith.constant 0 : index
    %c0_291 = arith.constant 0 : index
    %391 = vector.load %arg18[%c4_289, %c0_290, %c0_291] : memref<9x64x256xbf16, #tpu.memory_space<vmem>>, vector<1x64x256xbf16>
    %392 = vector.shape_cast %391 : vector<1x64x256xbf16> to vector<64x256xbf16>
    %cst_292 = arith.constant dense<0.000000e+00> : vector<8x256xf32>
    %393 = tpu.matmul %357, %392, %cst_292 {dimension_numbers = #tpu.dot_dimension_numbers<[1], [0], [0], [1], [0, 0, 1, 1], [], []>} : vector<8x64xbf16>, vector<64x256xbf16>, vector<8x256xf32> -> vector<8x256xf32>
    %c4_293 = arith.constant 4 : index
    %c0_294 = arith.constant 0 : index
    %c0_295 = arith.constant 0 : index
    %394 = vector.load %arg19[%c4_293, %c0_294, %c0_295] : memref<9x4x8xbf16, #tpu.memory_space<vmem>>, vector<1x4x8xbf16>
    %395 = vector.shape_cast %394 : vector<1x4x8xbf16> to vector<4x8xbf16>
    %396 = arith.truncf %393 : vector<8x256xf32> to vector<8x256xbf16>
    %cst_296 = arith.constant dense<0.000000e+00> : vector<4x256xf32>
    %397 = tpu.matmul %395, %396, %cst_296 {dimension_numbers = #tpu.dot_dimension_numbers<[1], [0], [0], [1], [0, 0, 1, 1], [], []>} : vector<4x8xbf16>, vector<8x256xbf16>, vector<4x256xf32> -> vector<4x256xf32>
    %398 = arith.addf %390, %397 : vector<4x256xf32>
    %c5_297 = arith.constant 5 : index
    %c0_298 = arith.constant 0 : index
    %c0_299 = arith.constant 0 : index
    %399 = vector.load %arg18[%c5_297, %c0_298, %c0_299] : memref<9x64x256xbf16, #tpu.memory_space<vmem>>, vector<1x64x256xbf16>
    %400 = vector.shape_cast %399 : vector<1x64x256xbf16> to vector<64x256xbf16>
    %cst_300 = arith.constant dense<0.000000e+00> : vector<8x256xf32>
    %401 = tpu.matmul %357, %400, %cst_300 {dimension_numbers = #tpu.dot_dimension_numbers<[1], [0], [0], [1], [0, 0, 1, 1], [], []>} : vector<8x64xbf16>, vector<64x256xbf16>, vector<8x256xf32> -> vector<8x256xf32>
    %c5_301 = arith.constant 5 : index
    %c0_302 = arith.constant 0 : index
    %c0_303 = arith.constant 0 : index
    %402 = vector.load %arg19[%c5_301, %c0_302, %c0_303] : memref<9x4x8xbf16, #tpu.memory_space<vmem>>, vector<1x4x8xbf16>
    %403 = vector.shape_cast %402 : vector<1x4x8xbf16> to vector<4x8xbf16>
    %404 = arith.truncf %401 : vector<8x256xf32> to vector<8x256xbf16>
    %cst_304 = arith.constant dense<0.000000e+00> : vector<4x256xf32>
    %405 = tpu.matmul %403, %404, %cst_304 {dimension_numbers = #tpu.dot_dimension_numbers<[1], [0], [0], [1], [0, 0, 1, 1], [], []>} : vector<4x8xbf16>, vector<8x256xbf16>, vector<4x256xf32> -> vector<4x256xf32>
    %406 = arith.addf %398, %405 : vector<4x256xf32>
    %c6_305 = arith.constant 6 : index
    %c0_306 = arith.constant 0 : index
    %c0_307 = arith.constant 0 : index
    %407 = vector.load %arg18[%c6_305, %c0_306, %c0_307] : memref<9x64x256xbf16, #tpu.memory_space<vmem>>, vector<1x64x256xbf16>
    %408 = vector.shape_cast %407 : vector<1x64x256xbf16> to vector<64x256xbf16>
    %cst_308 = arith.constant dense<0.000000e+00> : vector<8x256xf32>
    %409 = tpu.matmul %357, %408, %cst_308 {dimension_numbers = #tpu.dot_dimension_numbers<[1], [0], [0], [1], [0, 0, 1, 1], [], []>} : vector<8x64xbf16>, vector<64x256xbf16>, vector<8x256xf32> -> vector<8x256xf32>
    %c6_309 = arith.constant 6 : index
    %c0_310 = arith.constant 0 : index
    %c0_311 = arith.constant 0 : index
    %410 = vector.load %arg19[%c6_309, %c0_310, %c0_311] : memref<9x4x8xbf16, #tpu.memory_space<vmem>>, vector<1x4x8xbf16>
    %411 = vector.shape_cast %410 : vector<1x4x8xbf16> to vector<4x8xbf16>
    %412 = arith.truncf %409 : vector<8x256xf32> to vector<8x256xbf16>
    %cst_312 = arith.constant dense<0.000000e+00> : vector<4x256xf32>
    %413 = tpu.matmul %411, %412, %cst_312 {dimension_numbers = #tpu.dot_dimension_numbers<[1], [0], [0], [1], [0, 0, 1, 1], [], []>} : vector<4x8xbf16>, vector<8x256xbf16>, vector<4x256xf32> -> vector<4x256xf32>
    %414 = arith.addf %406, %413 : vector<4x256xf32>
    %c7_313 = arith.constant 7 : index
    %c0_314 = arith.constant 0 : index
    %c0_315 = arith.constant 0 : index
    %415 = vector.load %arg18[%c7_313, %c0_314, %c0_315] : memref<9x64x256xbf16, #tpu.memory_space<vmem>>, vector<1x64x256xbf16>
    %416 = vector.shape_cast %415 : vector<1x64x256xbf16> to vector<64x256xbf16>
    %cst_316 = arith.constant dense<0.000000e+00> : vector<8x256xf32>
    %417 = tpu.matmul %357, %416, %cst_316 {dimension_numbers = #tpu.dot_dimension_numbers<[1], [0], [0], [1], [0, 0, 1, 1], [], []>} : vector<8x64xbf16>, vector<64x256xbf16>, vector<8x256xf32> -> vector<8x256xf32>
    %c7_317 = arith.constant 7 : index
    %c0_318 = arith.constant 0 : index
    %c0_319 = arith.constant 0 : index
    %418 = vector.load %arg19[%c7_317, %c0_318, %c0_319] : memref<9x4x8xbf16, #tpu.memory_space<vmem>>, vector<1x4x8xbf16>
    %419 = vector.shape_cast %418 : vector<1x4x8xbf16> to vector<4x8xbf16>
    %420 = arith.truncf %417 : vector<8x256xf32> to vector<8x256xbf16>
    %cst_320 = arith.constant dense<0.000000e+00> : vector<4x256xf32>
    %421 = tpu.matmul %419, %420, %cst_320 {dimension_numbers = #tpu.dot_dimension_numbers<[1], [0], [0], [1], [0, 0, 1, 1], [], []>} : vector<4x8xbf16>, vector<8x256xbf16>, vector<4x256xf32> -> vector<4x256xf32>
    %422 = arith.addf %414, %421 : vector<4x256xf32>
    %c8_321 = arith.constant 8 : index
    %c0_322 = arith.constant 0 : index
    %c0_323 = arith.constant 0 : index
    %423 = vector.load %arg18[%c8_321, %c0_322, %c0_323] : memref<9x64x256xbf16, #tpu.memory_space<vmem>>, vector<1x64x256xbf16>
    %424 = vector.shape_cast %423 : vector<1x64x256xbf16> to vector<64x256xbf16>
    %cst_324 = arith.constant dense<0.000000e+00> : vector<8x256xf32>
    %425 = tpu.matmul %357, %424, %cst_324 {dimension_numbers = #tpu.dot_dimension_numbers<[1], [0], [0], [1], [0, 0, 1, 1], [], []>} : vector<8x64xbf16>, vector<64x256xbf16>, vector<8x256xf32> -> vector<8x256xf32>
    %c8_325 = arith.constant 8 : index
    %c0_326 = arith.constant 0 : index
    %c0_327 = arith.constant 0 : index
    %426 = vector.load %arg19[%c8_325, %c0_326, %c0_327] : memref<9x4x8xbf16, #tpu.memory_space<vmem>>, vector<1x4x8xbf16>
    %427 = vector.shape_cast %426 : vector<1x4x8xbf16> to vector<4x8xbf16>
    %428 = arith.truncf %425 : vector<8x256xf32> to vector<8x256xbf16>
    %cst_328 = arith.constant dense<0.000000e+00> : vector<4x256xf32>
    %429 = tpu.matmul %427, %428, %cst_328 {dimension_numbers = #tpu.dot_dimension_numbers<[1], [0], [0], [1], [0, 0, 1, 1], [], []>} : vector<4x8xbf16>, vector<8x256xbf16>, vector<4x256xf32> -> vector<4x256xf32>
    %430 = arith.addf %422, %429 : vector<4x256xf32>
    %c0_329 = arith.constant 0 : index
    %c0_330 = arith.constant 0 : index
    %431 = vector.load %arg20[%c0_329, %c0_330] : memref<4x1xf32, #tpu.memory_space<vmem>>, vector<4x1xf32>
    %432 = vector.broadcast %431 : vector<4x1xf32> to vector<4x256xf32>
    %433 = arith.addf %430, %432 : vector<4x256xf32>
    %cst_331 = arith.constant 0.000000e+00 : f32
    %434 = vector.broadcast %cst_331 : f32 to vector<4x256xf32>
    %435 = arith.subf %434, %433 : vector<4x256xf32>
    %436 = math.exp %435 : vector<4x256xf32>
    %cst_332 = arith.constant 1.000000e+00 : f32
    %437 = vector.broadcast %cst_332 : f32 to vector<4x256xf32>
    %438 = arith.addf %437, %436 : vector<4x256xf32>
    %cst_333 = arith.constant 1.000000e+00 : f32
    %439 = vector.broadcast %cst_333 : f32 to vector<4x256xf32>
    %440 = arith.divf %439, %438 : vector<4x256xf32>
    %c0_334 = arith.constant 0 : index
    %c0_335 = arith.constant 0 : index
    %c0_336 = arith.constant 0 : index
    %441 = vector.load %arg21[%c0_334, %c0_335, %c0_336] : memref<1x4x256xf32, #tpu.memory_space<vmem>>, vector<1x4x256xf32>
    %442 = vector.shape_cast %441 : vector<1x4x256xf32> to vector<4x256xf32>
    %443 = vector.shape_cast %440 : vector<4x256xf32> to vector<1x4x256xf32>
    tpu.vector_store %arg21[%c0_334, %c0_335, %c0_336], %443 {strides = array<i32>} : memref<1x4x256xf32, #tpu.memory_space<vmem>>, vector<1x4x256xf32>,
    %c0_337 = arith.constant 0 : index
    %c0_338 = arith.constant 0 : index
    %c0_339 = arith.constant 0 : index
    %444 = vector.load %arg22[%c0_337, %c0_338, %c0_339] : memref<1x1x32xf32, #tpu.memory_space<vmem>>, vector<1x1x32xf32>
    %445 = vector.shape_cast %444 : vector<1x1x32xf32> to vector<1x32xf32>
    %446 = vector.shape_cast %224 : vector<1x32xf32> to vector<1x1x32xf32>
    tpu.vector_store %arg22[%c0_337, %c0_338, %c0_339], %446 {strides = array<i32>} : memref<1x1x32xf32, #tpu.memory_space<vmem>>, vector<1x1x32xf32>,
    %c0_340 = arith.constant 0 : index
    %c0_341 = arith.constant 0 : index
    %c0_342 = arith.constant 0 : index
    %447 = vector.load %arg23[%c0_340, %c0_341, %c0_342] : memref<1x1x32xf32, #tpu.memory_space<vmem>>, vector<1x1x32xf32>
    %448 = vector.shape_cast %447 : vector<1x1x32xf32> to vector<1x32xf32>
    %449 = vector.shape_cast %228 : vector<1x32xf32> to vector<1x1x32xf32>
    tpu.vector_store %arg23[%c0_340, %c0_341, %c0_342], %449 {strides = array<i32>} : memref<1x1x32xf32, #tpu.memory_space<vmem>>, vector<1x1x32xf32>,
    %c0_343 = arith.constant 0 : index
    %c0_344 = arith.constant 0 : index
    %c0_345 = arith.constant 0 : index
    %450 = vector.load %arg24[%c0_343, %c0_344, %c0_345] : memref<1x1x32xf32, #tpu.memory_space<vmem>>, vector<1x1x32xf32>
    %451 = vector.shape_cast %450 : vector<1x1x32xf32> to vector<1x32xf32>
    %452 = vector.shape_cast %232 : vector<1x32xf32> to vector<1x1x32xf32>
    tpu.vector_store %arg24[%c0_343, %c0_344, %c0_345], %452 {strides = array<i32>} : memref<1x1x32xf32, #tpu.memory_space<vmem>>, vector<1x1x32xf32>,
    return
  }
  func.func @transform_0(%arg0: i32) -> i32 {
    %c0_i32 = arith.constant 0 : i32
    %c0_i32_0 = arith.constant 0 : i32
    return %c0_i32 : i32
  }
  func.func @transform_1(%arg0: i32) -> (i32, i32, i32) {
    %c0_i32 = arith.constant 0 : i32
    %c0_i32_0 = arith.constant 0 : i32
    %c0_i32_1 = arith.constant 0 : i32
    return %arg0, %c0_i32, %c0_i32_0 : i32, i32, i32
  }
  func.func @transform_2(%arg0: i32) -> (i32, i32, i32) {
    %c0_i32 = arith.constant 0 : i32
    %c0_i32_0 = arith.constant 0 : i32
    %c0_i32_1 = arith.constant 0 : i32
    %c0_i32_2 = arith.constant 0 : i32
    return %c0_i32, %c0_i32_0, %c0_i32_1 : i32, i32, i32
  }
  func.func @transform_3(%arg0: i32) -> (i32, i32, i32) {
    %c0_i32 = arith.constant 0 : i32
    %c0_i32_0 = arith.constant 0 : i32
    %c0_i32_1 = arith.constant 0 : i32
    %c0_i32_2 = arith.constant 0 : i32
    return %c0_i32, %c0_i32_0, %c0_i32_1 : i32, i32, i32
  }
  func.func @transform_4(%arg0: i32) -> (i32, i32) {
    %c0_i32 = arith.constant 0 : i32
    %c0_i32_0 = arith.constant 0 : i32
    %c0_i32_1 = arith.constant 0 : i32
    return %c0_i32, %c0_i32_0 : i32, i32
  }
  func.func @transform_5(%arg0: i32) -> (i32, i32, i32) {
    %c0_i32 = arith.constant 0 : i32
    %c0_i32_0 = arith.constant 0 : i32
    %c0_i32_1 = arith.constant 0 : i32
    %c0_i32_2 = arith.constant 0 : i32
    return %c0_i32, %c0_i32_0, %c0_i32_1 : i32, i32, i32
  }
  func.func @transform_6(%arg0: i32) -> (i32, i32, i32) {
    %c0_i32 = arith.constant 0 : i32
    %c0_i32_0 = arith.constant 0 : i32
    %c0_i32_1 = arith.constant 0 : i32
    %c0_i32_2 = arith.constant 0 : i32
    return %c0_i32, %c0_i32_0, %c0_i32_1 : i32, i32, i32
  }
  func.func @transform_7(%arg0: i32) -> (i32, i32) {
    %c0_i32 = arith.constant 0 : i32
    %c0_i32_0 = arith.constant 0 : i32
    %c0_i32_1 = arith.constant 0 : i32
    return %c0_i32, %c0_i32_0 : i32, i32
  }
  func.func @transform_8(%arg0: i32) -> (i32, i32) {
    %c0_i32 = arith.constant 0 : i32
    %c0_i32_0 = arith.constant 0 : i32
    %c0_i32_1 = arith.constant 0 : i32
    return %c0_i32, %c0_i32_0 : i32, i32
  }
  func.func @transform_9(%arg0: i32) -> (i32, i32) {
    %c0_i32 = arith.constant 0 : i32
    %c0_i32_0 = arith.constant 0 : i32
    %c0_i32_1 = arith.constant 0 : i32
    return %c0_i32, %c0_i32_0 : i32, i32
  }
  func.func @transform_10(%arg0: i32) -> (i32, i32) {
    %c0_i32 = arith.constant 0 : i32
    %c0_i32_0 = arith.constant 0 : i32
    %c0_i32_1 = arith.constant 0 : i32
    return %c0_i32, %c0_i32_0 : i32, i32
  }
  func.func @transform_11(%arg0: i32) -> (i32, i32) {
    %c0_i32 = arith.constant 0 : i32
    %c0_i32_0 = arith.constant 0 : i32
    %c0_i32_1 = arith.constant 0 : i32
    return %c0_i32, %c0_i32_0 : i32, i32
  }
  func.func @transform_12(%arg0: i32) -> (i32, i32) {
    %c0_i32 = arith.constant 0 : i32
    %c0_i32_0 = arith.constant 0 : i32
    %c0_i32_1 = arith.constant 0 : i32
    return %c0_i32, %c0_i32_0 : i32, i32
  }
  func.func @transform_13(%arg0: i32) -> (i32, i32) {
    %c0_i32 = arith.constant 0 : i32
    %c0_i32_0 = arith.constant 0 : i32
    %c0_i32_1 = arith.constant 0 : i32
    return %c0_i32, %c0_i32_0 : i32, i32
  }
  func.func @transform_14(%arg0: i32) -> (i32, i32, i32) {
    %c0_i32 = arith.constant 0 : i32
    %c0_i32_0 = arith.constant 0 : i32
    %c0_i32_1 = arith.constant 0 : i32
    %c0_i32_2 = arith.constant 0 : i32
    return %c0_i32, %c0_i32_0, %c0_i32_1 : i32, i32, i32
  }
  func.func @transform_15(%arg0: i32) -> (i32, i32, i32) {
    %c0_i32 = arith.constant 0 : i32
    %c0_i32_0 = arith.constant 0 : i32
    %c0_i32_1 = arith.constant 0 : i32
    %c0_i32_2 = arith.constant 0 : i32
    return %c0_i32, %c0_i32_0, %c0_i32_1 : i32, i32, i32
  }
  func.func @transform_16(%arg0: i32) -> (i32, i32) {
    %c0_i32 = arith.constant 0 : i32
    %c0_i32_0 = arith.constant 0 : i32
    %c0_i32_1 = arith.constant 0 : i32
    return %c0_i32, %c0_i32_0 : i32, i32
  }
  func.func @transform_17(%arg0: i32) -> (i32, i32, i32) {
    %c0_i32 = arith.constant 0 : i32
    %c0_i32_0 = arith.constant 0 : i32
    %c0_i32_1 = arith.constant 0 : i32
    %c0_i32_2 = arith.constant 0 : i32
    return %c0_i32, %c0_i32_0, %c0_i32_1 : i32, i32, i32
  }
  func.func @transform_18(%arg0: i32) -> (i32, i32, i32) {
    %c0_i32 = arith.constant 0 : i32
    %c0_i32_0 = arith.constant 0 : i32
    %c0_i32_1 = arith.constant 0 : i32
    %c0_i32_2 = arith.constant 0 : i32
    return %c0_i32, %c0_i32_0, %c0_i32_1 : i32, i32, i32
  }
  func.func @transform_19(%arg0: i32) -> (i32, i32) {
    %c0_i32 = arith.constant 0 : i32
    %c0_i32_0 = arith.constant 0 : i32
    %c0_i32_1 = arith.constant 0 : i32
    return %c0_i32, %c0_i32_0 : i32, i32
  }
  func.func @transform_20(%arg0: i32) -> (i32, i32, i32) {
    %c0_i32 = arith.constant 0 : i32
    %c0_i32_0 = arith.constant 0 : i32
    %c0_i32_1 = arith.constant 0 : i32
    return %arg0, %c0_i32, %c0_i32_0 : i32, i32, i32
  }
  func.func @transform_21(%arg0: i32) -> (i32, i32, i32) {
    %c0_i32 = arith.constant 0 : i32
    %c0_i32_0 = arith.constant 0 : i32
    %c0_i32_1 = arith.constant 0 : i32
    return %arg0, %c0_i32, %c0_i32_0 : i32, i32, i32
  }
  func.func @transform_22(%arg0: i32) -> (i32, i32, i32) {
    %c0_i32 = arith.constant 0 : i32
    %c0_i32_0 = arith.constant 0 : i32
    %c0_i32_1 = arith.constant 0 : i32
    return %arg0, %c0_i32, %c0_i32_0 : i32, i32, i32
  }
  func.func @transform_23(%arg0: i32) -> (i32, i32, i32) {
    %c0_i32 = arith.constant 0 : i32
    %c0_i32_0 = arith.constant 0 : i32
    %c0_i32_1 = arith.constant 0 : i32
    return %arg0, %c0_i32, %c0_i32_0 : i32, i32, i32
  }
}

</mosaic_0001>

<bundles_post_ra>
// kernel: _lambda_.1
= control target key start
LH: loop header
LB: loop body
LE: loop exit
PB: predicated region body
PF: predicated region fallthrough
CT: control target
= control target key end

     0   :  { %s11502_s0 = inlined_call_operand.vmem [shape: f32[3], index: 0, kind: input, shape index: {}]   ;;  %s11503_s1 = inlined_call_operand.vmem [shape: f32[2,4,256], index: 1, kind: input, shape index: {}]   ;;  %s11504_s2 = inlined_call_operand.vmem [shape: bf16[9,256,64], index: 2, kind: input, shape index: {}]   ;;  %s11505_s3 = inlined_call_operand.hbm [shape: bf16[9,8,4], index: 3, kind: input, shape index: {}]   ;;  %s11506_s4 = inlined_call_operand.hbm [shape: f32[8,1], index: 4, kind: input, shape index: {}]   ;;  %s11507_s5 = inlined_call_operand.hbm [shape: bf16[9,64,16], index: 5, kind: input, shape index: {}]   ;;  %s11508_s6 = inlined_call_operand.vmem [shape: bf16[9,16,8], index: 6, kind: input, shape index: {}]   ;;  %s11509_s7 = inlined_call_operand.hbm [shape: f32[16,1], index: 7, kind: input, shape index: {}]   ;;  %s11510_s8 = inlined_call_operand.hbm [shape: f32[256,32], index: 8, kind: input, shape index: {}]   ;;  %s11511_s9 = inlined_call_operand.vmem [shape: f32[1,32], index: 9, kind: input, shape index: {}]   ;;  %s11512_s10 = inlined_call_operand.hbm [shape: f32[256,32], index: 10, kind: input, shape index: {}]   ;;  %s11513_s11 = inlined_call_operand.hbm [shape: f32[1,32], index: 11, kind: input, shape index: {}]   ;;  %s11514_s12 = inlined_call_operand.vmem [shape: f32[32,256], index: 12, kind: input, shape index: {}]   ;;  %s11515_s13 = inlined_call_operand.hbm [shape: f32[1,256], index: 13, kind: input, shape index: {}]   ;;  %s11516_s14 = inlined_call_operand.vmem [shape: bf16[9,16,64], index: 14, kind: input, shape index: {}]   ;;  %s11517_s15 = inlined_call_operand.hbm [shape: bf16[9,8,16], index: 15, kind: input, shape index: {}]   ;;  %s11518_s16 = inlined_call_operand.hbm [shape: f32[8,1], index: 16, kind: input, shape index: {}]   ;;  %s11519_s17 = inlined_call_operand.vmem [shape: bf16[9,64,256], index: 17, kind: input, shape index: {}]   ;;  %s11520_s18 = inlined_call_operand.vmem [shape: bf16[9,4,8], index: 18, kind: input, shape index: {}]   ;;  %s11521_s19 = inlined_call_operand.hbm [shape: f32[4,1], index: 19, kind: input, shape index: {}]   ;;  %s11522_s20 = inlined_call_operand.vmem [shape: f32[2,4,256], index: 20, kind: output, shape index: {0}]   ;;  %s11523_s21 = inlined_call_operand.hbm [shape: f32[2,1,32], index: 21, kind: output, shape index: {1}]   ;;  %s11524_s22 = inlined_call_operand.hbm [shape: f32[2,1,32], index: 22, kind: output, shape index: {2}]   ;;  %s11525_s23 = inlined_call_operand.hbm [shape: f32[2,1,32], index: 23, kind: output, shape index: {3}]  }
   0x1   :  { %11561 = sst [smem:[#allocation42_spill]] %s11502_s0 }
   0x2   :  { %11562 = sst [smem:[#allocation43_spill]] %s11503_s1 }
   0x3   :  { %11563 = sst [smem:[#allocation44_spill]] %s11504_s2 }
   0x4   :  { %11564 = sst [smem:[#allocation45_spill]] %s11505_s3 }
   0x5   :  { %11565 = sst [smem:[#allocation46_spill]] %s11506_s4 }
   0x6   :  { %11566 = sst [smem:[#allocation47_spill]] %s11507_s5 }
   0x7   :  { %11567 = sst [smem:[#allocation48_spill]] %s11508_s6 }
   0x8   :  { %11568 = sst [smem:[#allocation49_spill]] %s11509_s7 }
   0x9   :  { %11569 = sst [smem:[#allocation50_spill]] %s11510_s8 }
   0xa   :  { %11570 = sst [smem:[#allocation51_spill]] %s11512_s10 }
   0xb   :  { %11571 = sst [smem:[#allocation52_spill]] %s11515_s13 }
   0xc   :  { %11572 = sst [smem:[#allocation53_spill]] %s11518_s16 }
   0xd   :  { %11573 = sst [smem:[#allocation54_spill]] %s11520_s18 }
   0xe   :  { %11574 = sst [smem:[#allocation55_spill]] %s11522_s20 }
   0xf   :  { %11575 = sst [smem:[#allocation56_spill]] %s11523_s21 }
  0x10   :  { %11576 = sst [smem:[#allocation57_spill]] %s11524_s22 }
  0x11   :  { %11577 = sst [smem:[#allocation58_spill]] %s11525_s23 }
  0x12   :  { %29 = vsyncpa [#allocation5], 0 }
  0x13   :  { %30 = vsyncpa [#allocation3], 0 }
  0x14   :  { %31 = vsyncpa [#allocation8], 0 }
  0x15   :  { %32 = vsyncpa [#allocation11], 0 }
  0x16   :  { %33 = vsyncpa [#allocation14], 0 }
  0x17   :  { %34 = vsyncpa [#allocation17], 0 }
  0x18   :  { %35 = vsyncpa [#allocation20], 0 }
  0x19   :  { %36 = vsyncpa [#allocation4], 0 }
  0x1a   :  { %38 = vsyncpa [#allocation4 + $0x1], 0 }
  0x1b   :  { %39 = vsyncpa [#allocation24], 0 }
  0x1c   :  { %41 = vsyncpa [#allocation24 + $0x1], 0  ;;  %s9868_s4 = smov 0   ;;  %s9870_s30 = smov 0  }
  0x1d   :  { %s9872_s24 = smov 0   ;;  %s9874_s25 = smov 0  }
  0x1e LB: > { %11578 = sst [smem:[#allocation35_spill]] %s9705_s4  ;;  %s9889_s5 = sadd.s32 4294967295, %s9717_s25   ;;  %s9717_s25 = sphi %s9874_s25, %s11638_s25   ;;  %s9713_s24 = sphi %s9872_s24, %s11640_s24   ;;  %s9709_s30 = sphi %s9870_s30, %s11642_s30   ;;  %s9705_s4 = sphi %s9868_s4, %s11641_s4  }
  0x1f   : > { %11579 = sst [smem:[#allocation36_spill]] %s9713_s24  ;;  %s11532_s1 = sadd.s32 4294967294, %s9717_s25  }
  0x20   : > { %11580 = sst [smem:[#allocation37_spill]] %s9717_s25  ;;  %s9893_s26 = sadd.s32 1, %s9717_s25  }
  0x21   : > { %11581 = sst [smem:[#allocation38_spill]] %s9893_s26  ;;  %s505_s2 = sadd.s32 1, %s9713_s24 }
  0x22   : > { %s502_s6 = ssub.s32 %s9717_s25, %s9893_s26  ;;  %p515_p0 = scmp.ne.s32.totalorder %s9713_s24, %s9709_s30 }
  0x23   : > { %p503_p1 = scmp.eq.s32.totalorder %s502_s6, 0  ;;  %p516_p2 = scmp.eq.s32.totalorder %s9889_s5, 1 }
  0x24   : > { %p521_p3 = scmp.ne.s32.totalorder %s9709_s30, %s9705_s4  ;;  %p522_p4 = scmp.eq.s32.totalorder %s11532_s1, 1 }
  0x25   : > { %s9906_s27 = scalar_select %p503_p1, %s9713_s24, %s505_s2  }
  0x26   : > { %p9908_p5 = por %p516_p2, %p515_p0  ;;  %p9912_p6 = por %p522_p4, %p521_p3 }
  0x27   : > { %11582 = sst [smem:[#allocation39_spill]] %s9906_s27  ;;  %p7139_p7 = scmp.ge.s32.totalorder %s9717_s25, 1 }
  0x28   : > { %s11583_s7 = scalar_select %p9908_p5, 1, 0 }
  0x29   : > { %s11585_s28 = scalar_select %p9912_p6, 1, 0 }
  0x2a   : > { %11584 = sst [smem:[#allocation40_spill]] %s11583_s7  ;;  %p581_p8 = scmp.lt.s32.totalorder %s9717_s25, 3 }
  0x2b   : > { %11586 = sst [smem:[#allocation41_spill]] %s11585_s28  ;;  %p11542_p9 = scmp.eq.s32.totalorder %s9889_s5, 0 }
  0x2c   : > { %p9919_p10 = pnand %p7139_p7, %p581_p8  ;;  %s9719_s3 = smov [#allocation7]  }
  0x2d   : > { %s621_s0 = sshll.u32 %s9719_s3, 4  ;;  %s9720_s2 = smov [#allocation10]   ;;  %s622_s0 = int_to_ptr.vmem [resolvable:$true] %s621_s0 }
  0x2e   : > { %s11587_s29 = scalar_select %p9919_p10, 1, 0 }
  0x2f   : > { %p8717_p11 = pneg %p9919_p10  ;;  %s647_s6 = sshll.u32 %s9720_s2, 4  ;;  %s9931_s6 = int_to_ptr.vmem [resolvable:$true] %s647_s6 }
  0x30   : > { %s9721_s27 = smov [#allocation13]   ;;  %s11589_s4 = sld [smem:[#allocation46_spill]] }
  0x31   : > { %p9927_p12 = pnand %p11542_p9, %p8717_p11  ;;  %s9933_s24 = sshll.u32 %s9721_s27, 4  ;;  %s677_s24 = int_to_ptr.vmem [resolvable:$true] %s9933_s24 }
  0x33   : > { %p9943_p0 = pneg %p9927_p12 }
  0x36   : > { %s11590_s20 = smov %s11589_s4  ;;  %s9244_s3 = scalar_lea.hbm %s11589_s4, 128 }
  0x37   : > { %p9245_p13 = scmp.ne.s32.totalorder %s11590_s20, %s9244_s3  ;;  %p9251_p3 = scmp.lt.u32.totalorder %s9244_s3, %s11590_s20 }
  0x39   : > { %p9247_p1 = pnand %p9943_p0, %p9245_p13 }
  0x3b   : > { %p9248_p2 = pneg %p9247_p1 }
  0x3d   : > { %p9253_p4 = pnand %p9251_p3, %p9248_p2 }
  0x3f   : > { %9256 = shalt.err (!%p9253_p4)
}
  0x40   : > { %s9257_s4 = scalar_lea.vmem %s622_s0, 128  ;;  %p9265_p9 = scmp.lt.s32.totalorder %s622_s0, %s622_s0 }
  0x41   : > { %p9258_p7 = scmp.ne.s32.totalorder %s622_s0, %s9257_s4  ;;  %p9266_p6 = scmp.lt.s32.totalorder %s9257_s4, %s9257_s4 }
  0x43   : > { %p9260_p8 = pnand %p9258_p7, %p9943_p0  ;;  %p9267_p5 = por %p9266_p6, %p9265_p9 }
  0x45   : > { %p9261_p11 = pneg %p9260_p8 }
  0x47   : > { %p9268_p10 = pnand %p9267_p5, %p9261_p11 }
  0x49   : > { %9271 = shalt.err (!%p9268_p10)
}
  0x4a   : > { %8726 = dma.hbm_to_vmem [thread:$0]  (!%p9927_p12), %s11590_s20, 128, %s622_s0, [#allocation8]  }
  0x4b   : > { %s11592_s28 = sld [smem:[#allocation49_spill]] }
  0x51   : > { %s9272_s3 = scalar_lea.hbm %s11592_s28, 256 }
  0x52   : > { %p9273_p13 = scmp.ne.s32.totalorder %s11592_s28, %s9272_s3  ;;  %p9279_p5 = scmp.lt.u32.totalorder %s9272_s3, %s11592_s28 }
  0x54   : > { %p9275_p1 = pnand %p9273_p13, %p9943_p0 }
  0x56   : > { %p9276_p6 = pneg %p9275_p1 }
  0x58   : > { %p9281_p9 = pnand %p9279_p5, %p9276_p6 }
  0x5a   : > { %9284 = shalt.err (!%p9281_p9)
}
  0x5b   : > { %s9285_s0 = scalar_lea.vmem %s9931_s6, 256  ;;  %p9293_p4 = scmp.lt.s32.totalorder %s9931_s6, %s9931_s6 }
  0x5c   : > { %p9286_p10 = scmp.ne.s32.totalorder %s9931_s6, %s9285_s0  ;;  %p9294_p7 = scmp.lt.s32.totalorder %s9285_s0, %s9285_s0 }
  0x5e   : > { %p9288_p2 = pnand %p9286_p10, %p9943_p0  ;;  %p9295_p8 = por %p9294_p7, %p9293_p4 }
  0x60   : > { %p9289_p3 = pneg %p9288_p2 }
  0x62   : > { %p9296_p11 = pnand %p9295_p8, %p9289_p3 }
  0x64   : > { %9299 = shalt.err (!%p9296_p11)
}
  0x65   : > { %s11551_s22 = smov 128   ;;  %s11552_s7 = smov 8  }
  0x66   : > { %8732 = dma.hbm_to_vmem [thread:$0]  (!%p9927_p12), %s11592_s28, 256, %s9931_s6, [#allocation11], %s11551_s22, %s11551_s22, %s11552_s7  }
  0x67   : > { %s11593_s10 = sld [smem:[#allocation51_spill]] }
  0x6d   : > { %s9300_s3 = scalar_lea.hbm %s11593_s10, 4096 }
  0x6e   : > { %p9301_p13 = scmp.ne.s32.totalorder %s11593_s10, %s9300_s3  ;;  %p9307_p5 = scmp.lt.u32.totalorder %s9300_s3, %s11593_s10 }
  0x70   : > { %p9303_p1 = pnand %p9301_p13, %p9943_p0 }
  0x72   : > { %p9304_p6 = pneg %p9303_p1 }
  0x74   : > { %p9309_p9 = pnand %p9307_p5, %p9304_p6 }
  0x76   : > { %9312 = shalt.err (!%p9309_p9)
}
  0x77   : > { %s9313_s23 = scalar_lea.vmem %s677_s24, 4096  ;;  %p9321_p4 = scmp.lt.s32.totalorder %s677_s24, %s677_s24 }
  0x78   : > { %p9314_p10 = scmp.ne.s32.totalorder %s677_s24, %s9313_s23  ;;  %p9322_p7 = scmp.lt.s32.totalorder %s9313_s23, %s9313_s23 }
  0x7a   : > { %p9316_p2 = pnand %p9314_p10, %p9943_p0  ;;  %p9323_p8 = por %p9322_p7, %p9321_p4 }
  0x7c   : > { %p9317_p3 = pneg %p9316_p2 }
  0x7e   : > { %p9324_p11 = pnand %p9323_p8, %p9317_p3 }
  0x80   : > { %9327 = shalt.err (!%p9324_p11)
}
  0x81   : > { %8738 = dma.hbm_to_vmem [thread:$0]  (!%p9927_p12), %s11593_s10, 4096, %s677_s24, [#allocation14], %s11551_s22, %s11551_s22, %s11552_s7  }
  0x82   : > { %s9724_s25 = smov [#allocation16]   ;;  %s9725_s26 = smov [#allocation19]  }
  0x83   : > { %s704_s21 = sshll.u32 %s9724_s25, 4  ;;  %s731_s3 = sshll.u32 %s9725_s26, 4  ;;  %s705_s21 = int_to_ptr.vmem [resolvable:$true] %s704_s21  ;;  %s732_s3 = int_to_ptr.vmem [resolvable:$true] %s731_s3 }
  0x84   : > { %s11594_s13 = sld [smem:[#allocation52_spill]] }
  0x8a   : > { %s9328_s0 = scalar_lea.hbm %s11594_s13, 32 }
  0x8b   : > { %p9329_p13 = scmp.ne.s32.totalorder %s11594_s13, %s9328_s0  ;;  %p9335_p5 = scmp.lt.u32.totalorder %s9328_s0, %s11594_s13 }
  0x8d   : > { %p9331_p1 = pnand %p9329_p13, %p9943_p0 }
  0x8f   : > { %p9332_p6 = pneg %p9331_p1 }
  0x91   : > { %p9337_p9 = pnand %p9335_p5, %p9332_p6 }
  0x93   : > { %9340 = shalt.err (!%p9337_p9)
}
  0x94   : > { %s9341_s24 = scalar_lea.vmem %s705_s21, 32  ;;  %p9349_p4 = scmp.lt.s32.totalorder %s705_s21, %s705_s21 }
  0x95   : > { %p9342_p10 = scmp.ne.s32.totalorder %s705_s21, %s9341_s24  ;;  %p9350_p7 = scmp.lt.s32.totalorder %s9341_s24, %s9341_s24 }
  0x97   : > { %p9344_p2 = pnand %p9342_p10, %p9943_p0  ;;  %p9351_p8 = por %p9350_p7, %p9349_p4 }
  0x99   : > { %p9345_p3 = pneg %p9344_p2 }
  0x9b   : > { %p9352_p11 = pnand %p9351_p8, %p9345_p3 }
  0x9d   : > { %9355 = shalt.err (!%p9352_p11)
}
  0x9e   : > { %8744 = dma.hbm_to_vmem [thread:$0]  (!%p9927_p12), %s11594_s13, 32, %s705_s21, [#allocation17]  }
  0x9f   : > { %s11595_s26 = sld [smem:[#allocation42_spill]]  ;;  %s11596_s16 = sld [smem:[#allocation53_spill]] }
  0xa5   : > { %s594_s27 = sshll.u32 %s11595_s26, 4  ;;  %s9356_s23 = scalar_lea.hbm %s11596_s16, 128  ;;  %s595_s27 = int_to_ptr.vmem [resolvable:$true] %s594_s27 }
  0xa6   : > { %p9357_p13 = scmp.ne.s32.totalorder %s11596_s16, %s9356_s23  ;;  %p9363_p5 = scmp.lt.u32.totalorder %s9356_s23, %s11596_s16 }
  0xa8   : > { %p9359_p1 = pnand %p9357_p13, %p9943_p0 }
  0xaa   : > { %p9360_p6 = pneg %p9359_p1 }
  0xac   : > { %p9365_p9 = pnand %p9363_p5, %p9360_p6 }
  0xae   : > { %9368 = shalt.err (!%p9365_p9)
}
  0xaf   : > { %s9369_s21 = scalar_lea.vmem %s732_s3, 128  ;;  %p9377_p4 = scmp.lt.s32.totalorder %s732_s3, %s732_s3 }
  0xb0   : > { %p9370_p10 = scmp.ne.s32.totalorder %s732_s3, %s9369_s21  ;;  %p9378_p7 = scmp.lt.s32.totalorder %s9369_s21, %s9369_s21 }
  0xb2   : > { %p9372_p2 = pnand %p9370_p10, %p9943_p0  ;;  %p9379_p8 = por %p9378_p7, %p9377_p4 }
  0xb4   : > { %p9373_p3 = pneg %p9372_p2 }
  0xb6   : > { %p9380_p11 = pnand %p9379_p8, %p9373_p3 }
  0xb8   : > { %9383 = shalt.err (!%p9380_p11)
}
  0xb9   : > { %8750 = dma.hbm_to_vmem [thread:$0]  (!%p9927_p12), %s11596_s16, 128, %s732_s3, [#allocation20]  }
  0xba   : > { %s9384_s22 = scalar_lea.vmem %s595_s27, 16  ;;  %p9392_p5 = scmp.lt.s32.totalorder %s595_s27, %s595_s27 }
  0xbb   : > { %p9385_p13 = scmp.ne.s32.totalorder %s595_s27, %s9384_s22  ;;  %p9393_p9 = scmp.lt.s32.totalorder %s9384_s22, %s9384_s22 }
  0xbd   : > { %p9387_p1 = pnand %p9385_p13, %p9943_p0  ;;  %p9394_p10 = por %p9393_p9, %p9392_p5 }
  0xbf   : > { %p9388_p6 = pneg %p9387_p1 }
  0xc1   : > { %p9395_p2 = pnand %p9394_p10, %p9388_p6 }
  0xc3   : > { %9398 = shalt.err (!%p9395_p2)
}
  0xc4   : > { %s9726_s25 = smov [#allocation2]   ;;  %s9727_s26 = smov [#allocation6]  }
  0xc5   : > { %8720 = dma.vmem_to_smem (!%p9927_p12), %s595_s27, 16, %s9726_s25, [#allocation5]  }
  0xc6   : > { %s607_s4 = sshll.u32 %s9727_s26, 4  ;;  %s11597_s23 = sld [smem:[#allocation45_spill]]  ;;  %s608_s4 = int_to_ptr.vmem [resolvable:$true] %s607_s4 }
  0xcc   : > { %s9399_s20 = scalar_lea.hbm %s11597_s23, 576 }
  0xcd   : > { %p9400_p3 = scmp.ne.s32.totalorder %s11597_s23, %s9399_s20  ;;  %p9406_p8 = scmp.lt.u32.totalorder %s9399_s20, %s11597_s23 }
  0xcf   : > { %p9402_p4 = pnand %p9400_p3, %p9943_p0 }
  0xd1   : > { %p9403_p7 = pneg %p9402_p4 }
  0xd3   : > { %p9408_p11 = pnand %p9406_p8, %p9403_p7 }
  0xd5   : > { %9411 = shalt.err (!%p9408_p11)
}
  0xd6   : > { %s9412_s27 = scalar_lea.vmem %s608_s4, 576  ;;  %p9420_p5 = scmp.lt.s32.totalorder %s608_s4, %s608_s4 }
  0xd7   : > { %p9413_p13 = scmp.ne.s32.totalorder %s608_s4, %s9412_s27  ;;  %p9421_p9 = scmp.lt.s32.totalorder %s9412_s27, %s9412_s27 }
  0xd9   : > { %p9415_p1 = pnand %p9413_p13, %p9943_p0  ;;  %p9422_p10 = por %p9421_p9, %p9420_p5 }
  0xdb   : > { %p9416_p6 = pneg %p9415_p1 }
  0xdd   : > { %p9423_p2 = pnand %p9422_p10, %p9416_p6 }
  0xdf   : > { %9426 = shalt.err (!%p9423_p2)
}
  0xe0   : > { %s11553_s18 = smov 64   ;;  %s9729_s22 = smov 4  }
  0xe1   : > { %8723 = dma.hbm_to_vmem [thread:$0]  (!%p9927_p12), %s11597_s23, 576, %s608_s4, [#allocation3], %s11553_s18, %s11553_s18, %s9729_s22  }
  0xe2   : > { %s9730_s3 = smov [#allocation9]   ;;  %s9731_s20 = smov [#allocation12]  }
  0xe3   : > { %s631_s0 = sshll.u32 %s9730_s3, 4  ;;  %s660_s24 = sshll.u32 %s9731_s20, 4  ;;  %s632_s0 = int_to_ptr.vmem [resolvable:$true] %s631_s0  ;;  %s661_s24 = int_to_ptr.vmem [resolvable:$true] %s660_s24 }
  0xe4   : > { %s11598_s6 = sld [smem:[#allocation47_spill]] }
  0xea   : > { %s9427_s27 = scalar_lea.hbm %s11598_s6, 4608 }
  0xeb   : > { %p9428_p3 = scmp.ne.s32.totalorder %s11598_s6, %s9427_s27  ;;  %p9434_p8 = scmp.lt.u32.totalorder %s9427_s27, %s11598_s6 }
  0xed   : > { %p9430_p4 = pnand %p9428_p3, %p9943_p0 }
  0xef   : > { %p9431_p7 = pneg %p9430_p4 }
  0xf1   : > { %p9436_p11 = pnand %p9434_p8, %p9431_p7 }
  0xf3   : > { %9439 = shalt.err (!%p9436_p11)
}
  0xf4   : > { %s9440_s4 = scalar_lea.vmem %s632_s0, 4608  ;;  %p9448_p5 = scmp.lt.s32.totalorder %s632_s0, %s632_s0 }
  0xf5   : > { %p9441_p13 = scmp.ne.s32.totalorder %s632_s0, %s9440_s4  ;;  %p9449_p9 = scmp.lt.s32.totalorder %s9440_s4, %s9440_s4 }
  0xf7   : > { %p9443_p1 = pnand %p9441_p13, %p9943_p0  ;;  %p9450_p10 = por %p9449_p9, %p9448_p5 }
  0xf9   : > { %p9444_p6 = pneg %p9443_p1 }
  0xfb   : > { %p9451_p2 = pnand %p9450_p10, %p9444_p6 }
  0xfd   : > { %9454 = shalt.err (!%p9451_p2)
}
  0xfe   : > { %8729 = dma.hbm_to_vmem [thread:$0]  (!%p9927_p12), %s11598_s6, 4608, %s632_s0, [#allocation8], %s11553_s18, %s11553_s18, %s9729_s22  }
  0xff   : > { %s11599_s8 = sld [smem:[#allocation50_spill]] }
 0x105   : > { %s9455_s25 = scalar_lea.hbm %s11599_s8, 4096 }
 0x106   : > { %p9456_p3 = scmp.ne.s32.totalorder %s11599_s8, %s9455_s25  ;;  %p9462_p8 = scmp.lt.u32.totalorder %s9455_s25, %s11599_s8 }
 0x108   : > { %p9458_p4 = pnand %p9456_p3, %p9943_p0 }
 0x10a   : > { %p9459_p7 = pneg %p9458_p4 }
 0x10c   : > { %p9464_p11 = pnand %p9462_p8, %p9459_p7 }
 0x10e   : > { %9467 = shalt.err (!%p9464_p11)
}
 0x10f   : > { %s9468_s21 = scalar_lea.vmem %s661_s24, 4096  ;;  %p9476_p5 = scmp.lt.s32.totalorder %s661_s24, %s661_s24 }
 0x110   : > { %p9469_p13 = scmp.ne.s32.totalorder %s661_s24, %s9468_s21  ;;  %p9477_p9 = scmp.lt.s32.totalorder %s9468_s21, %s9468_s21 }
 0x112   : > { %p9471_p1 = pnand %p9469_p13, %p9943_p0  ;;  %p9478_p10 = por %p9477_p9, %p9476_p5 }
 0x114   : > { %p9472_p6 = pneg %p9471_p1 }
 0x116   : > { %p9479_p2 = pnand %p9478_p10, %p9472_p6 }
 0x118   : > { %9482 = shalt.err (!%p9479_p2)
}
 0x119   : > { %s11600_s0 = smov 8   ;;  %s11601_s27 = smov 128  }
 0x11a   : > { %8735 = dma.hbm_to_vmem [thread:$0]  (!%p9927_p12), %s11599_s8, 4096, %s661_s24, [#allocation11], %s11601_s27, %s11601_s27, %s11600_s0  }
 0x11b   : > { %s9732_s13 = smov [#allocation15]   ;;  %s9733_s7 = smov [#allocation18]  }
 0x11c   : > { %s690_s16 = sshll.u32 %s9732_s13, 4  ;;  %s717_s25 = sshll.u32 %s9733_s7, 4  ;;  %s691_s16 = int_to_ptr.vmem [resolvable:$true] %s690_s16  ;;  %s718_s25 = int_to_ptr.vmem [resolvable:$true] %s717_s25 }
 0x11d   : > { %s9483_s20 = scalar_lea.hbm %s11513_s11, 16 }
 0x11e   : > { %p9484_p3 = scmp.ne.s32.totalorder %s11513_s11, %s9483_s20  ;;  %p9490_p8 = scmp.lt.u32.totalorder %s9483_s20, %s11513_s11 }
 0x120   : > { %p9486_p4 = pnand %p9484_p3, %p9943_p0 }
 0x122   : > { %p9487_p7 = pneg %p9486_p4 }
 0x124   : > { %p9492_p11 = pnand %p9490_p8, %p9487_p7 }
 0x126   : > { %9495 = shalt.err (!%p9492_p11)
}
 0x127   : > { %s9496_s24 = scalar_lea.vmem %s691_s16, 16  ;;  %s9503_s0 = scalar_lea.vmem %s691_s16, 32 }
 0x128   : > { %p9497_p13 = scmp.ne.s32.totalorder %s691_s16, %s9496_s24  ;;  %p9504_p5 = scmp.lt.s32.totalorder %s691_s16, %s691_s16 }
 0x129   : > { %p9505_p9 = scmp.lt.s32.totalorder %s9503_s0, %s9496_s24 }
 0x12a   : > { %p9499_p1 = pnand %p9497_p13, %p9943_p0 }
 0x12b   : > { %p9506_p10 = por %p9505_p9, %p9504_p5 }
 0x12c   : > { %p9500_p6 = pneg %p9499_p1 }
 0x12e   : > { %p9507_p2 = pnand %p9506_p10, %p9500_p6 }
 0x130   : > { %9510 = shalt.err (!%p9507_p2)
}
 0x131   : > { %8741 = dma.hbm_to_vmem [thread:$0]  (!%p9927_p12), %s11513_s11, 16, %s691_s16, [#allocation14]  }
 0x132   : > { %s9511_s7 = scalar_lea.hbm %s11517_s15, 576 }
 0x133   : > { %p9512_p3 = scmp.ne.s32.totalorder %s11517_s15, %s9511_s7  ;;  %p9518_p8 = scmp.lt.u32.totalorder %s9511_s7, %s11517_s15 }
 0x135   : > { %p9514_p4 = pnand %p9512_p3, %p9943_p0 }
 0x137   : > { %p9515_p7 = pneg %p9514_p4 }
 0x139   : > { %p9520_p11 = pnand %p9518_p8, %p9515_p7 }
 0x13b   : > { %9523 = shalt.err (!%p9520_p11)
}
 0x13c   : > { %s9524_s21 = scalar_lea.vmem %s718_s25, 576  ;;  %p9532_p5 = scmp.lt.s32.totalorder %s718_s25, %s718_s25 }
 0x13d   : > { %p9525_p13 = scmp.ne.s32.totalorder %s718_s25, %s9524_s21  ;;  %p9533_p9 = scmp.lt.s32.totalorder %s9524_s21, %s9524_s21 }
 0x13f   : > { %p9527_p1 = pnand %p9525_p13, %p9943_p0  ;;  %p9534_p10 = por %p9533_p9, %p9532_p5 }
 0x141   : > { %p9528_p6 = pneg %p9527_p1 }
 0x143   : > { %p9535_p2 = pnand %p9534_p10, %p9528_p6 }
 0x145   : > { %9538 = shalt.err (!%p9535_p2)
}
 0x146   : > { %s11602_s16 = smov 64   ;;  %s9734_s0 = smov [#allocation21]  }
 0x147   : > { %8747 = dma.hbm_to_vmem [thread:$0]  (!%p9927_p12), %s11517_s15, 576, %s718_s25, [#allocation17], %s11602_s16, %s11602_s16, %s9729_s22  }
 0x148   : > { %s748_s27 = sshll.u32 %s9734_s0, 4  ;;  %s9539_s13 = scalar_lea.hbm %s11521_s19, 64  ;;  %s749_s27 = int_to_ptr.vmem [resolvable:$true] %s748_s27 }
 0x149   : > { %p9540_p3 = scmp.ne.s32.totalorder %s11521_s19, %s9539_s13  ;;  %p9546_p8 = scmp.lt.u32.totalorder %s9539_s13, %s11521_s19 }
 0x14b   : > { %p9542_p4 = pnand %p9540_p3, %p9943_p0 }
 0x14d   : > { %p9543_p7 = pneg %p9542_p4 }
 0x14f   : > { %p9548_p11 = pnand %p9546_p8, %p9543_p7 }
 0x151   : > { %9551 = shalt.err (!%p9548_p11)
}
 0x152   : > { %s9552_s22 = scalar_lea.vmem %s749_s27, 64  ;;  %p9560_p5 = scmp.lt.s32.totalorder %s749_s27, %s749_s27 }
 0x153   : > { %p9553_p13 = scmp.ne.s32.totalorder %s749_s27, %s9552_s22  ;;  %p9561_p9 = scmp.lt.s32.totalorder %s9552_s22, %s9552_s22 }
 0x155   : > { %p9555_p1 = pnand %p9553_p13, %p9943_p0  ;;  %p9562_p10 = por %p9561_p9, %p9560_p5 }
 0x157   : > { %p9556_p6 = pneg %p9555_p1 }
 0x159   : > { %p9563_p2 = pnand %p9562_p10, %p9556_p6 }
 0x15b   : > { %9566 = shalt.err (!%p9563_p2)
}
 0x15c   : > { %8753 = dma.hbm_to_vmem [thread:$0]  (!%p9927_p12), %s11521_s19, 64, %s749_s27, [#allocation20]  }
 0x15d   : > { %p11603_p3 = scmp.ne.s32.totalorder %s11587_s29, 0 }
 0x15e   : > { %p11604_p4 = scmp.eq.s32.totalorder (!%p11603_p3), %s9889_s5, 0 }
 0x15f   : > { %769 = sbr.rel (%p11603_p3) target bundleno = 8992 (0x2320), region = 100 }
 0x166   : > { %9668 = dma.done.wait (%p11604_p4), [#allocation5], 16   ;;  %p11605_p0 = pmov %p11604_p4 }
 0x168   : > { %9670 = vsyncadd (%p11605_p0), [#allocation5], 4294967280  ;;  %p11606_p7 = pmov %p11605_p0 }
 0x169   : > { %p11607_p8 = pmov %p11605_p0 }
 0x16a   : > { %9672 = dma.done.wait (%p11606_p7), [#allocation3], 576  }
 0x16b   : > { %9674 = vsyncadd (%p11607_p8), [#allocation3], 4294966720  ;;  %p11608_p11 = pmov %p11605_p0 }
 0x16c   : > { %p11609_p12 = pmov %p11605_p0 }
 0x16d   : > { %9676 = dma.done.wait (%p11608_p11), [#allocation8], 4736  }
 0x16e   : > { %9678 = vsyncadd (%p11609_p12), [#allocation8], 4294962560  ;;  %p11610_p13 = pmov %p11605_p0 }
 0x16f   : > { %p11611_p1 = pmov %p11605_p0 }
 0x170   : > { %9680 = dma.done.wait (%p11610_p13), [#allocation11], 4352  }
 0x171   : > { %9682 = vsyncadd (%p11611_p1), [#allocation11], 4294962944  ;;  %p11612_p6 = pmov %p11605_p0 }
 0x172   : > { %p11613_p5 = pmov %p11605_p0 }
 0x173   : > { %9684 = dma.done.wait (%p11612_p6), [#allocation14], 4112  }
 0x174   : > { %9686 = vsyncadd (%p11613_p5), [#allocation14], 4294963184  ;;  %p11614_p9 = pmov %p11605_p0 }
 0x175   : > { %p11615_p10 = pmov %p11605_p0 }
 0x176   : > { %9688 = dma.done.wait (%p11614_p9), [#allocation17], 608  }
 0x177   : > { %9690 = vsyncadd (%p11615_p10), [#allocation17], 4294966688  ;;  %p11616_p2 = pmov %p11605_p0 }
 0x178   : > { %p11617_p3 = pmov %p11605_p0 }
 0x179   : > { %9692 = dma.done.wait (%p11616_p2), [#allocation20], 192  }
 0x17a   : > { %9694 = vsyncadd (%p11617_p3), [#allocation20], 4294967104 }
 0x17b   : > { %819 = sfence }
 0x17c   : > { %s11618_s2 = sld [smem:[#allocation44_spill]]  ;;  %p890_p4 = scmp.lt.s32.totalorder %s9889_s5, 1  ;;  %v9735_v36 = vmov 0.0   ;;  %vm9736_vm0 = vmmov 0   ;;  %vm1253_vm1 = vcmask 1041408   ;;  %vm1249_vm2 = vcmask 31744  }
 0x17d   : > { %s11619_s7 = sld [smem:[#allocation43_spill]]  ;;  %v1247_v52 = vld [vmem:[#allocation6 + $0x4] sm:$0xf]  ;;  %v1075_v53 = vld [vmem:[#allocation6] sm:$0xf]  ;;  %vm2884_vm3 = vcmask 523264  }
 0x17e   : > { %s10271_s13 = scalar_select %p890_p4, %s9889_s5, 1  ;;  %vm3068_vm5 = vcmask 1043456   ;;  %vm3064_vm6 = vcmask 64512   ;;  %vm4097_vm7 = vcmask 130048   ;;  %vm4191_vm10 = vcmask 261120  }
 0x17f   : > { %s2883_s28 = sld [smem:[#allocation2]]  ;;  %s11620_s16 = sld [smem:[#allocation48_spill]]  ;;  %vm4193_vm11 = vcmask 392192   ;;  %vm4196_vm12 = vcmask 654336   ;;  %vm4198_vm13 = vcmask 785408   ;;  %vm4200_vm14 = vcmask 916480  }
 0x180   : > { %s11554_s29 = sshll.u32 %s10271_s13, 3  ;;  %s10871_s24 = sld [smem:[#allocation2 + $0x1]]  ;;  %vm6827_vm15 = vcmask 253952  }
 0x181   : > { %s9738_s0 = smov 32   ;;  %s11555_s27 = smov 16  }
 0x182   : > { %v8919_v0 = vld [vmem:[%s11618_s2 + $0xc0] sm:$0xff]   ;;  %v8923_v4 = vld [vmem:[%s11618_s2 + $0xc8] sm:$0xff]   ;;  %v8927_v8 = vld [vmem:[%s11618_s2 + $0xd0] sm:$0xff]   ;;  %s9740_s10 = smov 96   ;;  %s9741_s18 = smov 48  }
 0x183   : > { %v8920_v1 = vld [vmem:[%s11618_s2 + $0x40] sm:$0xff]   ;;  %7904 = vmatprep.subr.bf16.mxu1 %v8919_v0  ;;  %v8924_v5 = vld [vmem:[%s11618_s2 + $0x48] sm:$0xff]   ;;  %v8928_v9 = vld [vmem:[%s11618_s2 + $0x50] sm:$0xff]   ;;  %s894_s26 = scalar_lea.vmem %s11619_s7, %s11554_s29  ;;  %s9742_s7 = smov 64  }
 0x184   : > { %v8921_v2 = vld [vmem:[%s11618_s2 + $0x80] sm:$0xff]   ;;  %7882 = vmatprep.subr.bf16.mxu0 %v8920_v1  ;;  %v8925_v6 = vld [vmem:[%s11618_s2 + $0x88] sm:$0xff]   ;;  %v8929_v10 = vld [vmem:[%s11618_s2 + $0x90] sm:$0xff]   ;;  %s9744_s3 = smov 112   ;;  %s10939_s29 = sand.u32 1, %s9709_s30  }
 0x185   : > { %v8922_v3 = vld [vmem:[%s11618_s2] sm:$0xff]   ;;  %7905 = vmatpush3.bf16.msra.mxu1 %v8921_v2  ;;  %v8926_v7 = vld [vmem:[%s11618_s2 + $0x8] sm:$0xff]   ;;  %v8930_v11 = vld [vmem:[%s11618_s2 + $0x10] sm:$0xff]   ;;  %s11557_s20 = scalar_lea.vmem [#allocation22], %s10939_s29  ;;  %s11556_s22 = scalar_lea.vmem [#allocation25], %s10939_s29 }
 0x186   : > { %7883 = vmatpush3.bf16.msra.mxu0 %v8922_v3  ;;  %7906 = vmatprep.subr.bf16.mxu1 %v8923_v4  ;;  %v8931_v12 = vld [vmem:[%s11618_s2 + $0xd8] sm:$0xff]   ;;  %v8935_v16 = vld [vmem:[%s11618_s2 + $0xe0] sm:$0xff]   ;;  %v8939_v20 = vld [vmem:[%s11618_s2 + $0xe8] sm:$0xff]   ;;  %s7703_s21 = sld [smem:[#allocation2 + $0x2]]  ;;  %s11623_s25 = sld [smem:[#allocation40_spill]] }
 0x187   : > { %7884 = vmatprep.subr.bf16.mxu0 %v8924_v5  ;;  %v8932_v13 = vld [vmem:[%s11618_s2 + $0x58] sm:$0xff]   ;;  %v8936_v17 = vld [vmem:[%s11618_s2 + $0x60] sm:$0xff]   ;;  %v8940_v21 = vld [vmem:[%s11618_s2 + $0x68] sm:$0xff]  }
 0x188   : > { %v8933_v14 = vld [vmem:[%s11618_s2 + $0x98] sm:$0xff]   ;;  %v8937_v18 = vld [vmem:[%s11618_s2 + $0xa0] sm:$0xff]   ;;  %v8941_v22 = vld [vmem:[%s11618_s2 + $0xa8] sm:$0xff]  }
 0x189   : > { %7907 = vmatpush3.bf16.msra.mxu1 %v8925_v6  ;;  %v8934_v15 = vld [vmem:[%s11618_s2 + $0x18] sm:$0xff]   ;;  %v8938_v19 = vld [vmem:[%s11618_s2 + $0x20] sm:$0xff]   ;;  %v8942_v23 = vld [vmem:[%s11618_s2 + $0x28] sm:$0xff]  }
 0x18a   : > { %7885 = vmatpush3.bf16.msra.mxu0 %v8926_v7  ;;  %7908 = vmatprep.subr.bf16.mxu1 %v8927_v8  ;;  %v8943_v24 = vld [vmem:[%s11618_s2 + $0xf0] sm:$0xff]   ;;  %v8947_v28 = vld [vmem:[%s11618_s2 + $0xf8] sm:$0xff]   ;;  %v901_v32 = vld [vmem:[%s894_s26] sm:$0xff]  ;;  %s9743_s26 = smov 80  }
 0x18b   : > { %7886 = vmatprep.subr.bf16.mxu0 %v8928_v9  ;;  %v8944_v25 = vld [vmem:[%s11618_s2 + $0x70] sm:$0xff]   ;;  %v8948_v29 = vld [vmem:[%s11618_s2 + $0x78] sm:$0xff]   ;;  %v903_v33 = vcombine.high %v901_v32, %v901_v32  ;;  %v10306_v34 = vpack.c.bf16 %v901_v32, %v901_v32  ;;  %v8952_v49 = vld [vmem:[%s11618_s2 + $0x140] sm:$0xff]  }
 0x18c   : > { %v8945_v26 = vld [vmem:[%s11618_s2 + $0xb0] sm:$0xff]   ;;  %v8949_v30 = vld [vmem:[%s11618_s2 + $0xb8] sm:$0xff]   ;;  %v8953_v54 = vld [vmem:[%s11618_s2 + $0x100] sm:$0xff]   ;;  %p11626_p7 = scmp.ne.s32.totalorder %s11623_s25, 0 }
 0x18d   : > { %7909 = vmatpush3.bf16.msra.mxu1 %v8929_v10  ;;  %v8946_v27 = vld [vmem:[%s11618_s2 + $0x30] sm:$0xff]   ;;  %v8950_v31 = vld [vmem:[%s11618_s2 + $0x38] sm:$0xff]   ;;  %v10308_v35 = vpack.c.bf16 %v903_v33, %v903_v33  ;;  %v8954_v55 = vld [vmem:[%s11618_s2 + $0x148] sm:$0xff]  }
 0x18e   : > { %7887 = vmatpush3.bf16.msra.mxu0 %v8930_v11  ;;  %7910 = vmatprep.subr.bf16.mxu1 %v8931_v12  ;;  %v8955_v56 = vld [vmem:[%s11618_s2 + $0x108] sm:$0xff]   ;;  %v8956_v57 = vld [vmem:[%s11618_s2 + $0x150] sm:$0xff]   ;;  %v8958_v59 = vld [vmem:[%s11618_s2 + $0x158] sm:$0xff]  }
 0x18f   : > { %7888 = vmatprep.subr.bf16.mxu0 %v8932_v13  ;;  %1238 = vmatprep.mubr.bf16.mxu1 %v10308_v35  ;;  %v8957_v58 = vld [vmem:[%s11618_s2 + $0x110] sm:$0xff]   ;;  %v8959_v60 = vld [vmem:[%s11618_s2 + $0x118] sm:$0xff]   ;;  %v8960_v61 = vld [vmem:[%s11618_s2 + $0x160] sm:$0xff]  }
 0x190   : > { %1067 = vmatprep.mubr.bf16.mxu0 %v10308_v35  ;;  %v8961_v62 = vld [vmem:[%s11618_s2 + $0x120] sm:$0xff]   ;;  %v8962_v63 = vld [vmem:[%s11618_s2 + $0x168] sm:$0xff]   ;;  %v8964_v1 = vld [vmem:[%s11618_s2 + $0x170] sm:$0xff]  }
 0x191   : > { %7911 = vmatpush3.bf16.msra.mxu1 %v8933_v14  ;;  %v8963_v0 = vld [vmem:[%s11618_s2 + $0x128] sm:$0xff]   ;;  %v8965_v2 = vld [vmem:[%s11618_s2 + $0x130] sm:$0xff]   ;;  %v8966_v3 = vld [vmem:[%s11618_s2 + $0x178] sm:$0xff]  }
 0x192   : > { %7889 = vmatpush3.bf16.msra.mxu0 %v8934_v15  ;;  %7912 = vmatprep.subr.bf16.mxu1 %v8935_v16  ;;  %v8967_v4 = vld [vmem:[%s11618_s2 + $0x138] sm:$0xff]   ;;  %v8978_v32 = vld [vmem:[%s11618_s2 + $0x1e8] sm:$0xff]  }
 0x193   : > { %7890 = vmatprep.subr.bf16.mxu0 %v8936_v17  ;;  %v8979_v33 = vld [vmem:[%s11618_s2 + $0x1a8] sm:$0xff]  }
 0x195   : > { %7913 = vmatpush3.bf16.msra.mxu1 %v8937_v18 }
 0x196   : > { %7891 = vmatpush3.bf16.msra.mxu0 %v8938_v19  ;;  %7914 = vmatprep.subr.bf16.mxu1 %v8939_v20  ;;  %v8968_v20 = vld [vmem:[%s11618_s2 + $0x1c0] sm:$0xff]  }
 0x197   : > { %7892 = vmatprep.subr.bf16.mxu0 %v8940_v21 }
 0x199   : > { %7915 = vmatpush3.bf16.msra.mxu1 %v8941_v22  ;;  %v1513_v22 = vld [vmem:[#allocation6 + $0x8] sm:$0xf] }
 0x19a   : > { %7893 = vmatpush3.bf16.msra.mxu0 %v8942_v23  ;;  %7916 = vmatprep.subr.bf16.mxu1 %v8943_v24  ;;  %v8969_v23 = vld [vmem:[%s11618_s2 + $0x180] sm:$0xff]   ;;  %v8970_v24 = vld [vmem:[%s11618_s2 + $0x1c8] sm:$0xff]  }
 0x19b   : > { %7894 = vmatprep.subr.bf16.mxu0 %v8944_v25  ;;  %v8971_v25 = vld [vmem:[%s11618_s2 + $0x188] sm:$0xff]  }
 0x19d   : > { %7917 = vmatpush3.bf16.msra.mxu1 %v8945_v26  ;;  %v8972_v26 = vld [vmem:[%s11618_s2 + $0x1d0] sm:$0xff]  }
 0x19e   : > { %7895 = vmatpush3.bf16.msra.mxu0 %v8946_v27  ;;  %7918 = vmatprep.subr.bf16.mxu1 %v8947_v28  ;;  %v8973_v27 = vld [vmem:[%s11618_s2 + $0x190] sm:$0xff]   ;;  %v8974_v28 = vld [vmem:[%s11618_s2 + $0x1d8] sm:$0xff]  }
 0x19f   : > { %7896 = vmatprep.subr.bf16.mxu0 %v8948_v29  ;;  %v8975_v29 = vld [vmem:[%s11618_s2 + $0x198] sm:$0xff]  }
 0x1a1   : > { %7919 = vmatpush3.bf16.msra.mxu1 %v8949_v30  ;;  %v8976_v30 = vld [vmem:[%s11618_s2 + $0x1e0] sm:$0xff]  }
 0x1a2   : > { %7897 = vmatpush3.bf16.msra.mxu0 %v8950_v31  ;;  %8273 = vmatprep.subr.bf16.mxu1 %v9735_v36  ;;  %v8977_v31 = vld [vmem:[%s11618_s2 + $0x1a0] sm:$0xff]  }
 0x1a3   : > { %8267 = vmatprep.subr.bf16.mxu0 %v9735_v36 }
 0x1a4   : > { %1239 = vmatmul.mubr.bf16.vlgmr.msra.gmra.mrb[0].mxu1 %v10306_v34 }
 0x1a5   : > { %1068 = vmatmul.mubr.bf16.vlgmr.msra.gmra.mrb[0].mxu0 %v10306_v34  ;;  %8275 = vmatprep.mubr.msk.bf16.mxu1 %vm9736_vm0, %v9735_v36 }
 0x1a6   : > { %8269 = vmatprep.mubr.msk.bf16.mxu0 %vm9736_vm0, %v9735_v36 }
 0x277   : > { %v7920_v37 = vpop.f32.mrb[0].mxu1 }
 0x278   : > { %v7898_v38 = vpop.f32.mrb[0].mxu0  ;;  %v7921_v39 = vpop.f32.mrb[1].mxu1 }
 0x279   : > { %v7899_v40 = vpop.f32.mrb[1].mxu0  ;;  %v7922_v41 = vadd.f32 %v7921_v39, %v7920_v37  ;;  %v7923_v43 = vpop.f32.mrb[2].mxu1  ;;  %v8980_v37 = vld [vmem:[%s11618_s2 + $0x1f0] sm:$0xff]   ;;  %v8982_v39 = vld [vmem:[%s11618_s2 + $0x1f8] sm:$0xff]  }
 0x27a   : > { %v7900_v42 = vadd.f32 %v7899_v40, %v7898_v38  ;;  %v7901_v44 = vpop.f32.mrb[2].mxu0  ;;  %v7924_v45 = vpop.f32.mrb[3].mxu1  ;;  %v8981_v38 = vld [vmem:[%s11618_s2 + $0x1b0] sm:$0xff]   ;;  %v8983_v40 = vld [vmem:[%s11618_s2 + $0x1b8] sm:$0xff]  }
 0x27b   : > { %v7902_v46 = vpop.f32.mrb[3].mxu0  ;;  %v1248_v47 = vpack.c.bf16 %v7922_v41, %v7922_v41 }
 0x27c   : > { %v1076_v48 = vpack.c.bf16 %v7900_v42, %v7900_v42 }
 0x27d   : > { %v1255_v50 = vsel %vm1253_vm1, %v1248_v47, 0 }
 0x27e   : > { %v1301_v51 = vsel %vm1253_vm1, %v1076_v48, 0  ;;  %8268 = vmatpush3.bf16.msra.mxu0 %v1255_v50 }
 0x27f   : > { %8274 = vmatpush3.bf16.msra.mxu1 %v1301_v51  ;;  %7930 = vmatprep.subr.bf16.mxu0 %v8952_v49 }
 0x280   : > { %8279 = vmatprep.subr.bf16.mxu1 %v9735_v36 }
 0x281   : > { %8270 = vmatmul.mubr.msk.bf16.vlgmr.msra.gmra.mrb[4].mxu0 %vm1249_vm2, %v1247_v52  ;;  %v8984_v52 = vld [vmem:[%s11618_s2 + $0x240] sm:$0xff]  }
 0x282   : > { %8276 = vmatmul.mubr.msk.bf16.vlgmr.msra.gmra.mrb[4].mxu1 %vm1249_vm2, %v1075_v53  ;;  %7931 = vmatpush3.bf16.msra.mxu0 %v8953_v54  ;;  %v1732_v54 = vld [vmem:[#allocation6 + $0xc] sm:$0xf] }
 0x283   : > { %1504 = vmatprep.mubr.bf16.mxu0 %v10308_v35  ;;  %7932 = vmatprep.subr.bf16.mxu0 %v8954_v55  ;;  %v8985_v55 = vld [vmem:[%s11618_s2 + $0x200] sm:$0xff]  }
 0x284   : > { %8281 = vmatprep.mubr.msk.bf16.mxu1 %vm9736_vm0, %v9735_v36 }
 0x286   : > { %7933 = vmatpush3.bf16.msra.mxu0 %v8955_v56  ;;  %v8986_v56 = vld [vmem:[%s11618_s2 + $0x248] sm:$0xff]  }
 0x287   : > { %7934 = vmatprep.subr.bf16.mxu0 %v8956_v57  ;;  %v8987_v57 = vld [vmem:[%s11618_s2 + $0x208] sm:$0xff]  }
 0x28a   : > { %7935 = vmatpush3.bf16.msra.mxu0 %v8957_v58  ;;  %v8988_v58 = vld [vmem:[%s11618_s2 + $0x250] sm:$0xff]  }
 0x28b   : > { %7936 = vmatprep.subr.bf16.mxu0 %v8958_v59  ;;  %v8989_v59 = vld [vmem:[%s11618_s2 + $0x210] sm:$0xff]  }
 0x28e   : > { %7937 = vmatpush3.bf16.msra.mxu0 %v8959_v60  ;;  %v8990_v60 = vld [vmem:[%s11618_s2 + $0x258] sm:$0xff]  }
 0x28f   : > { %7938 = vmatprep.subr.bf16.mxu0 %v8960_v61  ;;  %v8991_v61 = vld [vmem:[%s11618_s2 + $0x218] sm:$0xff]  }
 0x292   : > { %7939 = vmatpush3.bf16.msra.mxu0 %v8961_v62  ;;  %v8992_v62 = vld [vmem:[%s11618_s2 + $0x260] sm:$0xff]  }
 0x293   : > { %7940 = vmatprep.subr.bf16.mxu0 %v8962_v63  ;;  %v8993_v63 = vld [vmem:[%s11618_s2 + $0x220] sm:$0xff]  }
 0x296   : > { %7941 = vmatpush3.bf16.msra.mxu0 %v8963_v0  ;;  %v8994_v0 = vld [vmem:[%s11618_s2 + $0x268] sm:$0xff]  }
 0x297   : > { %7942 = vmatprep.subr.bf16.mxu0 %v8964_v1  ;;  %v8995_v1 = vld [vmem:[%s11618_s2 + $0x228] sm:$0xff]  }
 0x29a   : > { %7943 = vmatpush3.bf16.msra.mxu0 %v8965_v2  ;;  %v8996_v2 = vld [vmem:[%s11618_s2 + $0x270] sm:$0xff]  }
 0x29b   : > { %7944 = vmatprep.subr.bf16.mxu0 %v8966_v3  ;;  %v8997_v3 = vld [vmem:[%s11618_s2 + $0x230] sm:$0xff]  }
 0x29e   : > { %7945 = vmatpush3.bf16.msra.mxu0 %v8967_v4  ;;  %v8998_v4 = vld [vmem:[%s11618_s2 + $0x278] sm:$0xff]  }
 0x29f   : > { %8285 = vmatprep.subr.bf16.mxu0 %v9735_v36 }
 0x2a1   : > { %1505 = vmatmul.mubr.bf16.vlgmr.msra.gmra.mrb[8].mxu0 %v10306_v34 }
 0x2a2   : > { %8287 = vmatprep.mubr.msk.bf16.mxu0 %vm9736_vm0, %v9735_v36 }
 0x354   : > { %v1291_v5 = vpop.f32.mrb[4].mxu0 }
 0x355   : > { %v1337_v6 = vpop.f32.mrb[4].mxu1  ;;  %v8271_v7 = vpop.f32.mrb[5].mxu0 }
 0x356   : > { %v1338_v8 = vadd.f32 %v1337_v6, %v1291_v5  ;;  %v8277_v9 = vpop.f32.mrb[5].mxu1  ;;  %v1294_v10 = vpop.f32.mrb[6].mxu0  ;;  %v8999_v5 = vld [vmem:[%s11618_s2 + $0x238] sm:$0xff]  }
 0x357   : > { %v1340_v11 = vpop.f32.mrb[6].mxu1  ;;  %v8272_v12 = vpop.f32.mrb[7].mxu0 }
 0x358   : > { %v8278_v13 = vpop.f32.mrb[7].mxu1 }
 0x374   : > { %v7946_v14 = vpop.f32.mrb[8].mxu0 }
 0x375   : > { %v7947_v15 = vpop.f32.mrb[9].mxu0 }
 0x376   : > { %v7948_v16 = vadd.f32 %v7947_v15, %v7946_v14  ;;  %v7949_v17 = vpop.f32.mrb[10].mxu0 }
 0x377   : > { %v7950_v18 = vpop.f32.mrb[11].mxu0  ;;  %v9000_v17 = vld [vmem:[%s11618_s2 + $0x2c0] sm:$0xff]  }
 0x378   : > { %v1514_v19 = vpack.c.bf16 %v7948_v16, %v7948_v16 }
 0x37a   : > { %v1519_v21 = vsel %vm1253_vm1, %v1514_v19, 0  ;;  %v1951_v19 = vld [vmem:[#allocation6 + $0x10] sm:$0xf] }
 0x37b   : > { %8280 = vmatpush3.bf16.msra.mxu1 %v1519_v21  ;;  %v9002_v21 = vld [vmem:[%s11618_s2 + $0x2c8] sm:$0xff]  }
 0x37c   : > { %7954 = vmatprep.subr.bf16.mxu1 %v8968_v20  ;;  %v9001_v20 = vld [vmem:[%s11618_s2 + $0x280] sm:$0xff]  }
 0x37e   : > { %8282 = vmatmul.mubr.msk.bf16.vlgmr.msra.gmra.mrb[8].mxu1 %vm1249_vm2, %v1513_v22  ;;  %v9003_v22 = vld [vmem:[%s11618_s2 + $0x288] sm:$0xff]  }
 0x37f   : > { %7955 = vmatpush3.bf16.msra.mxu1 %v8969_v23  ;;  %1723 = vmatprep.mubr.bf16.mxu1 %v10308_v35  ;;  %v9004_v23 = vld [vmem:[%s11618_s2 + $0x2d0] sm:$0xff]  }
 0x380   : > { %7956 = vmatprep.subr.bf16.mxu1 %v8970_v24  ;;  %v9005_v24 = vld [vmem:[%s11618_s2 + $0x290] sm:$0xff]  }
 0x383   : > { %7957 = vmatpush3.bf16.msra.mxu1 %v8971_v25  ;;  %v9006_v25 = vld [vmem:[%s11618_s2 + $0x2d8] sm:$0xff]  }
 0x384   : > { %7958 = vmatprep.subr.bf16.mxu1 %v8972_v26  ;;  %v9007_v26 = vld [vmem:[%s11618_s2 + $0x298] sm:$0xff]  }
 0x387   : > { %7959 = vmatpush3.bf16.msra.mxu1 %v8973_v27  ;;  %v9008_v27 = vld [vmem:[%s11618_s2 + $0x2e0] sm:$0xff]  }
 0x388   : > { %7960 = vmatprep.subr.bf16.mxu1 %v8974_v28  ;;  %v9009_v28 = vld [vmem:[%s11618_s2 + $0x2a0] sm:$0xff]  }
 0x38b   : > { %7961 = vmatpush3.bf16.msra.mxu1 %v8975_v29  ;;  %v9010_v29 = vld [vmem:[%s11618_s2 + $0x2e8] sm:$0xff]  }
 0x38c   : > { %7962 = vmatprep.subr.bf16.mxu1 %v8976_v30  ;;  %v9011_v30 = vld [vmem:[%s11618_s2 + $0x2a8] sm:$0xff]  }
 0x38f   : > { %7963 = vmatpush3.bf16.msra.mxu1 %v8977_v31  ;;  %v9012_v31 = vld [vmem:[%s11618_s2 + $0x2f0] sm:$0xff]  }
 0x390   : > { %7964 = vmatprep.subr.bf16.mxu1 %v8978_v32  ;;  %v9013_v32 = vld [vmem:[%s11618_s2 + $0x2b0] sm:$0xff]  }
 0x393   : > { %7965 = vmatpush3.bf16.msra.mxu1 %v8979_v33  ;;  %v9014_v33 = vld [vmem:[%s11618_s2 + $0x2f8] sm:$0xff]  }
 0x394   : > { %7966 = vmatprep.subr.bf16.mxu1 %v8980_v37  ;;  %v9015_v37 = vld [vmem:[%s11618_s2 + $0x2b8] sm:$0xff]  }
 0x397   : > { %7967 = vmatpush3.bf16.msra.mxu1 %v8981_v38 }
 0x398   : > { %7968 = vmatprep.subr.bf16.mxu1 %v8982_v39 }
 0x39b   : > { %7969 = vmatpush3.bf16.msra.mxu1 %v8983_v40 }
 0x39c   : > { %8291 = vmatprep.subr.bf16.mxu1 %v9735_v36 }
 0x39e   : > { %1724 = vmatmul.mubr.bf16.vlgmr.msra.gmra.mrb[12].mxu1 %v10306_v34 }
 0x39f   : > { %8293 = vmatprep.mubr.msk.bf16.mxu1 %vm9736_vm0, %v9735_v36 }
 0x451   : > { %v1555_v41 = vpop.f32.mrb[8].mxu1 }
 0x452   : > { %v1561_v42 = vadd.f32 %v1555_v41, %v1338_v8  ;;  %v8283_v43 = vpop.f32.mrb[9].mxu1 }
 0x453   : > { %v1558_v44 = vpop.f32.mrb[10].mxu1 }
 0x454   : > { %v8284_v45 = vpop.f32.mrb[11].mxu1 }
 0x471   : > { %v7970_v46 = vpop.f32.mrb[12].mxu1 }
 0x472   : > { %v7971_v47 = vpop.f32.mrb[13].mxu1 }
 0x473   : > { %v7972_v48 = vadd.f32 %v7971_v47, %v7970_v46  ;;  %v7973_v49 = vpop.f32.mrb[14].mxu1 }
 0x474   : > { %v7974_v50 = vpop.f32.mrb[15].mxu1  ;;  %v9016_v49 = vld [vmem:[%s11618_s2 + $0x340] sm:$0xff]  }
 0x475   : > { %v1733_v51 = vpack.c.bf16 %v7972_v48, %v7972_v48 }
 0x477   : > { %v1738_v53 = vsel %vm1253_vm1, %v1733_v51, 0  ;;  %v2170_v51 = vld [vmem:[#allocation6 + $0x14] sm:$0xf] }
 0x478   : > { %8286 = vmatpush3.bf16.msra.mxu0 %v1738_v53  ;;  %v9018_v53 = vld [vmem:[%s11618_s2 + $0x348] sm:$0xff]  }
 0x479   : > { %7978 = vmatprep.subr.bf16.mxu0 %v8984_v52  ;;  %v9017_v52 = vld [vmem:[%s11618_s2 + $0x300] sm:$0xff]  }
 0x47b   : > { %8288 = vmatmul.mubr.msk.bf16.vlgmr.msra.gmra.mrb[12].mxu0 %vm1249_vm2, %v1732_v54  ;;  %v9019_v54 = vld [vmem:[%s11618_s2 + $0x308] sm:$0xff]  }
 0x47c   : > { %7979 = vmatpush3.bf16.msra.mxu0 %v8985_v55  ;;  %1942 = vmatprep.mubr.bf16.mxu0 %v10308_v35  ;;  %v9020_v55 = vld [vmem:[%s11618_s2 + $0x350] sm:$0xff]  }
 0x47d   : > { %7980 = vmatprep.subr.bf16.mxu0 %v8986_v56  ;;  %v9021_v56 = vld [vmem:[%s11618_s2 + $0x310] sm:$0xff]  }
 0x480   : > { %7981 = vmatpush3.bf16.msra.mxu0 %v8987_v57  ;;  %v9022_v57 = vld [vmem:[%s11618_s2 + $0x358] sm:$0xff]  }
 0x481   : > { %7982 = vmatprep.subr.bf16.mxu0 %v8988_v58  ;;  %v9023_v58 = vld [vmem:[%s11618_s2 + $0x318] sm:$0xff]  }
 0x484   : > { %7983 = vmatpush3.bf16.msra.mxu0 %v8989_v59  ;;  %v9024_v59 = vld [vmem:[%s11618_s2 + $0x360] sm:$0xff]  }
 0x485   : > { %7984 = vmatprep.subr.bf16.mxu0 %v8990_v60  ;;  %v9025_v60 = vld [vmem:[%s11618_s2 + $0x320] sm:$0xff]  }
 0x488   : > { %7985 = vmatpush3.bf16.msra.mxu0 %v8991_v61  ;;  %v9026_v61 = vld [vmem:[%s11618_s2 + $0x368] sm:$0xff]  }
 0x489   : > { %7986 = vmatprep.subr.bf16.mxu0 %v8992_v62  ;;  %v9027_v62 = vld [vmem:[%s11618_s2 + $0x328] sm:$0xff]  }
 0x48c   : > { %7987 = vmatpush3.bf16.msra.mxu0 %v8993_v63  ;;  %v9028_v63 = vld [vmem:[%s11618_s2 + $0x370] sm:$0xff]  }
 0x48d   : > { %7988 = vmatprep.subr.bf16.mxu0 %v8994_v0  ;;  %v9029_v0 = vld [vmem:[%s11618_s2 + $0x330] sm:$0xff]  }
 0x490   : > { %7989 = vmatpush3.bf16.msra.mxu0 %v8995_v1  ;;  %v9030_v1 = vld [vmem:[%s11618_s2 + $0x378] sm:$0xff]  }
 0x491   : > { %7990 = vmatprep.subr.bf16.mxu0 %v8996_v2  ;;  %v9031_v2 = vld [vmem:[%s11618_s2 + $0x338] sm:$0xff]  }
 0x494   : > { %7991 = vmatpush3.bf16.msra.mxu0 %v8997_v3 }
 0x495   : > { %7992 = vmatprep.subr.bf16.mxu0 %v8998_v4 }
 0x498   : > { %7993 = vmatpush3.bf16.msra.mxu0 %v8999_v5 }
 0x499   : > { %8297 = vmatprep.subr.bf16.mxu0 %v9735_v36 }
 0x49b   : > { %1943 = vmatmul.mubr.bf16.vlgmr.msra.gmra.mrb[16].mxu0 %v10306_v34 }
 0x49c   : > { %8299 = vmatprep.mubr.msk.bf16.mxu0 %vm9736_vm0, %v9735_v36 }
 0x54e   : > { %v1774_v6 = vpop.f32.mrb[12].mxu0 }
 0x54f   : > { %v1780_v7 = vadd.f32 %v1774_v6, %v1561_v42  ;;  %v8289_v8 = vpop.f32.mrb[13].mxu0 }
 0x550   : > { %v1777_v9 = vpop.f32.mrb[14].mxu0 }
 0x551   : > { %v8290_v10 = vpop.f32.mrb[15].mxu0 }
 0x56e   : > { %v7994_v11 = vpop.f32.mrb[16].mxu0 }
 0x56f   : > { %v7995_v12 = vpop.f32.mrb[17].mxu0 }
 0x570   : > { %v7996_v13 = vadd.f32 %v7995_v12, %v7994_v11  ;;  %v7997_v14 = vpop.f32.mrb[18].mxu0 }
 0x571   : > { %v7998_v15 = vpop.f32.mrb[19].mxu0  ;;  %v9032_v14 = vld [vmem:[%s11618_s2 + $0x3c0] sm:$0xff]  }
 0x572   : > { %v1952_v16 = vpack.c.bf16 %v7996_v13, %v7996_v13 }
 0x574   : > { %v1957_v18 = vsel %vm1253_vm1, %v1952_v16, 0  ;;  %v2389_v16 = vld [vmem:[#allocation6 + $0x18] sm:$0xf] }
 0x575   : > { %8292 = vmatpush3.bf16.msra.mxu1 %v1957_v18  ;;  %v9034_v18 = vld [vmem:[%s11618_s2 + $0x3c8] sm:$0xff]  }
 0x576   : > { %8002 = vmatprep.subr.bf16.mxu1 %v9000_v17  ;;  %v9033_v17 = vld [vmem:[%s11618_s2 + $0x380] sm:$0xff]  }
 0x578   : > { %8294 = vmatmul.mubr.msk.bf16.vlgmr.msra.gmra.mrb[16].mxu1 %vm1249_vm2, %v1951_v19  ;;  %v9035_v19 = vld [vmem:[%s11618_s2 + $0x388] sm:$0xff]  }
 0x579   : > { %8003 = vmatpush3.bf16.msra.mxu1 %v9001_v20  ;;  %2161 = vmatprep.mubr.bf16.mxu1 %v10308_v35  ;;  %v9036_v20 = vld [vmem:[%s11618_s2 + $0x3d0] sm:$0xff]  }
 0x57a   : > { %8004 = vmatprep.subr.bf16.mxu1 %v9002_v21  ;;  %v9037_v21 = vld [vmem:[%s11618_s2 + $0x390] sm:$0xff]  }
 0x57d   : > { %8005 = vmatpush3.bf16.msra.mxu1 %v9003_v22  ;;  %v9038_v22 = vld [vmem:[%s11618_s2 + $0x3d8] sm:$0xff]  }
 0x57e   : > { %8006 = vmatprep.subr.bf16.mxu1 %v9004_v23  ;;  %v9039_v23 = vld [vmem:[%s11618_s2 + $0x398] sm:$0xff]  }
 0x581   : > { %8007 = vmatpush3.bf16.msra.mxu1 %v9005_v24  ;;  %v9040_v24 = vld [vmem:[%s11618_s2 + $0x3e0] sm:$0xff]  }
 0x582   : > { %8008 = vmatprep.subr.bf16.mxu1 %v9006_v25  ;;  %v9041_v25 = vld [vmem:[%s11618_s2 + $0x3a0] sm:$0xff]  }
 0x585   : > { %8009 = vmatpush3.bf16.msra.mxu1 %v9007_v26  ;;  %v9042_v26 = vld [vmem:[%s11618_s2 + $0x3e8] sm:$0xff]  }
 0x586   : > { %8010 = vmatprep.subr.bf16.mxu1 %v9008_v27  ;;  %v9043_v27 = vld [vmem:[%s11618_s2 + $0x3a8] sm:$0xff]  }
 0x589   : > { %8011 = vmatpush3.bf16.msra.mxu1 %v9009_v28  ;;  %v9044_v28 = vld [vmem:[%s11618_s2 + $0x3f0] sm:$0xff]  }
 0x58a   : > { %8012 = vmatprep.subr.bf16.mxu1 %v9010_v29  ;;  %v9045_v29 = vld [vmem:[%s11618_s2 + $0x3b0] sm:$0xff]  }
 0x58d   : > { %8013 = vmatpush3.bf16.msra.mxu1 %v9011_v30  ;;  %v9046_v30 = vld [vmem:[%s11618_s2 + $0x3f8] sm:$0xff]  }
 0x58e   : > { %8014 = vmatprep.subr.bf16.mxu1 %v9012_v31  ;;  %v9047_v31 = vld [vmem:[%s11618_s2 + $0x3b8] sm:$0xff]  }
 0x591   : > { %8015 = vmatpush3.bf16.msra.mxu1 %v9013_v32 }
 0x592   : > { %8016 = vmatprep.subr.bf16.mxu1 %v9014_v33 }
 0x595   : > { %8017 = vmatpush3.bf16.msra.mxu1 %v9015_v37 }
 0x596   : > { %8303 = vmatprep.subr.bf16.mxu1 %v9735_v36 }
 0x598   : > { %2162 = vmatmul.mubr.bf16.vlgmr.msra.gmra.mrb[20].mxu1 %v10306_v34 }
 0x599   : > { %8305 = vmatprep.mubr.msk.bf16.mxu1 %vm9736_vm0, %v9735_v36 }
 0x64b   : > { %v1993_v38 = vpop.f32.mrb[16].mxu1 }
 0x64c   : > { %v1999_v39 = vadd.f32 %v1993_v38, %v1780_v7  ;;  %v8295_v40 = vpop.f32.mrb[17].mxu1 }
 0x64d   : > { %v1996_v41 = vpop.f32.mrb[18].mxu1 }
 0x64e   : > { %v8296_v42 = vpop.f32.mrb[19].mxu1 }
 0x66b   : > { %v8018_v43 = vpop.f32.mrb[20].mxu1 }
 0x66c   : > { %v8019_v44 = vpop.f32.mrb[21].mxu1 }
 0x66d   : > { %v8020_v45 = vadd.f32 %v8019_v44, %v8018_v43  ;;  %v8021_v46 = vpop.f32.mrb[22].mxu1 }
 0x66e   : > { %v8022_v47 = vpop.f32.mrb[23].mxu1  ;;  %v9048_v46 = vld [vmem:[%s11618_s2 + $0x440] sm:$0xff]  }
 0x66f   : > { %v2171_v48 = vpack.c.bf16 %v8020_v45, %v8020_v45 }
 0x671   : > { %v2176_v50 = vsel %vm1253_vm1, %v2171_v48, 0  ;;  %v2608_v48 = vld [vmem:[#allocation6 + $0x1c] sm:$0xf] }
 0x672   : > { %8298 = vmatpush3.bf16.msra.mxu0 %v2176_v50  ;;  %v9050_v50 = vld [vmem:[%s11618_s2 + $0x448] sm:$0xff]  }
 0x673   : > { %8026 = vmatprep.subr.bf16.mxu0 %v9016_v49  ;;  %v9049_v49 = vld [vmem:[%s11618_s2 + $0x400] sm:$0xff]  }
 0x675   : > { %8300 = vmatmul.mubr.msk.bf16.vlgmr.msra.gmra.mrb[20].mxu0 %vm1249_vm2, %v2170_v51  ;;  %v9051_v51 = vld [vmem:[%s11618_s2 + $0x408] sm:$0xff]  }
 0x676   : > { %8027 = vmatpush3.bf16.msra.mxu0 %v9017_v52  ;;  %2380 = vmatprep.mubr.bf16.mxu0 %v10308_v35  ;;  %v9052_v52 = vld [vmem:[%s11618_s2 + $0x450] sm:$0xff]  }
 0x677   : > { %8028 = vmatprep.subr.bf16.mxu0 %v9018_v53  ;;  %v9053_v53 = vld [vmem:[%s11618_s2 + $0x410] sm:$0xff]  }
 0x67a   : > { %8029 = vmatpush3.bf16.msra.mxu0 %v9019_v54  ;;  %v9054_v54 = vld [vmem:[%s11618_s2 + $0x458] sm:$0xff]  }
 0x67b   : > { %8030 = vmatprep.subr.bf16.mxu0 %v9020_v55  ;;  %v9056_v55 = vld [vmem:[%s11618_s2 + $0x460] sm:$0xff]  }
 0x67e   : > { %8031 = vmatpush3.bf16.msra.mxu0 %v9021_v56  ;;  %v9057_v56 = vld [vmem:[%s11618_s2 + $0x420] sm:$0xff]  }
 0x67f   : > { %8032 = vmatprep.subr.bf16.mxu0 %v9022_v57  ;;  %v9058_v57 = vld [vmem:[%s11618_s2 + $0x468] sm:$0xff]  }
 0x682   : > { %8033 = vmatpush3.bf16.msra.mxu0 %v9023_v58  ;;  %v9059_v58 = vld [vmem:[%s11618_s2 + $0x428] sm:$0xff]  }
 0x683   : > { %8034 = vmatprep.subr.bf16.mxu0 %v9024_v59  ;;  %v9060_v59 = vld [vmem:[%s11618_s2 + $0x470] sm:$0xff]  }
 0x686   : > { %8035 = vmatpush3.bf16.msra.mxu0 %v9025_v60  ;;  %v9061_v60 = vld [vmem:[%s11618_s2 + $0x430] sm:$0xff]  }
 0x687   : > { %8036 = vmatprep.subr.bf16.mxu0 %v9026_v61  ;;  %v9062_v61 = vld [vmem:[%s11618_s2 + $0x478] sm:$0xff]  }
 0x68a   : > { %8037 = vmatpush3.bf16.msra.mxu0 %v9027_v62  ;;  %v9063_v62 = vld [vmem:[%s11618_s2 + $0x438] sm:$0xff]  }
 0x68b   : > { %8038 = vmatprep.subr.bf16.mxu0 %v9028_v63  ;;  %v2876_v63 = vld [vmem:[#allocation7] sm:$0xff] }
 0x68e   : > { %8039 = vmatpush3.bf16.msra.mxu0 %v9029_v0  ;;  %v9737_v0 = vmov 0  }
 0x68f   : > { %8040 = vmatprep.subr.bf16.mxu0 %v9030_v1  ;;  %8847 = vset.pattern.permute.xlu0 %v9737_v0 }
 0x690   : > { %8848 = vset.pattern.permute.xlu1 %v9737_v0  ;;  %2879 = vperm.xlu0 %8847, %v2876_v63  }
 0x692   : > { %8041 = vmatpush3.bf16.msra.mxu0 %v9031_v2 }
 0x693   : > { %8309 = vmatprep.subr.bf16.mxu0 %v9735_v36 }
 0x695   : > { %2381 = vmatmul.mubr.bf16.vlgmr.msra.gmra.mrb[24].mxu0 %v10306_v34 }
 0x696   : > { %8311 = vmatprep.mubr.msk.bf16.mxu0 %vm9736_vm0, %v9735_v36 }
 0x748   : > { %v2212_v3 = vpop.f32.mrb[20].mxu0 }
 0x749   : > { %v2218_v4 = vadd.f32 %v2212_v3, %v1999_v39  ;;  %v8301_v5 = vpop.f32.mrb[21].mxu0 }
 0x74a   : > { %v2215_v6 = vpop.f32.mrb[22].mxu0 }
 0x74b   : > { %v8302_v7 = vpop.f32.mrb[23].mxu0 }
 0x768   : > { %v8042_v8 = vpop.f32.mrb[24].mxu0 }
 0x769   : > { %v8043_v9 = vpop.f32.mrb[25].mxu0 }
 0x76a   : > { %v8044_v10 = vadd.f32 %v8043_v9, %v8042_v8  ;;  %v8045_v11 = vpop.f32.mrb[26].mxu0 }
 0x76b   : > { %v8046_v12 = vpop.f32.mrb[27].mxu0 }
 0x76c   : > { %v2390_v13 = vpack.c.bf16 %v8044_v10, %v8044_v10  ;;  %v2827_v12 = vld [vmem:[#allocation6 + $0x20] sm:$0xf] }
 0x76e   : > { %v2395_v15 = vsel %vm1253_vm1, %v2390_v13, 0 }
 0x76f   : > { %8304 = vmatpush3.bf16.msra.mxu1 %v2395_v15 }
 0x770   : > { %8050 = vmatprep.subr.bf16.mxu1 %v9032_v14  ;;  %v2880_v14 = vpop.permute.xlu0 %2879 }
 0x772   : > { %8306 = vmatmul.mubr.msk.bf16.vlgmr.msra.gmra.mrb[24].mxu1 %vm1249_vm2, %v2389_v16 }
 0x773   : > { %8051 = vmatpush3.bf16.msra.mxu1 %v9033_v17  ;;  %2599 = vmatprep.mubr.bf16.mxu1 %v10308_v35 }
 0x774   : > { %8052 = vmatprep.subr.bf16.mxu1 %v9034_v18 }
 0x777   : > { %8053 = vmatpush3.bf16.msra.mxu1 %v9035_v19 }
 0x778   : > { %8054 = vmatprep.subr.bf16.mxu1 %v9036_v20 }
 0x77b   : > { %8055 = vmatpush3.bf16.msra.mxu1 %v9037_v21 }
 0x77c   : > { %8056 = vmatprep.subr.bf16.mxu1 %v9038_v22 }
 0x77f   : > { %8057 = vmatpush3.bf16.msra.mxu1 %v9039_v23 }
 0x780   : > { %8058 = vmatprep.subr.bf16.mxu1 %v9040_v24 }
 0x783   : > { %8059 = vmatpush3.bf16.msra.mxu1 %v9041_v25 }
 0x784   : > { %8060 = vmatprep.subr.bf16.mxu1 %v9042_v26  ;;  %v9064_v26 = vld [vmem:[#allocation9] sm:$0xff]  }
 0x787   : > { %8061 = vmatpush3.bf16.msra.mxu1 %v9043_v27  ;;  %v9065_v27 = vld [vmem:[#allocation9 + $0x8] sm:$0xff]  }
 0x788   : > { %8062 = vmatprep.subr.bf16.mxu1 %v9044_v28  ;;  %v9066_v28 = vld [vmem:[#allocation9 + $0x10] sm:$0xff]  }
 0x78b   : > { %8063 = vmatpush3.bf16.msra.mxu1 %v9045_v29  ;;  %v9067_v29 = vld [vmem:[#allocation9 + $0x18] sm:$0xff]  }
 0x78c   : > { %8064 = vmatprep.subr.bf16.mxu1 %v9046_v30 }
 0x78f   : > { %8065 = vmatpush3.bf16.msra.mxu1 %v9047_v31 }
 0x790   : > { %8315 = vmatprep.subr.bf16.mxu1 %v9735_v36 }
 0x792   : > { %2600 = vmatmul.mubr.bf16.vlgmr.msra.gmra.mrb[28].mxu1 %v10306_v34 }
 0x793   : > { %8317 = vmatprep.mubr.msk.bf16.mxu1 %vm9736_vm0, %v9735_v36 }
 0x845   : > { %v2431_v32 = vpop.f32.mrb[24].mxu1 }
 0x846   : > { %v2437_v33 = vadd.f32 %v2431_v32, %v2218_v4  ;;  %v8307_v37 = vpop.f32.mrb[25].mxu1 }
 0x847   : > { %v2434_v38 = vpop.f32.mrb[26].mxu1  ;;  %v2900_v37 = vstv %s2883_s28  ;;  %s11625_s28 = sld [smem:[#allocation56_spill]] }
 0x848   : > { %v8308_v39 = vpop.f32.mrb[27].mxu1 }
 0x865   : > { %v8066_v40 = vpop.f32.mrb[28].mxu1 }
 0x866   : > { %v8067_v41 = vpop.f32.mrb[29].mxu1 }
 0x867   : > { %v8068_v42 = vadd.f32 %v8067_v41, %v8066_v40  ;;  %v8069_v43 = vpop.f32.mrb[30].mxu1  ;;  %v9068_v41 = vld [vmem:[#allocation9 + $0x20] sm:$0xff]  }
 0x868   : > { %v8070_v44 = vpop.f32.mrb[31].mxu1  ;;  %v9069_v43 = vld [vmem:[#allocation9 + $0x28] sm:$0xff]  }
 0x869   : > { %v2609_v45 = vpack.c.bf16 %v8068_v42, %v8068_v42  ;;  %v9070_v44 = vld [vmem:[#allocation9 + $0x30] sm:$0xff]  }
 0x86b   : > { %v2614_v47 = vsel %vm1253_vm1, %v2609_v45, 0  ;;  %v9071_v45 = vld [vmem:[#allocation9 + $0x38] sm:$0xff]  }
 0x86c   : > { %8310 = vmatpush3.bf16.msra.mxu0 %v2614_v47  ;;  %v9073_v47 = vld [vmem:[#allocation9 + $0x48] sm:$0xff]  }
 0x86d   : > { %8074 = vmatprep.subr.bf16.mxu0 %v9048_v46  ;;  %v9072_v46 = vld [vmem:[#allocation9 + $0x40] sm:$0xff]  }
 0x86f   : > { %8312 = vmatmul.mubr.msk.bf16.vlgmr.msra.gmra.mrb[28].mxu0 %vm1249_vm2, %v2608_v48  ;;  %v9074_v48 = vld [vmem:[#allocation9 + $0x50] sm:$0xff]  }
 0x870   : > { %8075 = vmatpush3.bf16.msra.mxu0 %v9049_v49  ;;  %2818 = vmatprep.mubr.bf16.mxu0 %v10308_v35  ;;  %v9055_v35 = vld [vmem:[%s11618_s2 + $0x418] sm:$0xff]   ;;  %v9075_v49 = vld [vmem:[#allocation9 + $0x58] sm:$0xff]  }
 0x871   : > { %8076 = vmatprep.subr.bf16.mxu0 %v9050_v50 }
 0x874   : > { %8077 = vmatpush3.bf16.msra.mxu0 %v9051_v51 }
 0x875   : > { %8078 = vmatprep.subr.bf16.mxu0 %v9052_v52 }
 0x878   : > { %8079 = vmatpush3.bf16.msra.mxu0 %v9053_v53 }
 0x879   : > { %8080 = vmatprep.subr.bf16.mxu0 %v9054_v54 }
 0x87c   : > { %8081 = vmatpush3.bf16.msra.mxu0 %v9055_v35 }
 0x87d   : > { %8082 = vmatprep.subr.bf16.mxu0 %v9056_v55 }
 0x880   : > { %8083 = vmatpush3.bf16.msra.mxu0 %v9057_v56 }
 0x881   : > { %8084 = vmatprep.subr.bf16.mxu0 %v9058_v57 }
 0x884   : > { %8085 = vmatpush3.bf16.msra.mxu0 %v9059_v58 }
 0x885   : > { %8086 = vmatprep.subr.bf16.mxu0 %v9060_v59 }
 0x888   : > { %8087 = vmatpush3.bf16.msra.mxu0 %v9061_v60  ;;  %v9076_v60 = vld [vmem:[%s11620_s16 + $0x8] sm:$0xff]  }
 0x889   : > { %8088 = vmatprep.subr.bf16.mxu0 %v9062_v61 }
 0x88c   : > { %8089 = vmatpush3.bf16.msra.mxu0 %v9063_v62  ;;  %v9077_v62 = vld [vmem:[%s11620_s16] sm:$0xff]  }
 0x88d   : > { %8345 = vmatprep.subr.bf16.mxu0 %v9735_v36 }
 0x88f   : > { %2819 = vmatmul.mubr.bf16.vlgmr.msra.gmra.mrb[32].mxu0 %v10306_v34 }
 0x890   : > { %8347 = vmatprep.mubr.msk.bf16.mxu0 %vm9736_vm0, %v9735_v36 }
 0x942   : > { %v2650_v1 = vpop.f32.mrb[28].mxu0 }
 0x943   : > { %v2656_v2 = vadd.f32 %v2650_v1, %v2437_v33  ;;  %v8313_v3 = vpop.f32.mrb[29].mxu0 }
 0x944   : > { %v2653_v4 = vpop.f32.mrb[30].mxu0 }
 0x945   : > { %v8314_v5 = vpop.f32.mrb[31].mxu0 }
 0x962   : > { %v8090_v6 = vpop.f32.mrb[32].mxu0 }
 0x963   : > { %v8091_v7 = vpop.f32.mrb[33].mxu0 }
 0x964   : > { %v8092_v8 = vadd.f32 %v8091_v7, %v8090_v6  ;;  %v8093_v9 = vpop.f32.mrb[34].mxu0  ;;  %v9078_v6 = vld [vmem:[%s11620_s16 + $0x10] sm:$0xff]  }
 0x965   : > { %v8094_v34 = vpop.f32.mrb[35].mxu0  ;;  %v9079_v7 = vld [vmem:[#allocation9 + $0x60] sm:$0xff]   ;;  %v9081_v9 = vld [vmem:[#allocation9 + $0x70] sm:$0xff]  }
 0x966   : > { %v2828_v10 = vpack.c.bf16 %v8092_v8, %v8092_v8  ;;  %v9080_v8 = vld [vmem:[#allocation9 + $0x68] sm:$0xff]   ;;  %v9082_v34 = vld [vmem:[#allocation9 + $0x78] sm:$0xff]  }
 0x968   : > { %v2833_v11 = vsel %vm1253_vm1, %v2828_v10, 0 }
 0x969   : > { %8316 = vmatpush3.bf16.msra.mxu1 %v2833_v11 }
 0x96a   : > { %8321 = vmatprep.subr.bf16.mxu1 %v9735_v36 }
 0x96c   : > { %8318 = vmatmul.mubr.msk.bf16.vlgmr.msra.gmra.mrb[32].mxu1 %vm1249_vm2, %v2827_v12  ;;  %vm4573_vm2 = vcmask 1040384  }
 0x96d   : > { %8329 = vmatprep.mubr.msk.bf16.mxu1 %vm9736_vm0, %v9735_v36  ;;  %8322 = vmatpush3.bf16.msra.mxu1 %v9064_v26 }
 0x96e   : > { %8323 = vmatprep.subr.bf16.mxu1 %v9735_v36 }
 0x971   : > { %8324 = vmatpush3.bf16.msra.mxu1 %v9065_v27 }
 0x972   : > { %8325 = vmatprep.subr.bf16.mxu1 %v9735_v36 }
 0x975   : > { %8326 = vmatpush3.bf16.msra.mxu1 %v9066_v28 }
 0x976   : > { %8327 = vmatprep.subr.bf16.mxu1 %v9735_v36 }
 0x979   : > { %8328 = vmatpush3.bf16.msra.mxu1 %v9067_v29 }
 0x97a   : > { %8333 = vmatprep.subr.bf16.mxu1 %v9735_v36 }
 0xa3f   : > { %v2869_v13 = vpop.f32.mrb[32].mxu1 }
 0xa40   : > { %v2875_v15 = vadd.f32 %v2869_v13, %v2656_v2  ;;  %v8319_v16 = vpop.f32.mrb[33].mxu1 }
 0xa41   : > { %v2872_v17 = vpop.f32.mrb[34].mxu1 }
 0xa42   : > { %v2882_v18 = vadd.f32 %v2880_v14, %v2875_v15  ;;  %v8320_v19 = vpop.f32.mrb[35].mxu1 }
 0xa44   : > { %v2885_v20 = vsel %vm2884_vm3, %v2882_v18, 0.0 }
 0xa45   : > { %2886 = vadd.xlane.f32.xlu0 %v2885_v20 }
 0xad2   : > { %v2887_v21 = vpop.xlane.xlu0 %2886 }
 0xad3   : > { %v2889_v22 = vmul.f32 0.015625, %v2887_v21 }
 0xad5   : > { %v2890_v23 = vsub.f32 %v2882_v18, %v2889_v22 }
 0xad7   : > { %v2891_v24 = vmul.f32 %v2890_v23, %v2890_v23 }
 0xad9   : > { %v2892_v25 = vsel %vm2884_vm3, %v2891_v24, 0.0 }
 0xada   : > { %2893 = vadd.xlane.f32.xlu1 %v2892_v25 }
 0xb67   : > { %v2894_v30 = vpop.xlane.xlu1 %2893 }
 0xb68   : > { %v2895_v31 = vmul.f32 0.015625, %v2894_v30 }
 0xb6a   : > { %v2896_v32 = vadd.f32 1e-05, %v2895_v31 }
 0xb6c   : > { %9226 = vrsqrt.f32 %v2896_v32  ;;  %v9083_v32 = vld [vmem:[%s11620_s16 + $0x18] sm:$0xff]  }
 0xb76   : > { %v9227_v33 = vpop.eup %9226 }
 0xb77   : > { %v2898_v38 = vmul.f32 %v9227_v33, %v2890_v23  ;;  %v9084_v33 = vld [vmem:[#allocation9 + $0x80] sm:$0xff]  }
 0xb79   : > { %vm2899_vm4 = vcmp.ge.f32.partialorder %v2898_v38, 0.0  ;;  %v2901_v39 = vmul.f32 %v2900_v37, %v2898_v38  ;;  %v9085_v37 = vld [vmem:[#allocation9 + $0x88] sm:$0xff]  }
 0xb7b   : > { %v2902_v40 = vsel %vm2899_vm4, %v2898_v38, %v2901_v39  ;;  %v9086_v38 = vld [vmem:[#allocation9 + $0x90] sm:$0xff]   ;;  %v9087_v39 = vld [vmem:[#allocation9 + $0x98] sm:$0xff]   ;;  %vm4576_vm4 = vcmask 1042432  }
 0xb7c   : > { %v10723_v42 = vpack.c.bf16 %v2902_v40, %v2902_v40 }
 0xb7e   : > { %8330 = vmatmul.mubr.msk.bf16.vlgmr.msra.gmra.mrb[36].mxu1 %vm2884_vm3, %v10723_v42 }
 0xb7f   : > { %8334 = vmatpush3.bf16.msra.mxu1 %v9068_v41  ;;  %8341 = vmatprep.mubr.msk.bf16.mxu1 %vm9736_vm0, %v9735_v36 }
 0xb80   : > { %8335 = vmatprep.subr.bf16.mxu1 %v9735_v36 }
 0xb83   : > { %8336 = vmatpush3.bf16.msra.mxu1 %v9069_v43 }
 0xb84   : > { %8337 = vmatprep.subr.bf16.mxu1 %v9735_v36 }
 0xb87   : > { %8338 = vmatpush3.bf16.msra.mxu1 %v9070_v44 }
 0xb88   : > { %8339 = vmatprep.subr.bf16.mxu1 %v9735_v36 }
 0xb8b   : > { %8340 = vmatpush3.bf16.msra.mxu1 %v9071_v45 }
 0xb8c   : > { %8357 = vmatprep.subr.bf16.mxu1 %v9735_v36 }
 0xb8e   : > { %8342 = vmatmul.mubr.msk.bf16.vlgmr.msra.gmra.mrb[40].mxu1 %vm2884_vm3, %v10723_v42 }
 0xb8f   : > { %8358 = vmatpush3.bf16.msra.mxu1 %v9072_v46  ;;  %8365 = vmatprep.mubr.msk.bf16.mxu1 %vm9736_vm0, %v9735_v36 }
 0xb90   : > { %8359 = vmatprep.subr.bf16.mxu1 %v9735_v36 }
 0xb93   : > { %8360 = vmatpush3.bf16.msra.mxu1 %v9073_v47 }
 0xb94   : > { %8361 = vmatprep.subr.bf16.mxu1 %v9735_v36 }
 0xb97   : > { %8362 = vmatpush3.bf16.msra.mxu1 %v9074_v48 }
 0xb98   : > { %8363 = vmatprep.subr.bf16.mxu1 %v9735_v36 }
 0xb9b   : > { %8364 = vmatpush3.bf16.msra.mxu1 %v9075_v49 }
 0xb9c   : > { %8387 = vmatprep.subr.bf16.mxu1 %v9735_v36 }
 0xb9e   : > { %8366 = vmatmul.mubr.msk.bf16.vlgmr.msra.gmra.mrb[44].mxu1 %vm2884_vm3, %v10723_v42 }
 0xb9f   : > { %8389 = vmatprep.mubr.msk.bf16.mxu1 %vm9736_vm0, %v9735_v36 }
 0xc51   : > { %v2973_v50 = vpop.f32.mrb[36].mxu1 }
 0xc52   : > { %v8331_v51 = vpop.f32.mrb[37].mxu1  ;;  %v2981_v57 = vpack.c.bf16 %v2973_v50, %v2973_v50 }
 0xc53   : > { %v2976_v52 = vpop.f32.mrb[38].mxu1 }
 0xc54   : > { %v8332_v53 = vpop.f32.mrb[39].mxu1  ;;  %v3122_v61 = vsel %vm3068_vm5, %v2981_v57, 0 }
 0xc55   : > { %v9088_v53 = vld [vmem:[%s11620_s16 + $0x20] sm:$0xff]  }
 0xc61   : > { %v3049_v54 = vpop.f32.mrb[40].mxu1 }
 0xc62   : > { %v3058_v35 = vpack.c.bf16 %v3049_v54, %v3049_v54  ;;  %v8343_v55 = vpop.f32.mrb[41].mxu1  ;;  %v9089_v54 = vld [vmem:[#allocation9 + $0xa0] sm:$0xff]  }
 0xc63   : > { %v3052_v56 = vpop.f32.mrb[42].mxu1  ;;  %v9091_v55 = vld [vmem:[#allocation9 + $0xb0] sm:$0xff]  }
 0xc64   : > { %v3070_v58 = vsel %vm3068_vm5, %v3058_v35, 0  ;;  %v8344_v59 = vpop.f32.mrb[43].mxu1  ;;  %v9090_v35 = vld [vmem:[#allocation9 + $0xa8] sm:$0xff]   ;;  %v9092_v56 = vld [vmem:[#allocation9 + $0xb8] sm:$0xff]  }
 0xc65   : > { %8346 = vmatpush3.bf16.msra.mxu0 %v3070_v58 }
 0xc66   : > { %8351 = vmatprep.subr.bf16.mxu0 %v9735_v36 }
 0xc68   : > { %8348 = vmatmul.mubr.msk.bf16.vlgmr.msra.gmra.mrb[36].mxu0 %vm3064_vm6, %v9076_v60 }
 0xc69   : > { %8352 = vmatpush3.bf16.msra.mxu0 %v3122_v61  ;;  %8353 = vmatprep.mubr.msk.bf16.mxu0 %vm9736_vm0, %v9735_v36 }
 0xc6a   : > { %8369 = vmatprep.subr.bf16.mxu0 %v9735_v36 }
 0xc70   : > { %8354 = vmatmul.mubr.msk.bf16.vlgmr.msra.gmra.mrb[40].mxu0 %vm3064_vm6, %v9077_v62 }
 0xc71   : > { %v3232_v63 = vpop.f32.mrb[44].mxu1  ;;  %8371 = vmatprep.mubr.msk.bf16.mxu0 %vm9736_vm0, %v9735_v36 }
 0xc72   : > { %v3241_v1 = vpack.c.bf16 %v3232_v63, %v3232_v63  ;;  %v8367_v2 = vpop.f32.mrb[45].mxu1 }
 0xc73   : > { %v3235_v3 = vpop.f32.mrb[46].mxu1 }
 0xc74   : > { %v3251_v4 = vsel %vm3068_vm5, %v3241_v1, 0  ;;  %v8368_v5 = vpop.f32.mrb[47].mxu1 }
 0xc75   : > { %8370 = vmatpush3.bf16.msra.mxu0 %v3251_v4 }
 0xc76   : > { %8375 = vmatprep.subr.bf16.mxu0 %v9735_v36 }
 0xc78   : > { %8372 = vmatmul.mubr.msk.bf16.vlgmr.msra.gmra.mrb[44].mxu0 %vm3064_vm6, %v9078_v6  ;;  %v9093_v6 = vld [vmem:[%s11620_s16 + $0x28] sm:$0xff]  }
 0xc79   : > { %8376 = vmatpush3.bf16.msra.mxu0 %v9079_v7  ;;  %8383 = vmatprep.mubr.msk.bf16.mxu0 %vm9736_vm0, %v9735_v36  ;;  %v9094_v7 = vld [vmem:[#allocation9 + $0xc0] sm:$0xff]  }
 0xc7a   : > { %8377 = vmatprep.subr.bf16.mxu0 %v9735_v36 }
 0xc7d   : > { %8378 = vmatpush3.bf16.msra.mxu0 %v9080_v8  ;;  %v9095_v8 = vld [vmem:[#allocation9 + $0xc8] sm:$0xff]  }
 0xc7e   : > { %8379 = vmatprep.subr.bf16.mxu0 %v9735_v36 }
 0xc81   : > { %8380 = vmatpush3.bf16.msra.mxu0 %v9081_v9  ;;  %v9096_v9 = vld [vmem:[#allocation9 + $0xd0] sm:$0xff]  }
 0xc82   : > { %8381 = vmatprep.subr.bf16.mxu0 %v9735_v36 }
 0xc85   : > { %8382 = vmatpush3.bf16.msra.mxu0 %v9082_v34  ;;  %v9097_v34 = vld [vmem:[#allocation9 + $0xd8] sm:$0xff]  }
 0xc86   : > { %8405 = vmatprep.subr.bf16.mxu0 %v9735_v36 }
 0xc88   : > { %8384 = vmatmul.mubr.msk.bf16.vlgmr.msra.gmra.mrb[48].mxu0 %vm2884_vm3, %v10723_v42 }
 0xc89   : > { %8407 = vmatprep.mubr.msk.bf16.mxu0 %vm9736_vm0, %v9735_v36 }
 0xd3b   : > { %v3106_v10 = vpop.f32.mrb[36].mxu0 }
 0xd3c   : > { %v8349_v11 = vpop.f32.mrb[37].mxu0 }
 0xd3d   : > { %v3109_v12 = vpop.f32.mrb[38].mxu0 }
 0xd3e   : > { %v8350_v13 = vpop.f32.mrb[39].mxu0 }
 0xd43   : > { %v3158_v14 = vpop.f32.mrb[40].mxu0 }
 0xd44   : > { %v3159_v15 = vadd.f32 %v3158_v14, %v3106_v10  ;;  %v8355_v16 = vpop.f32.mrb[41].mxu0 }
 0xd45   : > { %v3161_v17 = vpop.f32.mrb[42].mxu0 }
 0xd46   : > { %v3162_v18 = vadd.f32 %v3161_v17, %v3109_v12  ;;  %v8356_v19 = vpop.f32.mrb[43].mxu0 }
 0xd4b   : > { %v3287_v20 = vpop.f32.mrb[44].mxu0 }
 0xd4c   : > { %v3294_v21 = vadd.f32 %v3287_v20, %v3159_v15  ;;  %v8373_v22 = vpop.f32.mrb[45].mxu0 }
 0xd4d   : > { %v3290_v23 = vpop.f32.mrb[46].mxu0  ;;  %v9098_v22 = vld [vmem:[%s11620_s16 + $0x30] sm:$0xff]  }
 0xd4e   : > { %v3295_v24 = vadd.f32 %v3290_v23, %v3162_v18  ;;  %v8374_v25 = vpop.f32.mrb[47].mxu0  ;;  %v9099_v23 = vld [vmem:[#allocation9 + $0xe0] sm:$0xff]  }
 0xd4f   : > { %v9101_v25 = vld [vmem:[#allocation9 + $0xf0] sm:$0xff]  }
 0xd5b   : > { %v3363_v26 = vpop.f32.mrb[48].mxu0 }
 0xd5c   : > { %v3372_v27 = vpack.c.bf16 %v3363_v26, %v3363_v26  ;;  %v8385_v28 = vpop.f32.mrb[49].mxu0  ;;  %v9102_v26 = vld [vmem:[#allocation9 + $0xf8] sm:$0xff]  }
 0xd5d   : > { %v3366_v29 = vpop.f32.mrb[50].mxu0 }
 0xd5e   : > { %v3382_v30 = vsel %vm3068_vm5, %v3372_v27, 0  ;;  %v8386_v31 = vpop.f32.mrb[51].mxu0 }
 0xd5f   : > { %8388 = vmatpush3.bf16.msra.mxu1 %v3382_v30 }
 0xd60   : > { %8393 = vmatprep.subr.bf16.mxu1 %v9735_v36 }
 0xd62   : > { %8390 = vmatmul.mubr.msk.bf16.vlgmr.msra.gmra.mrb[48].mxu1 %vm3064_vm6, %v9083_v32 }
 0xd63   : > { %8394 = vmatpush3.bf16.msra.mxu1 %v9084_v33  ;;  %8401 = vmatprep.mubr.msk.bf16.mxu1 %vm9736_vm0, %v9735_v36 }
 0xd64   : > { %8395 = vmatprep.subr.bf16.mxu1 %v9735_v36 }
 0xd67   : > { %8396 = vmatpush3.bf16.msra.mxu1 %v9085_v37 }
 0xd68   : > { %8397 = vmatprep.subr.bf16.mxu1 %v9735_v36 }
 0xd6b   : > { %8398 = vmatpush3.bf16.msra.mxu1 %v9086_v38 }
 0xd6c   : > { %8399 = vmatprep.subr.bf16.mxu1 %v9735_v36 }
 0xd6f   : > { %8400 = vmatpush3.bf16.msra.mxu1 %v9087_v39 }
 0xd70   : > { %8423 = vmatprep.subr.bf16.mxu1 %v9735_v36 }
 0xd72   : > { %8402 = vmatmul.mubr.msk.bf16.vlgmr.msra.gmra.mrb[52].mxu1 %vm2884_vm3, %v10723_v42 }
 0xd73   : > { %8425 = vmatprep.mubr.msk.bf16.mxu1 %vm9736_vm0, %v9735_v36 }
 0xe35   : > { %v3418_v40 = vpop.f32.mrb[48].mxu1 }
 0xe36   : > { %v3425_v41 = vadd.f32 %v3418_v40, %v3294_v21  ;;  %v8391_v43 = vpop.f32.mrb[49].mxu1 }
 0xe37   : > { %v3421_v44 = vpop.f32.mrb[50].mxu1  ;;  %v9103_v43 = vld [vmem:[%s11620_s16 + $0x38] sm:$0xff]  }
 0xe38   : > { %v3426_v45 = vadd.f32 %v3421_v44, %v3295_v24  ;;  %v8392_v46 = vpop.f32.mrb[51].mxu1  ;;  %v9100_v24 = vld [vmem:[#allocation9 + $0xe8] sm:$0xff]   ;;  %v9104_v44 = vld [vmem:[#allocation9 + $0x100] sm:$0xff]  }
 0xe39   : > { %v9106_v46 = vld [vmem:[#allocation9 + $0x110] sm:$0xff]  }
 0xe45   : > { %v3494_v47 = vpop.f32.mrb[52].mxu1 }
 0xe46   : > { %v3503_v48 = vpack.c.bf16 %v3494_v47, %v3494_v47  ;;  %v8403_v49 = vpop.f32.mrb[53].mxu1  ;;  %v9107_v47 = vld [vmem:[#allocation9 + $0x118] sm:$0xff]  }
 0xe47   : > { %v3497_v50 = vpop.f32.mrb[54].mxu1  ;;  %v4082_v49 = vld [vmem:[#allocation10] sm:$0xff] }
 0xe48   : > { %v3513_v51 = vsel %vm3068_vm5, %v3503_v48, 0  ;;  %v8404_v52 = vpop.f32.mrb[55].mxu1  ;;  %v4083_v48 = vld [vmem:[#allocation10 + $0x8] sm:$0xff] }
 0xe49   : > { %8406 = vmatpush3.bf16.msra.mxu0 %v3513_v51  ;;  %4091 = vperm.xlu1 %8848, %v4083_v48  }
 0xe4a   : > { %8411 = vmatprep.subr.bf16.mxu0 %v9735_v36 }
 0xe4c   : > { %8408 = vmatmul.mubr.msk.bf16.vlgmr.msra.gmra.mrb[52].mxu0 %vm3064_vm6, %v9088_v53 }
 0xe4d   : > { %8412 = vmatpush3.bf16.msra.mxu0 %v9089_v54  ;;  %8419 = vmatprep.mubr.msk.bf16.mxu0 %vm9736_vm0, %v9735_v36 }
 0xe4e   : > { %8413 = vmatprep.subr.bf16.mxu0 %v9735_v36  ;;  %4086 = vperm.xlu1 %8848, %v4082_v49  }
 0xe51   : > { %8414 = vmatpush3.bf16.msra.mxu0 %v9090_v35 }
 0xe52   : > { %8415 = vmatprep.subr.bf16.mxu0 %v9735_v36 }
 0xe55   : > { %8416 = vmatpush3.bf16.msra.mxu0 %v9091_v55 }
 0xe56   : > { %8417 = vmatprep.subr.bf16.mxu0 %v9735_v36 }
 0xe59   : > { %8418 = vmatpush3.bf16.msra.mxu0 %v9092_v56 }
 0xe5a   : > { %8441 = vmatprep.subr.bf16.mxu0 %v9735_v36 }
 0xe5c   : > { %8420 = vmatmul.mubr.msk.bf16.vlgmr.msra.gmra.mrb[56].mxu0 %vm2884_vm3, %v10723_v42 }
 0xe5d   : > { %8443 = vmatprep.mubr.msk.bf16.mxu0 %vm9736_vm0, %v9735_v36 }
 0xf1f   : > { %v3549_v57 = vpop.f32.mrb[52].mxu0 }
 0xf20   : > { %v3556_v58 = vadd.f32 %v3549_v57, %v3425_v41  ;;  %v8409_v59 = vpop.f32.mrb[53].mxu0 }
 0xf21   : > { %v3552_v60 = vpop.f32.mrb[54].mxu0 }
 0xf22   : > { %v3557_v61 = vadd.f32 %v3552_v60, %v3426_v45  ;;  %v8410_v62 = vpop.f32.mrb[55].mxu0  ;;  %v9105_v45 = vld [vmem:[#allocation9 + $0x108] sm:$0xff]  }
 0xf2f   : > { %v3625_v63 = vpop.f32.mrb[56].mxu0 }
 0xf30   : > { %v3634_v1 = vpack.c.bf16 %v3625_v63, %v3625_v63  ;;  %v8421_v2 = vpop.f32.mrb[57].mxu0 }
 0xf31   : > { %v3628_v3 = vpop.f32.mrb[58].mxu0 }
 0xf32   : > { %v3644_v4 = vsel %vm3068_vm5, %v3634_v1, 0  ;;  %v8422_v5 = vpop.f32.mrb[59].mxu0 }
 0xf33   : > { %8424 = vmatpush3.bf16.msra.mxu1 %v3644_v4 }
 0xf34   : > { %8429 = vmatprep.subr.bf16.mxu1 %v9735_v36 }
 0xf36   : > { %8426 = vmatmul.mubr.msk.bf16.vlgmr.msra.gmra.mrb[56].mxu1 %vm3064_vm6, %v9093_v6 }
 0xf37   : > { %8430 = vmatpush3.bf16.msra.mxu1 %v9094_v7  ;;  %8437 = vmatprep.mubr.msk.bf16.mxu1 %vm9736_vm0, %v9735_v36 }
 0xf38   : > { %8431 = vmatprep.subr.bf16.mxu1 %v9735_v36 }
 0xf3b   : > { %8432 = vmatpush3.bf16.msra.mxu1 %v9095_v8 }
 0xf3c   : > { %8433 = vmatprep.subr.bf16.mxu1 %v9735_v36 }
 0xf3f   : > { %8434 = vmatpush3.bf16.msra.mxu1 %v9096_v9 }
 0xf40   : > { %8435 = vmatprep.subr.bf16.mxu1 %v9735_v36 }
 0xf43   : > { %8436 = vmatpush3.bf16.msra.mxu1 %v9097_v34 }
 0xf44   : > { %8459 = vmatprep.subr.bf16.mxu1 %v9735_v36 }
 0xf46   : > { %8438 = vmatmul.mubr.msk.bf16.vlgmr.msra.gmra.mrb[60].mxu1 %vm2884_vm3, %v10723_v42 }
 0xf47   : > { %8461 = vmatprep.mubr.msk.bf16.mxu1 %vm9736_vm0, %v9735_v36 }
0x1009   : > { %v3680_v10 = vpop.f32.mrb[56].mxu1 }
0x100a   : > { %v3687_v11 = vadd.f32 %v3680_v10, %v3556_v58  ;;  %v8427_v12 = vpop.f32.mrb[57].mxu1 }
0x100b   : > { %v3683_v13 = vpop.f32.mrb[58].mxu1 }
0x100c   : > { %v3688_v14 = vadd.f32 %v3683_v13, %v3557_v61  ;;  %v8428_v15 = vpop.f32.mrb[59].mxu1  ;;  %v4092_v61 = vpop.permute.xlu1 %4091 }
0x1010   : > { %v4087_v63 = vpop.permute.xlu1 %4086 }
0x1019   : > { %v3756_v16 = vpop.f32.mrb[60].mxu1 }
0x101a   : > { %v3765_v17 = vpack.c.bf16 %v3756_v16, %v3756_v16  ;;  %v8439_v18 = vpop.f32.mrb[61].mxu1 }
0x101b   : > { %v3759_v19 = vpop.f32.mrb[62].mxu1 }
0x101c   : > { %v3775_v20 = vsel %vm3068_vm5, %v3765_v17, 0  ;;  %v8440_v21 = vpop.f32.mrb[63].mxu1  ;;  %v4225_v19 = vld [vmem:[#allocation12 + $0x80] sm:$0xff] }
0x101d   : > { %8442 = vmatpush3.bf16.msra.mxu0 %v3775_v20  ;;  %v4226_v20 = vld [vmem:[#allocation12 + $0x88] sm:$0xff]  ;;  %v4328_v21 = vld [vmem:[#allocation13 + $0x80] sm:$0xff] }
0x101e   : > { %8447 = vmatprep.subr.bf16.mxu0 %v9735_v36 }
0x1020   : > { %8444 = vmatmul.mubr.msk.bf16.vlgmr.msra.gmra.mrb[60].mxu0 %vm3064_vm6, %v9098_v22  ;;  %v8591_v22 = vpack.c.bf16 %v4226_v20, %v4225_v19  ;;  %v4234_v19 = vld [vmem:[#allocation12 + $0xc8] sm:$0xff]  ;;  %v4336_v20 = vld [vmem:[#allocation13 + $0xc0] sm:$0xff] }
0x1021   : > { %8448 = vmatpush3.bf16.msra.mxu0 %v9099_v23  ;;  %8455 = vmatprep.mubr.msk.bf16.mxu0 %vm9736_vm0, %v9735_v36  ;;  %v4329_v23 = vld [vmem:[#allocation13 + $0x88] sm:$0xff] }
0x1022   : > { %8449 = vmatprep.subr.bf16.mxu0 %v9735_v36 }
0x1025   : > { %8450 = vmatpush3.bf16.msra.mxu0 %v9100_v24  ;;  %v4209_v24 = vld [vmem:[#allocation12] sm:$0xff] }
0x1026   : > { %8451 = vmatprep.subr.bf16.mxu0 %v9735_v36 }
0x1029   : > { %8452 = vmatpush3.bf16.msra.mxu0 %v9101_v25  ;;  %v4210_v25 = vld [vmem:[#allocation12 + $0x8] sm:$0xff] }
0x102a   : > { %8453 = vmatprep.subr.bf16.mxu0 %v9735_v36 }
0x102d   : > { %8454 = vmatpush3.bf16.msra.mxu0 %v9102_v26  ;;  %v8623_v26 = vpack.c.bf16 %v4329_v23, %v4328_v21  ;;  %v4337_v21 = vld [vmem:[#allocation13 + $0xc8] sm:$0xff] }
0x102e   : > { %8477 = vmatprep.subr.bf16.mxu0 %v9735_v36  ;;  %v4218_v23 = vld [vmem:[#allocation12 + $0x48] sm:$0xff] }
0x1030   : > { %8456 = vmatmul.mubr.msk.bf16.vlgmr.msra.gmra.mrb[64].mxu0 %vm2884_vm3, %v10723_v42 }
0x1031   : > { %8479 = vmatprep.mubr.msk.bf16.mxu0 %vm9736_vm0, %v9735_v36 }
0x10f3   : > { %v3811_v27 = vpop.f32.mrb[60].mxu0 }
0x10f4   : > { %v3818_v28 = vadd.f32 %v3811_v27, %v3687_v11  ;;  %v8445_v29 = vpop.f32.mrb[61].mxu0  ;;  %v8593_v27 = vpack.c.bf16 %v4210_v25, %v4209_v24  ;;  %v4320_v24 = vld [vmem:[#allocation13 + $0x40] sm:$0xff]  ;;  %v4321_v25 = vld [vmem:[#allocation13 + $0x48] sm:$0xff] }
0x10f5   : > { %v3814_v30 = vpop.f32.mrb[62].mxu0  ;;  %v4313_v29 = vld [vmem:[#allocation13 + $0x8] sm:$0xff] }
0x10f6   : > { %v3819_v31 = vadd.f32 %v3814_v30, %v3688_v14  ;;  %v8446_v32 = vpop.f32.mrb[63].mxu0  ;;  %v4227_v30 = vld [vmem:[#allocation12 + $0x90] sm:$0xff] }
0x10f7   : > { %v4228_v32 = vld [vmem:[#allocation12 + $0x98] sm:$0xff] }
0x1103   : > { %v3887_v33 = vpop.f32.mrb[64].mxu0 }
0x1104   : > { %v3896_v37 = vpack.c.bf16 %v3887_v33, %v3887_v33  ;;  %v8457_v38 = vpop.f32.mrb[65].mxu0  ;;  %v4330_v33 = vld [vmem:[#allocation13 + $0x90] sm:$0xff] }
0x1105   : > { %v3890_v39 = vpop.f32.mrb[66].mxu0  ;;  %v8595_v38 = vpack.c.bf16 %v4228_v32, %v4227_v30  ;;  %v4236_v32 = vld [vmem:[#allocation12 + $0xd8] sm:$0xff] }
0x1106   : > { %v3906_v40 = vsel %vm3068_vm5, %v3896_v37, 0  ;;  %v8458_v41 = vpop.f32.mrb[67].mxu0  ;;  %v4331_v37 = vld [vmem:[#allocation13 + $0x98] sm:$0xff] }
0x1107   : > { %8460 = vmatpush3.bf16.msra.mxu1 %v3906_v40  ;;  %v8627_v39 = vpack.c.bf16 %v4331_v37, %v4330_v33  ;;  %v4211_v40 = vld [vmem:[#allocation12 + $0x10] sm:$0xff]  ;;  %v4212_v41 = vld [vmem:[#allocation12 + $0x18] sm:$0xff] }
0x1108   : > { %8465 = vmatprep.subr.bf16.mxu1 %v9735_v36  ;;  %v4338_v33 = vld [vmem:[#allocation13 + $0xd0] sm:$0xff] }
0x110a   : > { %8462 = vmatmul.mubr.msk.bf16.vlgmr.msra.gmra.mrb[64].mxu1 %vm3064_vm6, %v9103_v43  ;;  %v4314_v43 = vld [vmem:[#allocation13 + $0x10] sm:$0xff] }
0x110b   : > { %8466 = vmatpush3.bf16.msra.mxu1 %v9104_v44  ;;  %8473 = vmatprep.mubr.msk.bf16.mxu1 %vm9736_vm0, %v9735_v36  ;;  %v8597_v44 = vpack.c.bf16 %v4212_v41, %v4211_v40 }
0x110c   : > { %8467 = vmatprep.subr.bf16.mxu1 %v9735_v36 }
0x110f   : > { %8468 = vmatpush3.bf16.msra.mxu1 %v9105_v45  ;;  %v4315_v45 = vld [vmem:[#allocation13 + $0x18] sm:$0xff] }
0x1110   : > { %8469 = vmatprep.subr.bf16.mxu1 %v9735_v36  ;;  %v8629_v48 = vpack.c.bf16 %v4315_v45, %v4314_v43  ;;  %v4219_v45 = vld [vmem:[#allocation12 + $0x50] sm:$0xff] }
0x1113   : > { %8470 = vmatpush3.bf16.msra.mxu1 %v9106_v46  ;;  %v4229_v46 = vld [vmem:[#allocation12 + $0xa0] sm:$0xff] }
0x1114   : > { %8471 = vmatprep.subr.bf16.mxu1 %v9735_v36 }
0x1117   : > { %8472 = vmatpush3.bf16.msra.mxu1 %v9107_v47  ;;  %v4230_v47 = vld [vmem:[#allocation12 + $0xa8] sm:$0xff] }
0x1118   : > { %8624 = vmatprep.subr.bf16.mxu1 %v8623_v26  ;;  %v8599_v49 = vpack.c.bf16 %v4230_v47, %v4229_v46  ;;  %v4220_v46 = vld [vmem:[#allocation12 + $0x58] sm:$0xff] }
0x111a   : > { %8474 = vmatmul.mubr.msk.bf16.vlgmr.msra.gmra.mrb[68].mxu1 %vm2884_vm3, %v10723_v42  ;;  %v9108_v42 = vld [vmem:[%s11620_s16 + $0x40] sm:$0xff]  }
0x11dd   : > { %v3942_v50 = vpop.f32.mrb[64].mxu1 }
0x11de   : > { %v3949_v51 = vadd.f32 %v3942_v50, %v3818_v28  ;;  %v8463_v52 = vpop.f32.mrb[65].mxu1  ;;  %v4312_v28 = vld [vmem:[#allocation13] sm:$0xff] }
0x11df   : > { %v3945_v53 = vpop.f32.mrb[66].mxu1  ;;  %v4332_v50 = vld [vmem:[#allocation13 + $0xa0] sm:$0xff] }
0x11e0   : > { %v3950_v54 = vadd.f32 %v3945_v53, %v3819_v31  ;;  %v8464_v35 = vpop.f32.mrb[67].mxu1  ;;  %v8625_v31 = vpack.c.bf16 %v4313_v29, %v4312_v28  ;;  %v4213_v52 = vld [vmem:[#allocation12 + $0x20] sm:$0xff]  ;;  %v8639_v29 = vpack.c.bf16 %v4337_v21, %v4336_v20 }
0x11e1   : > { %v4316_v35 = vld [vmem:[#allocation13 + $0x20] sm:$0xff] }
0x11e2   : > { %8626 = vmatpush3.bf16.msra.mxu1 %v8625_v31  ;;  %v4235_v31 = vld [vmem:[#allocation12 + $0xd0] sm:$0xff] }
0x11e3   : > { %8628 = vmatprep.subr.bf16.mxu1 %v8627_v39  ;;  %v4339_v39 = vld [vmem:[#allocation13 + $0xd8] sm:$0xff] }
0x11e4   : > { %v8643_v47 = vpack.c.bf16 %v4339_v39, %v4338_v33 }
0x11e6   : > { %8630 = vmatpush3.bf16.msra.mxu1 %v8629_v48  ;;  %v4322_v48 = vld [vmem:[#allocation13 + $0x50] sm:$0xff] }
0x11ed   : > { %v4018_v55 = vpop.f32.mrb[68].mxu1 }
0x11ee   : > { %v4027_v56 = vpack.c.bf16 %v4018_v55, %v4018_v55  ;;  %v8475_v57 = vpop.f32.mrb[69].mxu1  ;;  %v4317_v55 = vld [vmem:[#allocation13 + $0x28] sm:$0xff] }
0x11ef   : > { %v4021_v58 = vpop.f32.mrb[70].mxu1  ;;  %v8633_v57 = vpack.c.bf16 %v4317_v55, %v4316_v35  ;;  %v4238_v35 = vld [vmem:[#allocation12 + $0xe8] sm:$0xff]  ;;  %v4340_v55 = vld [vmem:[#allocation13 + $0xe0] sm:$0xff] }
0x11f0   : > { %v4037_v59 = vsel %vm3068_vm5, %v4027_v56, 0  ;;  %v8476_v60 = vpop.f32.mrb[71].mxu1 }
0x11f1   : > { %8478 = vmatpush3.bf16.msra.mxu0 %v4037_v59 }
0x11f2   : > { %8592 = vmatprep.subr.bf16.mxu0 %v8591_v22  ;;  %v4217_v22 = vld [vmem:[#allocation12 + $0x40] sm:$0xff] }
0x11f3   : > { %v8609_v30 = vpack.c.bf16 %v4218_v23, %v4217_v22 }
0x11f4   : > { %8480 = vmatmul.mubr.msk.bf16.vlgmr.msra.gmra.mrb[68].mxu0 %vm3064_vm6, %v9108_v42 }
0x11f5   : > { %8594 = vmatpush3.bf16.msra.mxu0 %v8593_v27 }
0x11f6   : > { %8596 = vmatprep.subr.bf16.mxu0 %v8595_v38  ;;  %v8641_v38 = vpack.c.bf16 %v4321_v25, %v4320_v24 }
0x11f9   : > { %8598 = vmatpush3.bf16.msra.mxu0 %v8597_v44 }
0x11fa   : > { %8600 = vmatprep.subr.bf16.mxu0 %v8599_v49  ;;  %v4323_v49 = vld [vmem:[#allocation13 + $0x58] sm:$0xff] }
0x12c7   : > { %v4073_v62 = vpop.f32.mrb[68].mxu0 }
0x12c8   : > { %v4080_v1 = vadd.f32 %v4073_v62, %v3949_v51  ;;  %v8481_v2 = vpop.f32.mrb[69].mxu0  ;;  %v4333_v51 = vld [vmem:[#allocation13 + $0xa8] sm:$0xff] }
0x12c9   : > { %v4076_v3 = vpop.f32.mrb[70].mxu0  ;;  %v8631_v53 = vpack.c.bf16 %v4333_v51, %v4332_v50  ;;  %v4231_v2 = vld [vmem:[#allocation12 + $0xb0] sm:$0xff] }
0x12ca   : > { %v4094_v4 = vadd.f32 %v4087_v63, %v4080_v1  ;;  %v4081_v5 = vadd.f32 %v4076_v3, %v3950_v54  ;;  %v8482_v6 = vpop.f32.mrb[71].mxu0  ;;  %v4214_v54 = vld [vmem:[#allocation12 + $0x28] sm:$0xff]  ;;  %v4127_v1 = vstv %s10871_s24  ;;  %v4232_v3 = vld [vmem:[#allocation12 + $0xb8] sm:$0xff]  ;;  %s883_s24 = scalar_lea.vmem [#allocation23], %s10939_s29 }
0x12cb   : > { %v8601_v56 = vpack.c.bf16 %v4214_v54, %v4213_v52  ;;  %8632 = vmatprep.subr.bf16.mxu1 %v8631_v53  ;;  %v8603_v6 = vpack.c.bf16 %v4232_v3, %v4231_v2  ;;  %v4237_v54 = vld [vmem:[#allocation12 + $0xe0] sm:$0xff]  ;;  %v4325_v2 = vld [vmem:[#allocation13 + $0x68] sm:$0xff] }
0x12cc   : > { %v4098_v7 = vsel %vm4097_vm7, %v4094_v4, 0.0  ;;  %v4095_v8 = vadd.f32 %v4092_v61, %v4081_v5  ;;  %8634 = vmatpush3.bf16.msra.mxu1 %v8633_v57  ;;  %v8613_v57 = vpack.c.bf16 %v4220_v46, %v4219_v45 }
0x12cd   : > { %4099 = vadd.xlane.f32.xlu0 %v4098_v7  ;;  %8602 = vmatpush3.bf16.msra.mxu0 %v8601_v56  ;;  %v4335_v7 = vld [vmem:[#allocation13 + $0xb8] sm:$0xff] }
0x12ce   : > { %v4101_v9 = vsel %vm4097_vm7, %v4095_v8, 0.0  ;;  %8604 = vmatprep.subr.bf16.mxu0 %v8603_v6 }
0x12cf   : > { %4102 = vadd.xlane.f32.xlu1 %v4101_v9  ;;  %v4216_v9 = vld [vmem:[#allocation12 + $0x38] sm:$0xff] }
0x135a   : > { %v4100_v34 = vpop.xlane.xlu0 %4099 }
0x135b   : > { %v4105_v10 = vmul.f32 0.0625, %v4100_v34 }
0x135c   : > { %v4103_v11 = vpop.xlane.xlu1 %4102 }
0x135d   : > { %v4106_v12 = vmul.f32 0.0625, %v4103_v11  ;;  %v10861_v13 = vsub.f32 %v4094_v4, %v4105_v10  ;;  %v4334_v4 = vld [vmem:[#allocation13 + $0xb0] sm:$0xff] }
0x135e   : > { %v8635_v34 = vpack.c.bf16 %v4335_v7, %v4334_v4  ;;  %v4318_v11 = vld [vmem:[#allocation13 + $0x30] sm:$0xff] }
0x135f   : > { %v10863_v14 = vsub.f32 %v4095_v8, %v4106_v12  ;;  %v4109_v17 = vmul.f32 %v10861_v13, %v10861_v13  ;;  %v4215_v8 = vld [vmem:[#allocation12 + $0x30] sm:$0xff]  ;;  %v4319_v12 = vld [vmem:[#allocation13 + $0x38] sm:$0xff] }
0x1360   : > { %v8605_v10 = vpack.c.bf16 %v4216_v9, %v4215_v8  ;;  %8636 = vmatprep.subr.bf16.mxu1 %v8635_v34  ;;  %v4239_v8 = vld [vmem:[#allocation12 + $0xf0] sm:$0xff]  ;;  %v4240_v9 = vld [vmem:[#allocation12 + $0xf8] sm:$0xff] }
0x1361   : > { %v4110_v15 = vmul.f32 %v10863_v14, %v10863_v14  ;;  %v4111_v18 = vsel %vm4097_vm7, %v4109_v17, 0.0  ;;  %v4342_v34 = vld [vmem:[#allocation13 + $0xf0] sm:$0xff] }
0x1362   : > { %8606 = vmatpush3.bf16.msra.mxu0 %v8605_v10  ;;  %v8619_v10 = vpack.c.bf16 %v4240_v9, %v4239_v8 }
0x1363   : > { %v4114_v16 = vsel %vm4097_vm7, %v4110_v15, 0.0 }
0x1364   : > { %4115 = vadd.xlane.f32.xlu0 %v4114_v16  ;;  %v8637_v16 = vpack.c.bf16 %v4319_v12, %v4318_v11  ;;  %v4343_v11 = vld [vmem:[#allocation13 + $0xf8] sm:$0xff]  ;;  %v4223_v12 = vld [vmem:[#allocation12 + $0x70] sm:$0xff] }
0x1366   : > { %8638 = vmatpush3.bf16.msra.mxu1 %v8637_v16 }
0x1367   : > { %8640 = vmatprep.subr.bf16.mxu1 %v8639_v29 }
0x1368   : > { %4112 = vadd.xlane.f32.xlu0 %v4111_v18  ;;  %v4233_v18 = vld [vmem:[#allocation12 + $0xc0] sm:$0xff] }
0x1369   : > { %v8607_v28 = vpack.c.bf16 %v4234_v19, %v4233_v18  ;;  %v4326_v18 = vld [vmem:[#allocation13 + $0x70] sm:$0xff]  ;;  %v4327_v19 = vld [vmem:[#allocation13 + $0x78] sm:$0xff] }
0x136a   : > { %8642 = vmatpush3.bf16.msra.mxu1 %v8641_v38  ;;  %v8653_v22 = vpack.c.bf16 %v4327_v19, %v4326_v18  ;;  %v4344_v18 = vld [vmem:[#allocation15] sm:$0x1] }
0x136b   : > { %8608 = vmatprep.subr.bf16.mxu0 %v8607_v28  ;;  %8644 = vmatprep.subr.bf16.mxu1 %v8643_v47 }
0x136c   : > { %8610 = vmatpush3.bf16.msra.mxu0 %v8609_v30 }
0x13f1   : > { %v4116_v58 = vpop.xlane.xlu0 %4115 }
0x13f2   : > { %v4118_v59 = vmul.f32 0.0625, %v4116_v58  ;;  %v4341_v58 = vld [vmem:[#allocation13 + $0xe8] sm:$0xff] }
0x13f4   : > { %v4120_v60 = vadd.f32 1e-05, %v4118_v59  ;;  %v4221_v59 = vld [vmem:[#allocation12 + $0x60] sm:$0xff] }
0x13f5   : > { %v4113_v42 = vpop.xlane.xlu0 %4112 }
0x13f6   : > { %9228 = vrsqrt.f32 %v4120_v60  ;;  %v4117_v61 = vmul.f32 0.0625, %v4113_v42  ;;  %v4222_v60 = vld [vmem:[#allocation12 + $0x68] sm:$0xff] }
0x13f7   : > { %v8617_v3 = vpack.c.bf16 %v4222_v60, %v4221_v59 }
0x13f8   : > { %v4119_v62 = vadd.f32 1e-05, %v4117_v61  ;;  %v8645_v61 = vpack.c.bf16 %v4323_v49, %v4322_v48 }
0x13fa   : > { %9230 = vrsqrt.f32 %v4119_v62  ;;  %v8615_v62 = vpack.c.bf16 %v4238_v35, %v4237_v54  ;;  %8646 = vmatpush3.bf16.msra.mxu1 %v8645_v61 }
0x1400   : > { %v9229_v63 = vpop.eup %9228 }
0x1401   : > { %v4124_v5 = vmul.f32 %v9229_v63, %v10863_v14  ;;  %v8647_v63 = vpack.c.bf16 %v4341_v58, %v4340_v55 }
0x1403   : > { %v4129_v15 = vmul.f32 %v4127_v1, %v4124_v5  ;;  %vm4126_vm8 = vcmp.ge.f32.partialorder %v4124_v5, 0.0  ;;  %8648 = vmatprep.subr.bf16.mxu1 %v8647_v63 }
0x1404   : > { %v9231_v17 = vpop.eup %9230 }
0x1405   : > { %v4123_v14 = vmul.f32 %v9231_v17, %v10861_v13  ;;  %v10876_v26 = vsel %vm4126_vm8, %v4124_v5, %v4129_v15  ;;  %v8611_v13 = vpack.c.bf16 %v4236_v32, %v4235_v31  ;;  %v4224_v15 = vld [vmem:[#allocation12 + $0x78] sm:$0xff]  ;;  %v8651_v17 = vpack.c.bf16 %v4343_v11, %v4342_v34  ;;  %v4423_v34 = vld [vmem:[%s11514_s12 + $0x20] sm:$0xff] }
0x1406   : > { %v4166_v41 = vrot.slane %v10876_v26, 2  ;;  %v4162_v44 = vrot.slane %v10876_v26, 1  ;;  %v4182_v56 = vrot.slane %v10876_v26, 6  ;;  %v4170_v42 = vrot.slane %v10876_v26, 3 }
0x1407   : > { %vm4125_vm9 = vcmp.ge.f32.partialorder %v4123_v14, 0.0  ;;  %v4128_v27 = vmul.f32 %v4127_v1, %v4123_v14  ;;  %8612 = vmatprep.subr.bf16.mxu0 %v8611_v13  ;;  %v4324_v1 = vld [vmem:[#allocation13 + $0x60] sm:$0xff]  ;;  %v4174_v16 = vrot.slane %v10876_v26, 4  ;;  %v8621_v20 = vpack.c.bf16 %v4224_v15, %v4223_v12 }
0x1408   : > { %8614 = vmatpush3.bf16.msra.mxu0 %v8613_v57  ;;  %v8649_v7 = vpack.c.bf16 %v4325_v2, %v4324_v1  ;;  %v4178_v23 = vrot.slane %v10876_v26, 5  ;;  %v4420_v1 = vld [vmem:[%s11514_s12 + $0x8] sm:$0xff]  ;;  %v4422_v2 = vld [vmem:[%s11514_s12 + $0x18] sm:$0xff]  ;;  %vm4579_vm8 = vcmask 1044480  }
0x1409   : > { %v10878_v37 = vsel %vm4125_vm9, %v4123_v14, %v4128_v27  ;;  %8616 = vmatprep.subr.bf16.mxu0 %v8615_v62  ;;  %v4186_v27 = vrot.slane %v10876_v26, 7  ;;  %vm4581_vm9 = vcmask 1045504  }
0x140a   : > { %v4137_v40 = vrot.slane %v10878_v37, 2  ;;  %v4133_v43 = vrot.slane %v10878_v37, 1  ;;  %v4153_v52 = vrot.slane %v10878_v37, 6  ;;  %v4141_v53 = vrot.slane %v10878_v37, 3  ;;  %8650 = vmatpush3.bf16.msra.mxu1 %v8649_v7  ;;  %v4426_v7 = vld [vmem:[%s11514_s12 + $0x38] sm:$0xff] }
0x140b   : > { %v4145_v6 = vrot.slane %v10878_v37, 4  ;;  %v4149_v21 = vrot.slane %v10878_v37, 5  ;;  %8652 = vmatprep.subr.bf16.mxu1 %v8651_v17  ;;  %v4157_v25 = vrot.slane %v10878_v37, 7 }
0x140c   : > { %v8854_v50 = vpack.i.bf16 %v4137_v40, %v4166_v41  ;;  %v8849_v51 = vpack.i.bf16 %v4133_v43, %v4162_v44  ;;  %v8874_v4 = vpack.i.bf16 %v4153_v52, %v4182_v56  ;;  %v8859_v5 = vpack.i.bf16 %v4141_v53, %v4170_v42  ;;  %8618 = vmatpush3.bf16.msra.mxu0 %v8617_v3  ;;  %v4419_v3 = vld [vmem:[%s11514_s12] sm:$0xff] }
0x140d   : > { %v8864_v14 = vpack.i.bf16 %v4145_v6, %v4174_v16  ;;  %8620 = vmatprep.subr.bf16.mxu0 %v8619_v10  ;;  %v8869_v24 = vpack.i.bf16 %v4149_v21, %v4178_v23  ;;  %v8879_v28 = vpack.i.bf16 %v4157_v25, %v4186_v27  ;;  %v4424_v6 = vld [vmem:[%s11514_s12 + $0x28] sm:$0xff]  ;;  %v4425_v10 = vld [vmem:[%s11514_s12 + $0x30] sm:$0xff]  ;;  %v4241_v16 = vld [vmem:[%s11511_s9] sm:$0x1] }
0x140e   : > { %8855 = vrot.lane.b32.xlu1 %v8854_v50, %s9738_s0  ;;  %8850 = vrot.lane.b32.xlu0 %v8849_v51, %s11555_s27  ;;  %v8659_v9 = vpack.c.bf16 %v4426_v7, %v4424_v6  ;;  %v8661_v11 = vpack.c.bf16 %v4425_v10, %v4423_v34  ;;  %s6873_s27 = sshll.u32 %s883_s24, 4  ;;  %s11389_s27 = int_to_ptr.vmem [resolvable:$true] %s6873_s27 }
0x140f   : > { %8654 = vmatpush3.bf16.msra.mxu1 %v8653_v22 }
0x1410   : > { %8622 = vmatpush3.bf16.msra.mxu0 %v8621_v20  ;;  %8483 = vmatprep.subr.bf16.mxu1 %v9735_v36 }
0x1412   : > { %8875 = vrot.lane.b32.xlu1 %v8874_v4, %s9740_s10  ;;  %8860 = vrot.lane.b32.xlu0 %v8859_v5, %s9741_s18  ;;  %v8655_v4 = vpack.c.bf16 %v4422_v2, %v4420_v1  ;;  %v4421_v5 = vld [vmem:[%s11514_s12 + $0x10] sm:$0xff] }
0x1413   : > { %v8657_v8 = vpack.c.bf16 %v4421_v5, %v4419_v3 }
0x1414   : > { %8656 = vmatprep.subr.bf16.mxu0 %v8655_v4 }
0x1416   : > { %8865 = vrot.lane.b32.xlu0 %v8864_v14, %s9742_s7 }
0x141a   : > { %8870 = vrot.lane.b32.xlu0 %v8869_v24, %s9743_s26 }
0x141e   : > { %8880 = vrot.lane.b32.xlu0 %v8879_v28, %s9744_s3  ;;  %v4429_v28 = vlaneseq }
0x1480   : > { %v8851_v29 = vpop.permute.xlu0 %8850  ;;  %v8856_v31 = vpop.permute.xlu1 %8855 }
0x1481   : > { %v8853_v32 = vunpack.i.h.bf16 %v8851_v29  ;;  %v8852_v33 = vunpack.i.l.bf16 %v8851_v29  ;;  %v8858_v38 = vunpack.i.h.bf16 %v8856_v31  ;;  %v8857_v13 = vunpack.i.l.bf16 %v8856_v31  ;;  %v4427_v31 = vld [vmem:[#allocation16] sm:$0x3] }
0x1482   : > { %v4430_v29 = vshrl.u32 %v4429_v28, 7 }
0x1483   : > { %v4190_v40 = vsel %vm4097_vm7, %v10878_v37, %v8853_v32  ;;  %v4202_v41 = vsel %vm4097_vm7, %v10876_v26, %v8852_v33 }
0x1484   : > { %v8861_v30 = vpop.permute.xlu0 %8860  ;;  %v4192_v47 = vsel %vm4191_vm10, %v4190_v40, %v8858_v38  ;;  %v4203_v48 = vsel %vm4191_vm10, %v4202_v41, %v8857_v13  ;;  %v8876_v50 = vpop.permute.xlu1 %8875  ;;  %v4435_v32 = vsub.s32 1, %v4430_v29 }
0x1485   : > { %v8863_v43 = vunpack.i.h.bf16 %v8861_v30  ;;  %v8862_v44 = vunpack.i.l.bf16 %v8861_v30  ;;  %v8878_v56 = vunpack.i.h.bf16 %v8876_v50  ;;  %v8877_v57 = vunpack.i.l.bf16 %v8876_v50 }
0x1486   : > { %v4431_v30 = vsub.s32 0, %v4430_v29  ;;  %v4436_v38 = vrot.slane %v4427_v31, %v4435_v32 }
0x1487   : > { %v4194_v51 = vsel %vm4193_vm11, %v4192_v47, %v8863_v43  ;;  %v4204_v52 = vsel %vm4193_vm11, %v4203_v48, %v8862_v44 }
0x1488   : > { %v8866_v39 = vpop.permute.xlu0 %8865  ;;  %v4432_v33 = vrot.slane %v4427_v31, %v4431_v30 }
0x1489   : > { %v8868_v45 = vunpack.i.h.bf16 %v8866_v39  ;;  %v8867_v46 = vunpack.i.l.bf16 %v8866_v39 }
0x148b   : > { %v4195_v37 = vsel %vm2884_vm3, %v4194_v51, %v8868_v45  ;;  %v4205_v26 = vsel %vm2884_vm3, %v4204_v52, %v8867_v46 }
0x148c   : > { %v8871_v49 = vpop.permute.xlu0 %8870 }
0x148d   : > { %v8873_v53 = vunpack.i.h.bf16 %v8871_v49  ;;  %v8872_v54 = vunpack.i.l.bf16 %v8871_v49 }
0x148f   : > { %v4197_v35 = vsel %vm4196_vm12, %v4195_v37, %v8873_v53  ;;  %v4206_v55 = vsel %vm4196_vm12, %v4205_v26, %v8872_v54 }
0x1490   : > { %v8881_v58 = vpop.permute.xlu0 %8880  ;;  %v4207_v42 = vsel %vm4198_vm13, %v4206_v55, %v8877_v57  ;;  %v4199_v61 = vsel %vm4198_vm13, %v4197_v35, %v8878_v56 }
0x1491   : > { %v8883_v59 = vunpack.i.h.bf16 %v8881_v58  ;;  %v8882_v60 = vunpack.i.l.bf16 %v8881_v58  ;;  %v9109_v58 = vld [vmem:[%s11516_s14] sm:$0xff]  }
0x1493   : > { %v4208_v62 = vsel %vm4200_vm14, %v4207_v42, %v8882_v60  ;;  %v4201_v63 = vsel %vm4200_vm14, %v4199_v61, %v8883_v59  ;;  %v9110_v59 = vld [vmem:[%s11516_s14 + $0x8] sm:$0xff]  }
0x1494   : > { %4306 = vmatprep.mubr.f32.mxu0 %v4208_v62  ;;  %4409 = vmatprep.mubr.f32.mxu1 %v4208_v62 }
0x1495   : > { %4307 = vmatmul.mubr.f32.vlgmr.msra.gmra.mrb[72].mxu0 %v4201_v63  ;;  %4410 = vmatmul.mubr.f32.vlgmr.msra.gmra.mrb[72].mxu1 %v4201_v63  ;;  %v5465_v63 = vld [vmem:[#allocation19] sm:$0xff] }
0x1496   : > { %4506 = vmatprep.mubr.f32.mxu0 %v9735_v36  ;;  %8485 = vmatprep.mubr.msk.bf16.mxu1 %vm9736_vm0, %v9735_v36 }
0x1497   : > { %8658 = vmatpush1.bf16.msra.mxu0 %v8657_v8  ;;  %8484 = vmatpush3.bf16.msra.mxu1 %v9109_v58  ;;  %v9117_v58 = vld [vmem:[%s11516_s14 + $0x40] sm:$0xff]  }
0x1498   : > { %8660 = vmatprep.subr.bf16.mxu0 %v8659_v9  ;;  %8495 = vmatprep.subr.bf16.mxu1 %v9735_v36 }
0x149b   : > { %8662 = vmatpush1.bf16.msra.mxu0 %v8661_v11 }
0x149c   : > { %8489 = vmatprep.subr.bf16.mxu0 %v9735_v36 }
0x1568   : > { %v8193_v12 = vpop.f32.mrb[72].mxu0  ;;  %v8228_v15 = vpop.f32.mrb[72].mxu1 }
0x1569   : > { %v8194_v17 = vpop.f32.mrb[73].mxu0  ;;  %v8229_v19 = vpop.f32.mrb[73].mxu1 }
0x156a   : > { %v8195_v20 = vadd.f32 %v8194_v17, %v8193_v12  ;;  %v8230_v14 = vadd.f32 %v8229_v19, %v8228_v15 }
0x156c   : > { %v4309_v21 = vadd.f32 %v8195_v20, %v4241_v16  ;;  %v4412_v22 = vadd.f32 %v8230_v14, %v4344_v18 }
0x156e   : > { %v4415_v23 = vmul.f32 0.5, %v4412_v22  ;;  %6829 = vst.msk [vmem:[%s883_s24] sm:$0x1] %vm6827_vm15, %v4412_v22  ;;  %6828 = vst.msk [vmem:[%s11557_s20] sm:$0x1] %vm6827_vm15, %v4309_v21  ;;  %s9567_s20 = scalar_lea.vmem %s11389_s27, 16 }
0x156f   : > { %p9568_p0 = scmp.ne.s32.totalorder %s11389_s27, %s9567_s20 }
0x1570   : > { %v4416_v24 = vmul.f32 1.442695, %v4415_v23 }
0x1571   : > { %p9569_p8 = pnand %p9568_p0, %p11626_p7 }
0x1572   : > { %9232 = vpow2.f32 %v4416_v24 }
0x1573   : > { %p9570_p11 = pneg %p9569_p8 }
0x157c   : > { %v9233_v25 = vpop.eup %9232 }
0x157d   : > { %v4418_v27 = vadd.f32 %v9233_v25, %v4309_v21 }
0x157f   : > { %7659 = vmatmul.mubr.msk.f32.vlgmr.msra.gmra.mrb[74].mxu0 %vm4191_vm10, %v4418_v27  ;;  %6830 = vst.msk [vmem:[%s11556_s22] sm:$0x1] %vm6827_vm15, %v4418_v27  ;;  %vm4583_vm10 = vcmask 1046528  }
0x1580   : > { %8491 = vmatprep.mubr.msk.bf16.mxu0 %vm9736_vm0, %v9735_v36  ;;  %8490 = vmatpush3.bf16.msra.mxu0 %v9110_v59 }
0x1581   : > { %8501 = vmatprep.subr.bf16.mxu0 %v9735_v36 }
0x1652   : > { %v4508_v13 = vpop.f32.mrb[74].mxu0 }
0x1653   : > { %v4509_v39 = vadd.f32 %v4508_v13, %v4432_v33  ;;  %v4510_v40 = vpop.f32.mrb[75].mxu0 }
0x1654   : > { %v4511_v41 = vadd.f32 %v4510_v40, %v4436_v38 }
0x1655   : > { %v4513_v43 = vmax.f32 %v4509_v39, 0.0 }
0x1656   : > { %v4514_v44 = vmax.f32 %v4511_v41, 0.0 }
0x1657   : > { %v4520_v45 = vrot.slane %v4513_v43, 6  ;;  %v4516_v46 = vrot.slane %v4513_v43, 7  ;;  %v4528_v49 = vrot.slane %v4513_v43, 4  ;;  %v4524_v50 = vrot.slane %v4513_v43, 5 }
0x1658   : > { %v4549_v47 = vrot.slane %v4514_v44, 6  ;;  %v4545_v48 = vrot.slane %v4514_v44, 7  ;;  %v4557_v53 = vrot.slane %v4514_v44, 4  ;;  %v4553_v54 = vrot.slane %v4514_v44, 5 }
0x1659   : > { %v4536_v37 = vrot.slane %v4513_v43, 2  ;;  %v4565_v26 = vrot.slane %v4514_v44, 2  ;;  %v4532_v56 = vrot.slane %v4513_v43, 3  ;;  %v4561_v57 = vrot.slane %v4514_v44, 3 }
0x165a   : > { %v8889_v51 = vpack.i.bf16 %v4549_v47, %v4520_v45  ;;  %v8884_v52 = vpack.i.bf16 %v4545_v48, %v4516_v46  ;;  %v8899_v35 = vpack.i.bf16 %v4557_v53, %v4528_v49  ;;  %v8894_v55 = vpack.i.bf16 %v4553_v54, %v4524_v50  ;;  %v4698_v53 = vld [vmem:[#allocation18 + $0x4] sm:$0xf]  ;;  %v4645_v54 = vld [vmem:[#allocation18] sm:$0xf] }
0x165b   : > { %v8909_v60 = vpack.i.bf16 %v4565_v26, %v4536_v37  ;;  %v8904_v42 = vpack.i.bf16 %v4561_v57, %v4532_v56  ;;  %v4540_v61 = vrot.slane %v4513_v43, 1  ;;  %v4569_v62 = vrot.slane %v4514_v44, 1  ;;  %v9111_v37 = vld [vmem:[%s11516_s14 + $0x10] sm:$0xff]   ;;  %v9112_v26 = vld [vmem:[%s11516_s14 + $0x18] sm:$0xff]  }
0x165c   : > { %8890 = vrot.lane.b32.xlu0 %v8889_v51, %s9740_s10  ;;  %8885 = vrot.lane.b32.xlu1 %v8884_v52, %s9744_s3  ;;  %s11621_s10 = smov 16   ;;  %v9115_v56 = vld [vmem:[%s11516_s14 + $0x30] sm:$0xff]   ;;  %v9116_v57 = vld [vmem:[%s11516_s14 + $0x38] sm:$0xff]  }
0x165d   : > { %v8914_v1 = vpack.i.bf16 %v4569_v62, %v4540_v61 }
0x1660   : > { %8900 = vrot.lane.b32.xlu0 %v8899_v35, %s9742_s7  ;;  %8895 = vrot.lane.b32.xlu1 %v8894_v55, %s9743_s26  ;;  %v9113_v35 = vld [vmem:[%s11516_s14 + $0x20] sm:$0xff]   ;;  %v9114_v55 = vld [vmem:[%s11516_s14 + $0x28] sm:$0xff]   ;;  %s11622_s26 = sld [smem:[#allocation54_spill]]  ;;  %s11624_s7 = sld [smem:[#allocation57_spill]] }
0x1664   : > { %8910 = vrot.lane.b32.xlu0 %v8909_v60, %s9738_s0  ;;  %8905 = vrot.lane.b32.xlu1 %v8904_v42, %s9741_s18  ;;  %s9745_s0 = smov [#allocation23]  }
0x1665   : > { %s9571_s18 = sshll.u32 %s9745_s0, 4  ;;  %s9572_s18 = int_to_ptr.vmem [resolvable:$false] %s9571_s18 }
0x1666   : > { %s9573_s24 = scalar_lea.vmem %s9572_s18, 32  ;;  %p9574_p12 = scmp.lt.s32.totalorder %s11389_s27, %s9572_s18 }
0x1667   : > { %p9575_p13 = scmp.lt.s32.totalorder %s9573_s24, %s9567_s20 }
0x1668   : > { %5468 = vperm.xlu0 %8847, %v5465_v63   ;;  %8915 = vrot.lane.b32.xlu1 %v8914_v1, %s11621_s10  ;;  %s11379_s10 = sshll.u32 %s9889_s5, 4 }
0x1669   : > { %s11385_s3 = scalar_lea.hbm %s11624_s7, %s11379_s10  ;;  %s11395_s1 = scalar_lea.hbm %s11625_s28, %s11379_s10 }
0x166a   : > { %p9576_p1 = por %p9575_p13, %p9574_p12 }
0x166c   : > { %p9577_p6 = pnand %p9576_p1, %p9570_p11 }
0x16ce   : > { %v8891_v2 = vpop.permute.xlu0 %8890  ;;  %v8886_v3 = vpop.permute.xlu1 %8885 }
0x16cf   : > { %v8888_v4 = vunpack.i.h.bf16 %v8886_v3  ;;  %v8887_v5 = vunpack.i.l.bf16 %v8886_v3  ;;  %v8893_v6 = vunpack.i.h.bf16 %v8891_v2  ;;  %v8892_v7 = vunpack.i.l.bf16 %v8891_v2 }
0x16d1   : > { %v4585_v8 = vsel %vm4573_vm2, %v4514_v44, %v8888_v4  ;;  %v4574_v9 = vsel %vm4573_vm2, %v4513_v43, %v8887_v5 }
0x16d2   : > { %v8901_v34 = vpop.permute.xlu0 %8900  ;;  %v8896_v10 = vpop.permute.xlu1 %8895  ;;  %v4575_v17 = vsel %vm1253_vm1, %v4574_v9, %v8892_v7  ;;  %v4586_v18 = vsel %vm1253_vm1, %v4585_v8, %v8893_v6  ;;  %v4837_v9 = vld [vmem:[#allocation18 + $0x8] sm:$0xf] }
0x16d3   : > { %v8898_v11 = vunpack.i.h.bf16 %v8896_v10  ;;  %v8897_v12 = vunpack.i.l.bf16 %v8896_v10  ;;  %v8903_v15 = vunpack.i.h.bf16 %v8901_v34  ;;  %v8902_v16 = vunpack.i.l.bf16 %v8901_v34 }
0x16d5   : > { %v4577_v19 = vsel %vm4576_vm4, %v4575_v17, %v8897_v12  ;;  %v4587_v20 = vsel %vm4576_vm4, %v4586_v18, %v8898_v11 }
0x16d6   : > { %v8911_v14 = vpop.permute.xlu0 %8910  ;;  %v8906_v21 = vpop.permute.xlu1 %8905  ;;  %v4578_v27 = vsel %vm3068_vm5, %v4577_v19, %v8902_v16  ;;  %v4588_v28 = vsel %vm3068_vm5, %v4587_v20, %v8903_v15  ;;  %v4934_v16 = vld [vmem:[#allocation18 + $0xc] sm:$0xf] }
0x16d7   : > { %v8908_v22 = vunpack.i.h.bf16 %v8906_v21  ;;  %v8907_v23 = vunpack.i.l.bf16 %v8906_v21  ;;  %v8913_v24 = vunpack.i.h.bf16 %v8911_v14  ;;  %v8912_v25 = vunpack.i.l.bf16 %v8911_v14  ;;  %v5031_v21 = vld [vmem:[#allocation18 + $0x10] sm:$0xf] }
0x16d9   : > { %v4580_v29 = vsel %vm4579_vm8, %v4578_v27, %v8907_v23  ;;  %v4589_v30 = vsel %vm4579_vm8, %v4588_v28, %v8908_v22  ;;  %v5128_v28 = vld [vmem:[#allocation18 + $0x14] sm:$0xf] }
0x16da   : > { %v8916_v31 = vpop.permute.xlu1 %8915  ;;  %v4582_v38 = vsel %vm4581_vm9, %v4580_v29, %v8912_v25  ;;  %v4590_v13 = vsel %vm4581_vm9, %v4589_v30, %v8913_v24 }
0x16db   : > { %v8918_v32 = vunpack.i.h.bf16 %v8916_v31  ;;  %v8917_v33 = vunpack.i.l.bf16 %v8916_v31 }
0x16dd   : > { %v4584_v39 = vsel %vm4583_vm10, %v4582_v38, %v8917_v33  ;;  %v4591_v40 = vsel %vm4583_vm10, %v4590_v13, %v8918_v32  ;;  %v5225_v38 = vld [vmem:[#allocation18 + $0x18] sm:$0xf] }
0x16de   : > { %v4592_v41 = vpack.c.bf16 %v4591_v40, %v4584_v39 }
0x16e0   : > { %8486 = vmatmul.mubr.msk.bf16.vlgmr.msra.gmra.mrb[76].mxu1 %vm4097_vm7, %v4592_v41  ;;  %8492 = vmatmul.mubr.msk.bf16.vlgmr.msra.gmra.mrb[76].mxu0 %vm4097_vm7, %v4592_v41 }
0x16e1   : > { %8497 = vmatprep.mubr.msk.bf16.mxu1 %vm9736_vm0, %v9735_v36  ;;  %8503 = vmatprep.mubr.msk.bf16.mxu0 %vm9736_vm0, %v9735_v36 }
0x17b3   : > { %v4638_v43 = vpop.f32.mrb[76].mxu1  ;;  %v4690_v44 = vpop.f32.mrb[76].mxu0 }
0x17b4   : > { %v8487_v45 = vpop.f32.mrb[77].mxu1  ;;  %v8493_v46 = vpop.f32.mrb[77].mxu0 }
0x17b5   : > { %v4641_v47 = vpop.f32.mrb[78].mxu1  ;;  %v4693_v48 = vpop.f32.mrb[78].mxu0 }
0x17b6   : > { %v4646_v49 = vpack.c.bf16 %v4641_v47, %v4638_v43  ;;  %v4699_v50 = vpack.c.bf16 %v4693_v48, %v4690_v44  ;;  %v8488_v51 = vpop.f32.mrb[79].mxu1  ;;  %v8494_v52 = vpop.f32.mrb[79].mxu0  ;;  %v5322_v44 = vld [vmem:[#allocation18 + $0x1c] sm:$0xf] }
0x17b8   : > { %8496 = vmatpush3.bf16.msra.mxu1 %v4699_v50  ;;  %8502 = vmatpush3.bf16.msra.mxu0 %v4646_v49  ;;  %v5419_v50 = vld [vmem:[#allocation18 + $0x20] sm:$0xf] }
0x17b9   : > { %8507 = vmatprep.subr.bf16.mxu1 %v9735_v36  ;;  %8513 = vmatprep.subr.bf16.mxu0 %v9735_v36 }
0x17bb   : > { %8498 = vmatmul.mubr.msk.bf16.vlgmr.msra.gmra.mrb[80].mxu1 %vm4097_vm7, %v4698_v53  ;;  %8504 = vmatmul.mubr.msk.bf16.vlgmr.msra.gmra.mrb[80].mxu0 %vm4097_vm7, %v4645_v54 }
0x17bc   : > { %8508 = vmatpush3.bf16.msra.mxu1 %v9111_v37  ;;  %8509 = vmatprep.mubr.msk.bf16.mxu1 %vm9736_vm0, %v9735_v36 }
0x17bd   : > { %8519 = vmatprep.subr.bf16.mxu1 %v9735_v36  ;;  %8515 = vmatprep.mubr.msk.bf16.mxu0 %vm9736_vm0, %v9735_v36 }
0x17c3   : > { %8510 = vmatmul.mubr.msk.bf16.vlgmr.msra.gmra.mrb[84].mxu1 %vm4097_vm7, %v4592_v41 }
0x17c4   : > { %8520 = vmatpush3.bf16.msra.mxu1 %v9112_v26  ;;  %8521 = vmatprep.mubr.msk.bf16.mxu1 %vm9736_vm0, %v9735_v36 }
0x17c5   : > { %8531 = vmatprep.subr.bf16.mxu1 %v9735_v36 }
0x17cb   : > { %8522 = vmatmul.mubr.msk.bf16.vlgmr.msra.gmra.mrb[88].mxu1 %vm4097_vm7, %v4592_v41 }
0x17cc   : > { %8532 = vmatpush3.bf16.msra.mxu1 %v9113_v35  ;;  %8533 = vmatprep.mubr.msk.bf16.mxu1 %vm9736_vm0, %v9735_v36 }
0x17cd   : > { %8543 = vmatprep.subr.bf16.mxu1 %v9735_v36 }
0x17d3   : > { %8534 = vmatmul.mubr.msk.bf16.vlgmr.msra.gmra.mrb[92].mxu1 %vm4097_vm7, %v4592_v41 }
0x17d4   : > { %8544 = vmatpush3.bf16.msra.mxu1 %v9114_v55  ;;  %8545 = vmatprep.mubr.msk.bf16.mxu1 %vm9736_vm0, %v9735_v36 }
0x17d5   : > { %8555 = vmatprep.subr.bf16.mxu1 %v9735_v36 }
0x17db   : > { %8546 = vmatmul.mubr.msk.bf16.vlgmr.msra.gmra.mrb[96].mxu1 %vm4097_vm7, %v4592_v41 }
0x17dc   : > { %8556 = vmatpush3.bf16.msra.mxu1 %v9115_v56  ;;  %8557 = vmatprep.mubr.msk.bf16.mxu1 %vm9736_vm0, %v9735_v36 }
0x17dd   : > { %8567 = vmatprep.subr.bf16.mxu1 %v9735_v36 }
0x17e3   : > { %8558 = vmatmul.mubr.msk.bf16.vlgmr.msra.gmra.mrb[100].mxu1 %vm4097_vm7, %v4592_v41 }
0x17e4   : > { %8568 = vmatpush3.bf16.msra.mxu1 %v9116_v57  ;;  %8569 = vmatprep.mubr.msk.bf16.mxu1 %vm9736_vm0, %v9735_v36 }
0x17e5   : > { %8579 = vmatprep.subr.bf16.mxu1 %v9735_v36 }
0x17eb   : > { %8570 = vmatmul.mubr.msk.bf16.vlgmr.msra.gmra.mrb[104].mxu1 %vm4097_vm7, %v4592_v41 }
0x17ec   : > { %8580 = vmatpush3.bf16.msra.mxu1 %v9117_v58  ;;  %8581 = vmatprep.mubr.msk.bf16.mxu1 %vm9736_vm0, %v9735_v36 }
0x17f3   : > { %8582 = vmatmul.mubr.msk.bf16.vlgmr.msra.gmra.mrb[108].mxu1 %vm4097_vm7, %v4592_v41 }
0x17f4   : > { %5574 = vmatprep.mubr.bf16.mxu1 %v9737_v0 }
0x188e   : > { %v4737_v59 = vpop.f32.mrb[80].mxu1  ;;  %v4780_v60 = vpop.f32.mrb[80].mxu0 }
0x188f   : > { %v11036_v42 = vadd.f32 %v4780_v60, %v4737_v59  ;;  %v8499_v61 = vpop.f32.mrb[81].mxu1  ;;  %v8505_v62 = vpop.f32.mrb[81].mxu0 }
0x1890   : > { %v4740_v63 = vpop.f32.mrb[82].mxu1  ;;  %v4783_v1 = vpop.f32.mrb[82].mxu0 }
0x1891   : > { %v8500_v2 = vpop.f32.mrb[83].mxu1  ;;  %v8506_v3 = vpop.f32.mrb[83].mxu0 }
0x1896   : > { %v4829_v4 = vpop.f32.mrb[84].mxu1 }
0x1897   : > { %v8511_v5 = vpop.f32.mrb[85].mxu1 }
0x1898   : > { %v4832_v6 = vpop.f32.mrb[86].mxu1 }
0x1899   : > { %v4838_v7 = vpack.c.bf16 %v4832_v6, %v4829_v4  ;;  %v8512_v8 = vpop.f32.mrb[87].mxu1 }
0x189b   : > { %8514 = vmatpush3.bf16.msra.mxu0 %v4838_v7 }
0x189c   : > { %8525 = vmatprep.subr.bf16.mxu0 %v9735_v36 }
0x189e   : > { %8516 = vmatmul.mubr.msk.bf16.vlgmr.msra.gmra.mrb[84].mxu0 %vm4097_vm7, %v4837_v9  ;;  %v4926_v34 = vpop.f32.mrb[88].mxu1 }
0x189f   : > { %v8523_v10 = vpop.f32.mrb[89].mxu1  ;;  %8527 = vmatprep.mubr.msk.bf16.mxu0 %vm9736_vm0, %v9735_v36 }
0x18a0   : > { %v4929_v11 = vpop.f32.mrb[90].mxu1 }
0x18a1   : > { %v4935_v12 = vpack.c.bf16 %v4929_v11, %v4926_v34  ;;  %v8524_v15 = vpop.f32.mrb[91].mxu1 }
0x18a3   : > { %8526 = vmatpush3.bf16.msra.mxu0 %v4935_v12 }
0x18a4   : > { %8537 = vmatprep.subr.bf16.mxu0 %v9735_v36 }
0x18a6   : > { %8528 = vmatmul.mubr.msk.bf16.vlgmr.msra.gmra.mrb[88].mxu0 %vm4097_vm7, %v4934_v16  ;;  %v5023_v17 = vpop.f32.mrb[92].mxu1 }
0x18a7   : > { %v8535_v18 = vpop.f32.mrb[93].mxu1  ;;  %8539 = vmatprep.mubr.msk.bf16.mxu0 %vm9736_vm0, %v9735_v36 }
0x18a8   : > { %v5026_v19 = vpop.f32.mrb[94].mxu1 }
0x18a9   : > { %v5032_v20 = vpack.c.bf16 %v5026_v19, %v5023_v17  ;;  %v8536_v14 = vpop.f32.mrb[95].mxu1  ;;  %v5469_v17 = vpop.permute.xlu0 %5468 }
0x18ab   : > { %8538 = vmatpush3.bf16.msra.mxu0 %v5032_v20 }
0x18ac   : > { %8549 = vmatprep.subr.bf16.mxu0 %v9735_v36 }
0x18ae   : > { %8540 = vmatmul.mubr.msk.bf16.vlgmr.msra.gmra.mrb[92].mxu0 %vm4097_vm7, %v5031_v21  ;;  %v5120_v22 = vpop.f32.mrb[96].mxu1 }
0x18af   : > { %v8547_v23 = vpop.f32.mrb[97].mxu1  ;;  %8551 = vmatprep.mubr.msk.bf16.mxu0 %vm9736_vm0, %v9735_v36 }
0x18b0   : > { %v5123_v24 = vpop.f32.mrb[98].mxu1 }
0x18b1   : > { %v5129_v25 = vpack.c.bf16 %v5123_v24, %v5120_v22  ;;  %v8548_v27 = vpop.f32.mrb[99].mxu1 }
0x18b2   : > { %v6802_v27 = vld [vmem:[#allocation21] sm:$0xf] }
0x18b3   : > { %8550 = vmatpush3.bf16.msra.mxu0 %v5129_v25 }
0x18b4   : > { %8561 = vmatprep.subr.bf16.mxu0 %v9735_v36 }
0x18b6   : > { %8552 = vmatmul.mubr.msk.bf16.vlgmr.msra.gmra.mrb[96].mxu0 %vm4097_vm7, %v5128_v28  ;;  %v5217_v29 = vpop.f32.mrb[100].mxu1  ;;  %v9120_v28 = vld [vmem:[%s11519_s17 + $0x4] ss:$8 sps:$4 sm:$0xff]  }
0x18b7   : > { %v8559_v30 = vpop.f32.mrb[101].mxu1  ;;  %8563 = vmatprep.mubr.msk.bf16.mxu0 %vm9736_vm0, %v9735_v36  ;;  %5542 = vmatprep.subr.bf16.mxu1 %v9120_v28 }
0x18b8   : > { %v5220_v31 = vpop.f32.mrb[102].mxu1  ;;  %v9118_v30 = vld [vmem:[%s11519_s17] ss:$8 sps:$4 sm:$0xff]  }
0x18b9   : > { %v5226_v32 = vpack.c.bf16 %v5220_v31, %v5217_v29  ;;  %v8560_v33 = vpop.f32.mrb[103].mxu1  ;;  %v9123_v29 = vld [vmem:[%s11519_s17 + $0x44] ss:$8 sps:$4 sm:$0xff]   ;;  %v9121_v31 = vld [vmem:[%s11519_s17 + $0x40] ss:$8 sps:$4 sm:$0xff]   ;;  %5543 = vmatpush1.bf16.msra.mxu1 %v9118_v30 }
0x18ba   : > { %v9129_v33 = vld [vmem:[%s11519_s17 + $0x54] ss:$8 sps:$4 sm:$0xff]  }
0x18bb   : > { %8562 = vmatpush3.bf16.msra.mxu0 %v5226_v32  ;;  %v9126_v32 = vld [vmem:[%s11519_s17 + $0x14] ss:$8 sps:$4 sm:$0xff]  }
0x18bc   : > { %8573 = vmatprep.subr.bf16.mxu0 %v9735_v36  ;;  %5544 = vmatprep.subr.bf16.mxu1 %v9126_v32  ;;  %v7752_v32 = vld [vmem:[%s11622_s26 + $0x4] sm:$0x3] }
0x18be   : > { %8564 = vmatmul.mubr.msk.bf16.vlgmr.msra.gmra.mrb[100].mxu0 %vm4097_vm7, %v5225_v38  ;;  %v5314_v13 = vpop.f32.mrb[104].mxu1  ;;  %v9124_v38 = vld [vmem:[%s11519_s17 + $0x10] ss:$8 sps:$4 sm:$0xff]  }
0x18bf   : > { %v8571_v39 = vpop.f32.mrb[105].mxu1  ;;  %8575 = vmatprep.mubr.msk.bf16.mxu0 %vm9736_vm0, %v9735_v36  ;;  %5545 = vmatpush1.bf16.msra.mxu1 %v9124_v38  ;;  %v9159_v38 = vld [vmem:[%s11519_s17 + $0xd4] ss:$8 sps:$4 sm:$0xff]  }
0x18c0   : > { %v5317_v40 = vpop.f32.mrb[106].mxu1  ;;  %v9132_v39 = vld [vmem:[%s11519_s17 + $0x24] ss:$8 sps:$4 sm:$0xff]  }
0x18c1   : > { %v5323_v41 = vpack.c.bf16 %v5317_v40, %v5314_v13  ;;  %v8572_v43 = vpop.f32.mrb[107].mxu1  ;;  %v9127_v13 = vld [vmem:[%s11519_s17 + $0x50] ss:$8 sps:$4 sm:$0xff]   ;;  %v9135_v40 = vld [vmem:[%s11519_s17 + $0x64] ss:$8 sps:$4 sm:$0xff]   ;;  %5546 = vmatprep.subr.bf16.mxu1 %v9132_v39 }
0x18c2   : > { %v9133_v43 = vld [vmem:[%s11519_s17 + $0x60] ss:$8 sps:$4 sm:$0xff]   ;;  %v9162_v39 = vld [vmem:[%s11519_s17 + $0xe4] ss:$8 sps:$4 sm:$0xff]  }
0x18c3   : > { %8574 = vmatpush3.bf16.msra.mxu0 %v5323_v41  ;;  %v9130_v41 = vld [vmem:[%s11519_s17 + $0x20] ss:$8 sps:$4 sm:$0xff]  }
0x18c4   : > { %8585 = vmatprep.subr.bf16.mxu0 %v9735_v36  ;;  %5547 = vmatpush1.bf16.msra.mxu1 %v9130_v41  ;;  %v9165_v41 = vld [vmem:[%s11519_s17 + $0xf4] ss:$8 sps:$4 sm:$0xff]  }
0x18c6   : > { %8576 = vmatmul.mubr.msk.bf16.vlgmr.msra.gmra.mrb[104].mxu0 %vm4097_vm7, %v5322_v44  ;;  %v5411_v45 = vpop.f32.mrb[108].mxu1  ;;  %v9136_v44 = vld [vmem:[%s11519_s17 + $0x30] ss:$8 sps:$4 sm:$0xff]  }
0x18c7   : > { %v8583_v46 = vpop.f32.mrb[109].mxu1  ;;  %8587 = vmatprep.mubr.msk.bf16.mxu0 %vm9736_vm0, %v9735_v36 }
0x18c8   : > { %v5414_v47 = vpop.f32.mrb[110].mxu1  ;;  %v9139_v46 = vld [vmem:[%s11519_s17 + $0x70] ss:$8 sps:$4 sm:$0xff]  }
0x18c9   : > { %v5420_v48 = vpack.c.bf16 %v5414_v47, %v5411_v45  ;;  %v8584_v49 = vpop.f32.mrb[111].mxu1  ;;  %v9138_v45 = vld [vmem:[%s11519_s17 + $0x34] ss:$8 sps:$4 sm:$0xff]  }
0x18ca   : > { %v9141_v47 = vld [vmem:[%s11519_s17 + $0x74] ss:$8 sps:$4 sm:$0xff]   ;;  %5548 = vmatprep.subr.bf16.mxu1 %v9138_v45 }
0x18cb   : > { %8586 = vmatpush3.bf16.msra.mxu0 %v5420_v48  ;;  %5549 = vmatpush1.bf16.msra.mxu1 %v9136_v44 }
0x18cc   : > { %5635 = vmatprep.subr.bf16.mxu0 %v9123_v29  ;;  %v9156_v29 = vld [vmem:[%s11519_s17 + $0xc4] ss:$8 sps:$4 sm:$0xff]  }
0x18ce   : > { %8588 = vmatmul.mubr.msk.bf16.vlgmr.msra.gmra.mrb[108].mxu0 %vm4097_vm7, %v5419_v50 }
0x18cf   : > { %5667 = vmatprep.mubr.bf16.mxu0 %v9737_v0  ;;  %5636 = vmatpush1.bf16.msra.mxu0 %v9121_v31 }
0x18d0   : > { %5637 = vmatprep.subr.bf16.mxu0 %v9129_v33  ;;  %v9154_v33 = vld [vmem:[%s11519_s17 + $0xc0] ss:$8 sps:$4 sm:$0xff]  }
0x18d3   : > { %5638 = vmatpush1.bf16.msra.mxu0 %v9127_v13  ;;  %v9157_v13 = vld [vmem:[%s11519_s17 + $0xd0] ss:$8 sps:$4 sm:$0xff]  }
0x18d4   : > { %5639 = vmatprep.subr.bf16.mxu0 %v9135_v40  ;;  %v9160_v40 = vld [vmem:[%s11519_s17 + $0xe0] ss:$8 sps:$4 sm:$0xff]  }
0x18d7   : > { %5640 = vmatpush1.bf16.msra.mxu0 %v9133_v43  ;;  %v9163_v43 = vld [vmem:[%s11519_s17 + $0xf0] ss:$8 sps:$4 sm:$0xff]  }
0x18d8   : > { %5641 = vmatprep.subr.bf16.mxu0 %v9141_v47 }
0x18db   : > { %5642 = vmatpush1.bf16.msra.mxu0 %v9139_v46 }
0x1971   : > { %v4876_v51 = vpop.f32.mrb[84].mxu0 }
0x1972   : > { %v4882_v52 = vadd.f32 %v4876_v51, %v11036_v42  ;;  %v8517_v53 = vpop.f32.mrb[85].mxu0 }
0x1973   : > { %v4879_v54 = vpop.f32.mrb[86].mxu0 }
0x1974   : > { %v8518_v37 = vpop.f32.mrb[87].mxu0 }
0x1979   : > { %v4973_v26 = vpop.f32.mrb[88].mxu0 }
0x197a   : > { %v4979_v35 = vadd.f32 %v4973_v26, %v4882_v52  ;;  %v8529_v55 = vpop.f32.mrb[89].mxu0  ;;  %v5487_v52 = vstv %s7703_s21  ;;  %s6840_s21 = sand.u32 1, %s9889_s5  }
0x197b   : > { %v4976_v56 = vpop.f32.mrb[90].mxu0  ;;  %s11397_s5 = scalar_lea.sflag [#allocation24], %s6840_s21 }
0x197c   : > { %v8530_v36 = vpop.f32.mrb[91].mxu0 }
0x1981   : > { %v5070_v57 = vpop.f32.mrb[92].mxu0 }
0x1982   : > { %v5076_v58 = vadd.f32 %v5070_v57, %v4979_v35  ;;  %v8541_v59 = vpop.f32.mrb[93].mxu0 }
0x1983   : > { %v5073_v60 = vpop.f32.mrb[94].mxu0 }
0x1984   : > { %v8542_v61 = vpop.f32.mrb[95].mxu0 }
0x1989   : > { %v5167_v62 = vpop.f32.mrb[96].mxu0 }
0x198a   : > { %v5173_v63 = vadd.f32 %v5167_v62, %v5076_v58  ;;  %v8553_v1 = vpop.f32.mrb[97].mxu0 }
0x198b   : > { %v5170_v2 = vpop.f32.mrb[98].mxu0 }
0x198c   : > { %v8554_v3 = vpop.f32.mrb[99].mxu0 }
0x1991   : > { %v5264_v4 = vpop.f32.mrb[100].mxu0 }
0x1992   : > { %v5270_v42 = vadd.f32 %v5264_v4, %v5173_v63  ;;  %v8565_v5 = vpop.f32.mrb[101].mxu0  ;;  %v9144_v63 = vld [vmem:[%s11519_s17 + $0x84] ss:$8 sps:$4 sm:$0xff]  }
0x1993   : > { %v5267_v6 = vpop.f32.mrb[102].mxu0  ;;  %v5583_v5 = vld [vmem:[%s11622_s26] sm:$0x3] }
0x1994   : > { %v8566_v7 = vpop.f32.mrb[103].mxu0  ;;  %v9142_v6 = vld [vmem:[%s11519_s17 + $0x80] ss:$8 sps:$4 sm:$0xff]  }
0x1995   : > { %v9147_v7 = vld [vmem:[%s11519_s17 + $0x94] ss:$8 sps:$4 sm:$0xff]  }
0x1999   : > { %v5361_v8 = vpop.f32.mrb[104].mxu0 }
0x199a   : > { %v5367_v9 = vadd.f32 %v5361_v8, %v5270_v42  ;;  %v8577_v34 = vpop.f32.mrb[105].mxu0  ;;  %v7730_v42 = vld [vmem:[%s11622_s26 + $0x2] sm:$0x3]  ;;  %v9145_v8 = vld [vmem:[%s11519_s17 + $0x90] ss:$8 sps:$4 sm:$0xff]  }
0x199b   : > { %v5364_v10 = vpop.f32.mrb[106].mxu0  ;;  %v9148_v34 = vld [vmem:[%s11519_s17 + $0xa0] ss:$8 sps:$4 sm:$0xff]  }
0x199c   : > { %v8578_v11 = vpop.f32.mrb[107].mxu0  ;;  %v9153_v10 = vld [vmem:[%s11519_s17 + $0xb4] ss:$8 sps:$4 sm:$0xff]  }
0x199d   : > { %v9151_v11 = vld [vmem:[%s11519_s17 + $0xb0] ss:$8 sps:$4 sm:$0xff]  }
0x19a1   : > { %v5458_v12 = vpop.f32.mrb[108].mxu0 }
0x19a2   : > { %v5464_v15 = vadd.f32 %v5458_v12, %v5367_v9  ;;  %v8589_v16 = vpop.f32.mrb[109].mxu0  ;;  %v9150_v9 = vld [vmem:[%s11519_s17 + $0xa4] ss:$8 sps:$4 sm:$0xff]  }
0x19a3   : > { %v5461_v18 = vpop.f32.mrb[110].mxu0 }
0x19a4   : > { %v8590_v19 = vpop.f32.mrb[111].mxu0  ;;  %v5471_v20 = vadd.f32 %v5469_v17, %v5464_v15 }
0x19a6   : > { %v5473_v14 = vsel %vm2884_vm3, %v5471_v20, 0.0 }
0x19a7   : > { %5474 = vadd.xlane.f32.xlu1 %v5473_v14 }
0x1a34   : > { %v5475_v21 = vpop.xlane.xlu1 %5474 }
0x1a35   : > { %v5476_v22 = vmul.f32 0.015625, %v5475_v21 }
0x1a37   : > { %v5477_v23 = vsub.f32 %v5471_v20, %v5476_v22 }
0x1a39   : > { %v5478_v24 = vmul.f32 %v5477_v23, %v5477_v23 }
0x1a3b   : > { %v5479_v25 = vsel %vm2884_vm3, %v5478_v24, 0.0 }
0x1a3c   : > { %5480 = vadd.xlane.f32.xlu0 %v5479_v25 }
0x1a52   : > { %6805 = vperm.xlu0 %8847, %v6802_v27  }
0x1ac9   : > { %v5481_v48 = vpop.xlane.xlu0 %5480 }
0x1aca   : > { %v5482_v49 = vmul.f32 0.015625, %v5481_v48 }
0x1acc   : > { %v5483_v50 = vadd.f32 1e-05, %v5482_v49 }
0x1ace   : > { %9234 = vrsqrt.f32 %v5483_v50 }
0x1ad8   : > { %v9235_v51 = vpop.eup %9234 }
0x1ad9   : > { %v5485_v53 = vmul.f32 %v9235_v51, %v5477_v23 }
0x1adb   : > { %vm5486_vm0 = vcmp.ge.f32.partialorder %v5485_v53, 0.0  ;;  %v5488_v54 = vmul.f32 %v5487_v52, %v5485_v53 }
0x1add   : > { %v5489_v37 = vsel %vm5486_vm0, %v5485_v53, %v5488_v54 }
0x1ade   : > { %v11115_v26 = vpack.c.bf16 %v5489_v37, %v5489_v37  ;;  %v9168_v37 = vld [vmem:[%s11519_s17 + $0x104] ss:$8 sps:$4 sm:$0xff]  }
0x1ae0   : > { %7712 = vmatmul.mubr.msk.bf16.vlgmr.msra.gmra.mrb[112].mxu1 %vm2884_vm3, %v11115_v26  ;;  %7729 = vmatmul.mubr.msk.bf16.vlgmr.msra.gmra.mrb[112].mxu0 %vm2884_vm3, %v11115_v26 }
0x1ae1   : > { %5721 = vmatprep.mubr.bf16.mxu1 %v9737_v0  ;;  %5771 = vmatprep.mubr.bf16.mxu0 %v9737_v0 }
0x1bb3   : > { %v5576_v35 = vpop.f32.mrb[112].mxu1  ;;  %v5669_v55 = vpop.f32.mrb[112].mxu0 }
0x1bb4   : > { %v5584_v56 = vpack.c.bf16 %v5576_v35, %v5576_v35  ;;  %v5678_v36 = vpack.c.bf16 %v5669_v55, %v5669_v55  ;;  %v5578_v57 = vpop.f32.mrb[113].mxu1  ;;  %v5671_v58 = vpop.f32.mrb[113].mxu0 }
0x1bb5   : > { %v5585_v59 = vpack.c.bf16 %v5578_v57, %v5578_v57  ;;  %v5679_v60 = vpack.c.bf16 %v5671_v58, %v5671_v58  ;;  %v5580_v61 = vpop.f32.mrb[114].mxu1  ;;  %v5673_v62 = vpop.f32.mrb[114].mxu0  ;;  %v9171_v57 = vld [vmem:[%s11519_s17 + $0x114] ss:$8 sps:$4 sm:$0xff]   ;;  %v9169_v58 = vld [vmem:[%s11519_s17 + $0x110] ss:$8 sps:$4 sm:$0xff]  }
0x1bb6   : > { %v5734_v1 = vsel %vm3068_vm5, %v5584_v56, 0  ;;  %v5684_v2 = vsel %vm3068_vm5, %v5678_v36, 0  ;;  %v5581_v3 = vpop.f32.mrb[115].mxu1  ;;  %v5674_v4 = vpop.f32.mrb[115].mxu0  ;;  %v7772_v56 = vld [vmem:[%s11622_s26 + $0x6] sm:$0x3] }
0x1bb7   : > { %7731 = vmatprep.subr.msk.bf16.mxu1 %vm3068_vm5, %v5679_v60  ;;  %7733 = vmatprep.subr.msk.bf16.mxu0 %vm3068_vm5, %v5585_v59  ;;  %v9166_v36 = vld [vmem:[%s11519_s17 + $0x100] ss:$8 sps:$4 sm:$0xff]   ;;  %v9174_v59 = vld [vmem:[%s11519_s17 + $0x124] ss:$8 sps:$4 sm:$0xff]   ;;  %v9177_v61 = vld [vmem:[%s11519_s17 + $0x134] ss:$8 sps:$4 sm:$0xff]  }
0x1bb8   : > { %5690 = vmatpush1.bf16.msra.mxu1 %v5684_v2  ;;  %5740 = vmatpush1.bf16.msra.mxu0 %v5734_v1  ;;  %v9172_v60 = vld [vmem:[%s11519_s17 + $0x120] ss:$8 sps:$4 sm:$0xff]   ;;  %v9175_v62 = vld [vmem:[%s11519_s17 + $0x130] ss:$8 sps:$4 sm:$0xff]  }
0x1bb9   : > { %5829 = vmatprep.subr.bf16.mxu1 %v9144_v63 }
0x1bbb   : > { %7732 = vmatmul.mubr.msk.bf16.vlgmr.msra.gmra.mrb[116].mxu1 %vm3064_vm6, %v7730_v42  ;;  %7734 = vmatmul.mubr.msk.bf16.vlgmr.msra.gmra.mrb[116].mxu0 %vm3064_vm6, %v5583_v5 }
0x1bbc   : > { %5830 = vmatpush1.bf16.msra.mxu1 %v9142_v6  ;;  %5861 = vmatprep.mubr.bf16.mxu1 %v9737_v0 }
0x1bbd   : > { %5831 = vmatprep.subr.bf16.mxu1 %v9147_v7  ;;  %5915 = vmatprep.mubr.bf16.mxu0 %v9737_v0 }
0x1bc0   : > { %5832 = vmatpush1.bf16.msra.mxu1 %v9145_v8 }
0x1bc1   : > { %5833 = vmatprep.subr.bf16.mxu1 %v9150_v9 }
0x1bc4   : > { %5834 = vmatpush1.bf16.msra.mxu1 %v9148_v34  ;;  %v9180_v34 = vld [vmem:[%s11519_s17 + $0x144] ss:$8 sps:$4 sm:$0xff]  }
0x1bc5   : > { %5835 = vmatprep.subr.bf16.mxu1 %v9153_v10 }
0x1bc8   : > { %5836 = vmatpush1.bf16.msra.mxu1 %v9151_v11 }
0x1bcb   : > { %7751 = vmatmul.mubr.msk.bf16.vlgmr.msra.gmra.mrb[120].mxu1 %vm2884_vm3, %v11115_v26 }
0x1bcc   : > { %6061 = vmatprep.mubr.bf16.mxu1 %v9737_v0 }
0x1c8e   : > { %v5723_v12 = vpop.f32.mrb[116].mxu1  ;;  %v5773_v15 = vpop.f32.mrb[116].mxu0 }
0x1c8f   : > { %v5774_v16 = vadd.f32 %v5773_v15, %v5723_v12  ;;  %v5725_v17 = vpop.f32.mrb[117].mxu1  ;;  %v5775_v18 = vpop.f32.mrb[117].mxu0  ;;  %v7792_v12 = vld [vmem:[%s11622_s26 + $0x8] sm:$0x3] }
0x1c90   : > { %v5776_v19 = vadd.f32 %v5775_v18, %v5725_v17  ;;  %v5727_v20 = vpop.f32.mrb[118].mxu1  ;;  %v5777_v14 = vpop.f32.mrb[118].mxu0  ;;  %v9178_v15 = vld [vmem:[%s11519_s17 + $0x140] ss:$8 sps:$4 sm:$0xff]   ;;  %v9181_v17 = vld [vmem:[%s11519_s17 + $0x150] ss:$8 sps:$4 sm:$0xff]  }
0x1c91   : > { %v5728_v21 = vpop.f32.mrb[119].mxu1  ;;  %v5778_v22 = vpop.f32.mrb[119].mxu0  ;;  %v9186_v18 = vld [vmem:[%s11519_s17 + $0x164] ss:$8 sps:$4 sm:$0xff]   ;;  %v9189_v20 = vld [vmem:[%s11519_s17 + $0x174] ss:$8 sps:$4 sm:$0xff]  }
0x1c92   : > { %v9187_v14 = vld [vmem:[%s11519_s17 + $0x170] ss:$8 sps:$4 sm:$0xff]  }
0x1c9e   : > { %v5863_v23 = vpop.f32.mrb[120].mxu1 }
0x1c9f   : > { %v5872_v24 = vpack.c.bf16 %v5863_v23, %v5863_v23  ;;  %v5865_v25 = vpop.f32.mrb[121].mxu1 }
0x1ca0   : > { %v5873_v27 = vpack.c.bf16 %v5865_v25, %v5865_v25  ;;  %v5867_v28 = vpop.f32.mrb[122].mxu1 }
0x1ca1   : > { %v5878_v30 = vsel %vm3068_vm5, %v5872_v24, 0  ;;  %v5868_v31 = vpop.f32.mrb[123].mxu1 }
0x1ca2   : > { %7753 = vmatprep.subr.msk.bf16.mxu0 %vm3068_vm5, %v5873_v27 }
0x1ca3   : > { %5884 = vmatpush1.bf16.msra.mxu0 %v5878_v30 }
0x1ca4   : > { %5975 = vmatprep.subr.bf16.mxu0 %v9156_v29 }
0x1ca6   : > { %7754 = vmatmul.mubr.msk.bf16.vlgmr.msra.gmra.mrb[120].mxu0 %vm3064_vm6, %v7752_v32 }
0x1ca7   : > { %5976 = vmatpush1.bf16.msra.mxu0 %v9154_v33  ;;  %6007 = vmatprep.mubr.bf16.mxu0 %v9737_v0  ;;  %v9192_v33 = vld [vmem:[%s11519_s17 + $0x184] ss:$8 sps:$4 sm:$0xff]  }
0x1ca8   : > { %5977 = vmatprep.subr.bf16.mxu0 %v9159_v38 }
0x1cab   : > { %5978 = vmatpush1.bf16.msra.mxu0 %v9157_v13 }
0x1cac   : > { %5979 = vmatprep.subr.bf16.mxu0 %v9162_v39  ;;  %v7812_v39 = vld [vmem:[%s11622_s26 + $0xa] sm:$0x3] }
0x1caf   : > { %5980 = vmatpush1.bf16.msra.mxu0 %v9160_v40  ;;  %v9190_v40 = vld [vmem:[%s11519_s17 + $0x180] ss:$8 sps:$4 sm:$0xff]  }
0x1cb0   : > { %5981 = vmatprep.subr.bf16.mxu0 %v9165_v41  ;;  %v9195_v41 = vld [vmem:[%s11519_s17 + $0x194] ss:$8 sps:$4 sm:$0xff]  }
0x1cb3   : > { %5982 = vmatpush1.bf16.msra.mxu0 %v9163_v43  ;;  %v9193_v43 = vld [vmem:[%s11519_s17 + $0x190] ss:$8 sps:$4 sm:$0xff]  }
0x1cb6   : > { %7771 = vmatmul.mubr.msk.bf16.vlgmr.msra.gmra.mrb[124].mxu0 %vm2884_vm3, %v11115_v26 }
0x1cb7   : > { %6207 = vmatprep.mubr.bf16.mxu0 %v9737_v0 }
0x1d79   : > { %v5917_v44 = vpop.f32.mrb[120].mxu0 }
0x1d7a   : > { %v5924_v45 = vadd.f32 %v5917_v44, %v5774_v16  ;;  %v5919_v46 = vpop.f32.mrb[121].mxu0  ;;  %v9183_v16 = vld [vmem:[%s11519_s17 + $0x154] ss:$8 sps:$4 sm:$0xff]   ;;  %v9198_v44 = vld [vmem:[%s11519_s17 + $0x1a4] ss:$8 sps:$4 sm:$0xff]  }
0x1d7b   : > { %v5925_v47 = vadd.f32 %v5919_v46, %v5776_v19  ;;  %v5921_v48 = vpop.f32.mrb[122].mxu0  ;;  %v9184_v19 = vld [vmem:[%s11519_s17 + $0x160] ss:$8 sps:$4 sm:$0xff]   ;;  %v9201_v46 = vld [vmem:[%s11519_s17 + $0x1b4] ss:$8 sps:$4 sm:$0xff]  }
0x1d7c   : > { %v5922_v49 = vpop.f32.mrb[123].mxu0 }
0x1d89   : > { %v6009_v50 = vpop.f32.mrb[124].mxu0 }
0x1d8a   : > { %v6018_v51 = vpack.c.bf16 %v6009_v50, %v6009_v50  ;;  %v6011_v52 = vpop.f32.mrb[125].mxu0 }
0x1d8b   : > { %v6019_v53 = vpack.c.bf16 %v6011_v52, %v6011_v52  ;;  %v6013_v54 = vpop.f32.mrb[126].mxu0 }
0x1d8c   : > { %v6024_v35 = vsel %vm3068_vm5, %v6018_v51, 0  ;;  %v6014_v55 = vpop.f32.mrb[127].mxu0 }
0x1d8d   : > { %7773 = vmatprep.subr.msk.bf16.mxu1 %vm3068_vm5, %v6019_v53 }
0x1d8e   : > { %6030 = vmatpush1.bf16.msra.mxu1 %v6024_v35 }
0x1d8f   : > { %6121 = vmatprep.subr.bf16.mxu1 %v9168_v37 }
0x1d91   : > { %7774 = vmatmul.mubr.msk.bf16.vlgmr.msra.gmra.mrb[124].mxu1 %vm3064_vm6, %v7772_v56 }
0x1d92   : > { %6122 = vmatpush1.bf16.msra.mxu1 %v9166_v36  ;;  %6153 = vmatprep.mubr.bf16.mxu1 %v9737_v0  ;;  %v9204_v36 = vld [vmem:[%s11519_s17 + $0x1c4] ss:$8 sps:$4 sm:$0xff]  }
0x1d93   : > { %6123 = vmatprep.subr.bf16.mxu1 %v9171_v57 }
0x1d96   : > { %6124 = vmatpush1.bf16.msra.mxu1 %v9169_v58 }
0x1d97   : > { %6125 = vmatprep.subr.bf16.mxu1 %v9174_v59  ;;  %v7832_v59 = vld [vmem:[%s11622_s26 + $0xc] sm:$0x3] }
0x1d9a   : > { %6126 = vmatpush1.bf16.msra.mxu1 %v9172_v60  ;;  %v9202_v60 = vld [vmem:[%s11519_s17 + $0x1c0] ss:$8 sps:$4 sm:$0xff]  }
0x1d9b   : > { %6127 = vmatprep.subr.bf16.mxu1 %v9177_v61  ;;  %v9207_v61 = vld [vmem:[%s11519_s17 + $0x1d4] ss:$8 sps:$4 sm:$0xff]  }
0x1d9e   : > { %6128 = vmatpush1.bf16.msra.mxu1 %v9175_v62  ;;  %v9205_v62 = vld [vmem:[%s11519_s17 + $0x1d0] ss:$8 sps:$4 sm:$0xff]  }
0x1da1   : > { %7791 = vmatmul.mubr.msk.bf16.vlgmr.msra.gmra.mrb[128].mxu1 %vm2884_vm3, %v11115_v26 }
0x1da2   : > { %6353 = vmatprep.mubr.bf16.mxu1 %v9737_v0 }
0x1e64   : > { %v6063_v63 = vpop.f32.mrb[124].mxu1 }
0x1e65   : > { %v6070_v1 = vadd.f32 %v6063_v63, %v5924_v45  ;;  %v6065_v2 = vpop.f32.mrb[125].mxu1  ;;  %v9196_v45 = vld [vmem:[%s11519_s17 + $0x1a0] ss:$8 sps:$4 sm:$0xff]   ;;  %v9210_v63 = vld [vmem:[%s11519_s17 + $0x1e4] ss:$8 sps:$4 sm:$0xff]  }
0x1e66   : > { %v6071_v3 = vadd.f32 %v6065_v2, %v5925_v47  ;;  %v6067_v4 = vpop.f32.mrb[126].mxu1  ;;  %v9199_v47 = vld [vmem:[%s11519_s17 + $0x1b0] ss:$8 sps:$4 sm:$0xff]   ;;  %v9213_v2 = vld [vmem:[%s11519_s17 + $0x1f4] ss:$8 sps:$4 sm:$0xff]  }
0x1e67   : > { %v6068_v42 = vpop.f32.mrb[127].mxu1 }
0x1e74   : > { %v6155_v5 = vpop.f32.mrb[128].mxu1 }
0x1e75   : > { %v6164_v6 = vpack.c.bf16 %v6155_v5, %v6155_v5  ;;  %v6157_v7 = vpop.f32.mrb[129].mxu1 }
0x1e76   : > { %v6165_v8 = vpack.c.bf16 %v6157_v7, %v6157_v7  ;;  %v6159_v9 = vpop.f32.mrb[130].mxu1 }
0x1e77   : > { %v6170_v10 = vsel %vm3068_vm5, %v6164_v6, 0  ;;  %v6160_v11 = vpop.f32.mrb[131].mxu1 }
0x1e78   : > { %7793 = vmatprep.subr.msk.bf16.mxu0 %vm3068_vm5, %v6165_v8 }
0x1e79   : > { %6176 = vmatpush1.bf16.msra.mxu0 %v6170_v10 }
0x1e7a   : > { %6267 = vmatprep.subr.bf16.mxu0 %v9180_v34 }
0x1e7c   : > { %7794 = vmatmul.mubr.msk.bf16.vlgmr.msra.gmra.mrb[128].mxu0 %vm3064_vm6, %v7792_v12 }
0x1e7d   : > { %6268 = vmatpush1.bf16.msra.mxu0 %v9178_v15  ;;  %6299 = vmatprep.mubr.bf16.mxu0 %v9737_v0  ;;  %v9216_v15 = vld [vmem:[%s11519_s17 + $0x204] ss:$8 sps:$4 sm:$0xff]  }
0x1e7e   : > { %6269 = vmatprep.subr.bf16.mxu0 %v9183_v16 }
0x1e81   : > { %6270 = vmatpush1.bf16.msra.mxu0 %v9181_v17 }
0x1e82   : > { %6271 = vmatprep.subr.bf16.mxu0 %v9186_v18  ;;  %v7852_v18 = vld [vmem:[%s11622_s26 + $0xe] sm:$0x3] }
0x1e85   : > { %6272 = vmatpush1.bf16.msra.mxu0 %v9184_v19  ;;  %v9214_v19 = vld [vmem:[%s11519_s17 + $0x200] ss:$8 sps:$4 sm:$0xff]  }
0x1e86   : > { %6273 = vmatprep.subr.bf16.mxu0 %v9189_v20  ;;  %v9219_v20 = vld [vmem:[%s11519_s17 + $0x214] ss:$8 sps:$4 sm:$0xff]  }
0x1e89   : > { %6274 = vmatpush1.bf16.msra.mxu0 %v9187_v14  ;;  %v9217_v14 = vld [vmem:[%s11519_s17 + $0x210] ss:$8 sps:$4 sm:$0xff]  }
0x1e8c   : > { %7811 = vmatmul.mubr.msk.bf16.vlgmr.msra.gmra.mrb[132].mxu0 %vm2884_vm3, %v11115_v26 }
0x1e8d   : > { %6499 = vmatprep.mubr.bf16.mxu0 %v9737_v0 }
0x1f4f   : > { %v6209_v21 = vpop.f32.mrb[128].mxu0 }
0x1f50   : > { %v6216_v22 = vadd.f32 %v6209_v21, %v6070_v1  ;;  %v6211_v23 = vpop.f32.mrb[129].mxu0  ;;  %v9208_v1 = vld [vmem:[%s11519_s17 + $0x1e0] ss:$8 sps:$4 sm:$0xff]   ;;  %v9222_v21 = vld [vmem:[%s11519_s17 + $0x224] ss:$8 sps:$4 sm:$0xff]  }
0x1f51   : > { %v6217_v24 = vadd.f32 %v6211_v23, %v6071_v3  ;;  %v6213_v25 = vpop.f32.mrb[130].mxu0  ;;  %v9211_v3 = vld [vmem:[%s11519_s17 + $0x1f0] ss:$8 sps:$4 sm:$0xff]   ;;  %v9225_v23 = vld [vmem:[%s11519_s17 + $0x234] ss:$8 sps:$4 sm:$0xff]  }
0x1f52   : > { %v6214_v27 = vpop.f32.mrb[131].mxu0 }
0x1f5f   : > { %v6301_v28 = vpop.f32.mrb[132].mxu0 }
0x1f60   : > { %v6310_v29 = vpack.c.bf16 %v6301_v28, %v6301_v28  ;;  %v6303_v30 = vpop.f32.mrb[133].mxu0 }
0x1f61   : > { %v6311_v31 = vpack.c.bf16 %v6303_v30, %v6303_v30  ;;  %v6305_v32 = vpop.f32.mrb[134].mxu0 }
0x1f62   : > { %v6316_v38 = vsel %vm3068_vm5, %v6310_v29, 0  ;;  %v6306_v13 = vpop.f32.mrb[135].mxu0 }
0x1f63   : > { %7813 = vmatprep.subr.msk.bf16.mxu1 %vm3068_vm5, %v6311_v31 }
0x1f64   : > { %6322 = vmatpush1.bf16.msra.mxu1 %v6316_v38 }
0x1f65   : > { %6413 = vmatprep.subr.bf16.mxu1 %v9192_v33 }
0x1f67   : > { %7814 = vmatmul.mubr.msk.bf16.vlgmr.msra.gmra.mrb[132].mxu1 %vm3064_vm6, %v7812_v39 }
0x1f68   : > { %6414 = vmatpush1.bf16.msra.mxu1 %v9190_v40  ;;  %6445 = vmatprep.mubr.bf16.mxu1 %v9737_v0  ;;  %v7872_v40 = vld [vmem:[%s11622_s26 + $0x10] sm:$0x3] }
0x1f69   : > { %6415 = vmatprep.subr.bf16.mxu1 %v9195_v41 }
0x1f6c   : > { %6416 = vmatpush1.bf16.msra.mxu1 %v9193_v43 }
0x1f6d   : > { %6417 = vmatprep.subr.bf16.mxu1 %v9198_v44 }
0x1f70   : > { %6418 = vmatpush1.bf16.msra.mxu1 %v9196_v45 }
0x1f71   : > { %6419 = vmatprep.subr.bf16.mxu1 %v9201_v46 }
0x1f74   : > { %6420 = vmatpush1.bf16.msra.mxu1 %v9199_v47 }
0x1f77   : > { %7831 = vmatmul.mubr.msk.bf16.vlgmr.msra.gmra.mrb[136].mxu1 %vm2884_vm3, %v11115_v26 }
0x1f78   : > { %6645 = vmatprep.mubr.bf16.mxu1 %v9737_v0 }
0x203a   : > { %v6355_v48 = vpop.f32.mrb[132].mxu1 }
0x203b   : > { %v6362_v49 = vadd.f32 %v6355_v48, %v6216_v22  ;;  %v6357_v50 = vpop.f32.mrb[133].mxu1  ;;  %v9220_v22 = vld [vmem:[%s11519_s17 + $0x220] ss:$8 sps:$4 sm:$0xff]  }
0x203c   : > { %v6363_v51 = vadd.f32 %v6357_v50, %v6217_v24  ;;  %v6359_v52 = vpop.f32.mrb[134].mxu1 }
0x203d   : > { %v6360_v53 = vpop.f32.mrb[135].mxu1 }
0x204a   : > { %v6447_v54 = vpop.f32.mrb[136].mxu1 }
0x204b   : > { %v6456_v37 = vpack.c.bf16 %v6447_v54, %v6447_v54  ;;  %v6449_v35 = vpop.f32.mrb[137].mxu1 }
0x204c   : > { %v6457_v55 = vpack.c.bf16 %v6449_v35, %v6449_v35  ;;  %v6451_v56 = vpop.f32.mrb[138].mxu1 }
0x204d   : > { %v6462_v57 = vsel %vm3068_vm5, %v6456_v37, 0  ;;  %v6452_v58 = vpop.f32.mrb[139].mxu1 }
0x204e   : > { %7833 = vmatprep.subr.msk.bf16.mxu0 %vm3068_vm5, %v6457_v55 }
0x204f   : > { %6468 = vmatpush1.bf16.msra.mxu0 %v6462_v57 }
0x2050   : > { %6559 = vmatprep.subr.bf16.mxu0 %v9204_v36 }
0x2052   : > { %7834 = vmatmul.mubr.msk.bf16.vlgmr.msra.gmra.mrb[136].mxu0 %vm3064_vm6, %v7832_v59 }
0x2053   : > { %6560 = vmatpush1.bf16.msra.mxu0 %v9202_v60  ;;  %6591 = vmatprep.mubr.bf16.mxu0 %v9737_v0 }
0x2054   : > { %6561 = vmatprep.subr.bf16.mxu0 %v9207_v61 }
0x2057   : > { %6562 = vmatpush1.bf16.msra.mxu0 %v9205_v62 }
0x2058   : > { %6563 = vmatprep.subr.bf16.mxu0 %v9210_v63 }
0x205b   : > { %6564 = vmatpush1.bf16.msra.mxu0 %v9208_v1 }
0x205c   : > { %6565 = vmatprep.subr.bf16.mxu0 %v9213_v2 }
0x205f   : > { %6566 = vmatpush1.bf16.msra.mxu0 %v9211_v3 }
0x2062   : > { %7851 = vmatmul.mubr.msk.bf16.vlgmr.msra.gmra.mrb[140].mxu0 %vm2884_vm3, %v11115_v26 }
0x2063   : > { %6791 = vmatprep.mubr.bf16.mxu0 %v9737_v0 }
0x2125   : > { %v6501_v4 = vpop.f32.mrb[136].mxu0 }
0x2126   : > { %v6508_v42 = vadd.f32 %v6501_v4, %v6362_v49  ;;  %v6503_v5 = vpop.f32.mrb[137].mxu0 }
0x2127   : > { %v6509_v6 = vadd.f32 %v6503_v5, %v6363_v51  ;;  %v6505_v7 = vpop.f32.mrb[138].mxu0 }
0x2128   : > { %v6506_v8 = vpop.f32.mrb[139].mxu0 }
0x2135   : > { %v6593_v9 = vpop.f32.mrb[140].mxu0 }
0x2136   : > { %v6602_v34 = vpack.c.bf16 %v6593_v9, %v6593_v9  ;;  %v6595_v10 = vpop.f32.mrb[141].mxu0 }
0x2137   : > { %v6603_v11 = vpack.c.bf16 %v6595_v10, %v6595_v10  ;;  %v6597_v12 = vpop.f32.mrb[142].mxu0 }
0x2138   : > { %v6608_v16 = vsel %vm3068_vm5, %v6602_v34, 0  ;;  %v6598_v17 = vpop.f32.mrb[143].mxu0 }
0x2139   : > { %7853 = vmatprep.subr.msk.bf16.mxu1 %vm3068_vm5, %v6603_v11 }
0x213a   : > { %6614 = vmatpush1.bf16.msra.mxu1 %v6608_v16 }
0x213b   : > { %6705 = vmatprep.subr.bf16.mxu1 %v9216_v15 }
0x213d   : > { %7854 = vmatmul.mubr.msk.bf16.vlgmr.msra.gmra.mrb[140].mxu1 %vm3064_vm6, %v7852_v18 }
0x213e   : > { %6706 = vmatpush1.bf16.msra.mxu1 %v9214_v19  ;;  %6737 = vmatprep.mubr.bf16.mxu1 %v9737_v0  ;;  %v9223_v0 = vld [vmem:[%s11519_s17 + $0x230] ss:$8 sps:$4 sm:$0xff]  }
0x213f   : > { %6707 = vmatprep.subr.bf16.mxu1 %v9219_v20 }
0x2142   : > { %6708 = vmatpush1.bf16.msra.mxu1 %v9217_v14 }
0x2143   : > { %6709 = vmatprep.subr.bf16.mxu1 %v9222_v21 }
0x2146   : > { %6710 = vmatpush1.bf16.msra.mxu1 %v9220_v22 }
0x2147   : > { %6711 = vmatprep.subr.bf16.mxu1 %v9225_v23 }
0x214a   : > { %6712 = vmatpush1.bf16.msra.mxu1 %v9223_v0 }
0x214d   : > { %7871 = vmatmul.mubr.msk.bf16.vlgmr.msra.gmra.mrb[144].mxu1 %vm2884_vm3, %v11115_v26 }
0x2210   : > { %v6647_v24 = vpop.f32.mrb[140].mxu1 }
0x2211   : > { %v11367_v25 = vadd.f32 %v6647_v24, %v6508_v42  ;;  %v6649_v27 = vpop.f32.mrb[141].mxu1 }
0x2212   : > { %v11369_v28 = vadd.f32 %v6649_v27, %v6509_v6  ;;  %v6651_v29 = vpop.f32.mrb[142].mxu1 }
0x2213   : > { %v6652_v30 = vpop.f32.mrb[143].mxu1 }
0x2220   : > { %v6739_v31 = vpop.f32.mrb[144].mxu1 }
0x2221   : > { %v6748_v32 = vpack.c.bf16 %v6739_v31, %v6739_v31  ;;  %v6741_v33 = vpop.f32.mrb[145].mxu1 }
0x2222   : > { %v6749_v38 = vpack.c.bf16 %v6741_v33, %v6741_v33  ;;  %v6743_v13 = vpop.f32.mrb[146].mxu1 }
0x2223   : > { %v6754_v39 = vsel %vm3068_vm5, %v6748_v32, 0  ;;  %v6744_v26 = vpop.f32.mrb[147].mxu1 }
0x2224   : > { %7873 = vmatprep.subr.msk.bf16.mxu0 %vm3068_vm5, %v6749_v38 }
0x2225   : > { %6760 = vmatpush1.bf16.msra.mxu0 %v6754_v39 }
0x2228   : > { %7874 = vmatmul.mubr.msk.bf16.vlgmr.msra.gmra.mrb[144].mxu0 %vm3064_vm6, %v7872_v40 }
0x2229   : > { %9580 = shalt.err (!%p9577_p6)
}
0x222a   : > { %s9581_s22 = scalar_lea.hbm %s11385_s3, 16  ;;  %s9585_s0 = scalar_lea.hbm %s11624_s7, 32 }
0x222b   : > { %p9582_p5 = scmp.ne.s32.totalorder %s11385_s3, %s9581_s22  ;;  %p9586_p2 = scmp.lt.u32.totalorder %s11385_s3, %s11624_s7 }
0x222c   : > { %p9587_p3 = scmp.lt.u32.totalorder %s9585_s0, %s9581_s22  ;;  %p9589_p0 = scmp.lt.u32.totalorder %s9581_s22, %s11385_s3 }
0x222d   : > { %p9583_p9 = pnand %p9582_p5, %p11626_p7 }
0x222e   : > { %p9588_p4 = por %p9587_p3, %p9586_p2 }
0x222f   : > { %p9584_p10 = pneg %p9583_p9 }
0x2230   : > { %p9590_p8 = por %p9589_p0, %p9588_p4 }
0x2232   : > { %p9591_p11 = pnand %p9590_p8, %p9584_p10 }
0x2234   : > { %9594 = shalt.err (!%p9591_p11)
}
0x2235   : > { %8712 = dma.vmem_to_hbm [thread:$0]  (%p11626_p7), %s11389_s27, 16, %s11385_s3, %s11397_s5  }
0x2236   : > { %s11627_s20 = scalar_lea.vmem [#allocation22], %s10939_s29  ;;  %s11628_s4 = sld [smem:[#allocation58_spill]] }
0x2237   : > { %s6860_s2 = sshll.u32 %s11627_s20, 4  ;;  %s11630_s18 = scalar_lea.vmem [#allocation25], %s10939_s29  ;;  %s11429_s2 = int_to_ptr.vmem [resolvable:$true] %s6860_s2 }
0x2238   : > { %s11433_s6 = sshll.u32 %s11630_s18, 4  ;;  %s6837_s7 = scalar_lea.sflag [#allocation4], %s10939_s29  ;;  %s6887_s6 = int_to_ptr.vmem [resolvable:$true] %s11433_s6 }
0x2239   : > { %s9595_s8 = scalar_lea.vmem %s11429_s2, 16  ;;  %s9746_s3 = smov [#allocation22]  }
0x223a   : > { %p9596_p12 = scmp.ne.s32.totalorder %s11429_s2, %s9595_s8  ;;  %s9599_s27 = sshll.u32 %s9746_s3, 4  ;;  %s9600_s27 = int_to_ptr.vmem [resolvable:$false] %s9599_s27 }
0x223b   : > { %s9601_s20 = scalar_lea.vmem %s9600_s27, 32  ;;  %p9602_p6 = scmp.lt.s32.totalorder %s11429_s2, %s9600_s27 }
0x223c   : > { %s11629_s0 = smov %s11628_s4  ;;  %s11427_s22 = scalar_lea.hbm %s11628_s4, %s11379_s10 }
0x223d   : > { %p9597_p13 = pnand %p9596_p12, %p11626_p7  ;;  %p9603_p5 = scmp.lt.s32.totalorder %s9601_s20, %s9595_s8 }
0x223f   : > { %p9598_p1 = pneg %p9597_p13  ;;  %p9604_p9 = por %p9603_p5, %p9602_p6 }
0x2241   : > { %p9605_p10 = pnand %p9604_p9, %p9598_p1 }
0x2243   : > { %9608 = shalt.err (!%p9605_p10)
}
0x2244   : > { %s9609_s29 = scalar_lea.hbm %s11395_s1, 16  ;;  %s9613_s21 = scalar_lea.hbm %s11625_s28, 32 }
0x2245   : > { %p9610_p2 = scmp.ne.s32.totalorder %s11395_s1, %s9609_s29  ;;  %p9614_p0 = scmp.lt.u32.totalorder %s11395_s1, %s11625_s28 }
0x2246   : > { %p9615_p8 = scmp.lt.u32.totalorder %s9613_s21, %s9609_s29  ;;  %p9617_p12 = scmp.lt.u32.totalorder %s9609_s29, %s11395_s1 }
0x2247   : > { %p9611_p3 = pnand %p9610_p2, %p11626_p7 }
0x2248   : > { %p9616_p11 = por %p9615_p8, %p9614_p0 }
0x2249   : > { %p9612_p4 = pneg %p9611_p3 }
0x224a   : > { %p9618_p13 = por %p9617_p12, %p9616_p11 }
0x224c   : > { %p9619_p1 = pnand %p9618_p13, %p9612_p4 }
0x224e   : > { %9622 = shalt.err (!%p9619_p1)
}
0x224f   : > { %8711 = dma.vmem_to_hbm [thread:$0]  (%p11626_p7), %s11429_s2, 16, %s11395_s1, %s6837_s7  }
0x2250   : > { %s9623_s8 = scalar_lea.vmem %s6887_s6, 16  ;;  %s9747_s3 = smov [#allocation25]  }
0x2251   : > { %p9624_p6 = scmp.ne.s32.totalorder %s6887_s6, %s9623_s8  ;;  %s9627_s27 = sshll.u32 %s9747_s3, 4  ;;  %s9628_s27 = int_to_ptr.vmem [resolvable:$false] %s9627_s27 }
0x2252   : > { %s9629_s20 = scalar_lea.vmem %s9628_s27, 32  ;;  %p9630_p10 = scmp.lt.s32.totalorder %s6887_s6, %s9628_s27 }
0x2253   : > { %p9625_p5 = pnand %p9624_p6, %p11626_p7  ;;  %p9631_p2 = scmp.lt.s32.totalorder %s9629_s20, %s9623_s8 }
0x2255   : > { %p9626_p9 = pneg %p9625_p5  ;;  %p9632_p3 = por %p9631_p2, %p9630_p10 }
0x2257   : > { %p9633_p4 = pnand %p9632_p3, %p9626_p9 }
0x2259   : > { %9636 = shalt.err (!%p9633_p4)
}
0x225a   : > { %s9637_s7 = scalar_lea.hbm %s11427_s22, 16  ;;  %s9641_s29 = scalar_lea.hbm %s11629_s0, 32 }
0x225b   : > { %p9638_p0 = scmp.ne.s32.totalorder %s11427_s22, %s9637_s7  ;;  %p9642_p12 = scmp.lt.u32.totalorder %s11427_s22, %s11629_s0 }
0x225c   : > { %p9643_p13 = scmp.lt.u32.totalorder %s9641_s29, %s9637_s7  ;;  %p9645_p6 = scmp.lt.u32.totalorder %s9637_s7, %s11427_s22 }
0x225d   : > { %p9639_p8 = pnand %p9638_p0, %p11626_p7 }
0x225e   : > { %p9644_p1 = por %p9643_p13, %p9642_p12 }
0x225f   : > { %p9640_p11 = pneg %p9639_p8 }
0x2260   : > { %p9646_p5 = por %p9645_p6, %p9644_p1 }
0x2262   : > { %p9647_p9 = pnand %p9646_p5, %p9640_p11 }
0x2264   : > { %9650 = shalt.err (!%p9647_p9)
}
0x2265   : > { %8713 = dma.vmem_to_hbm [thread:$0]  (%p11626_p7), %s6887_s6, 16, %s11427_s22, %s11397_s5   ;;  %v6806_v45 = vpop.permute.xlu0 %6805 }
0x2266   : > { %s11631_s6 = sshll.u32 %s10271_s13, 3  ;;  %s11632_s22 = sld [smem:[#allocation55_spill]] }
0x226c   : > { %s899_s21 = scalar_lea.vmem %s11632_s22, %s11631_s6 }
0x22fb   : > { %v6793_v41 = vpop.f32.mrb[144].mxu0 }
0x22fc   : > { %v6800_v43 = vadd.f32 %v6793_v41, %v11367_v25  ;;  %v6795_v44 = vpop.f32.mrb[145].mxu0 }
0x22fd   : > { %v6801_v46 = vadd.f32 %v6795_v44, %v11369_v28  ;;  %v6797_v47 = vpop.f32.mrb[146].mxu0 }
0x22fe   : > { %v6808_v48 = vadd.f32 %v6806_v45, %v6800_v43  ;;  %v6798_v49 = vpop.f32.mrb[147].mxu0 }
0x22ff   : > { %v6809_v50 = vadd.f32 %v6806_v45, %v6801_v46 }
0x2300   : > { %v6810_v51 = vsub.f32 0.0, %v6808_v48 }
0x2301   : > { %v6811_v52 = vsub.f32 0.0, %v6809_v50 }
0x2302   : > { %v6812_v53 = vmul.f32 1.442695, %v6810_v51 }
0x2303   : > { %v6814_v54 = vmul.f32 1.442695, %v6811_v52 }
0x2304   : > { %9236 = vpow2.f32 %v6812_v53 }
0x2305   : > { %9238 = vpow2.f32 %v6814_v54 }
0x230e   : > { %v9237_v37 = vpop.eup %9236 }
0x230f   : > { %v9239_v35 = vpop.eup %9238  ;;  %v6816_v55 = vadd.f32 1.0, %v9237_v37 }
0x2310   : > { %v6817_v56 = vadd.f32 1.0, %v9239_v35 }
0x2311   : > { %9240 = vrcp.f32 %v6816_v55 }
0x2312   : > { %9242 = vrcp.f32 %v6817_v56 }
0x231b   : > { %v9241_v36 = vpop.eup %9240 }
0x231c   : > { %v9243_v57 = vpop.eup %9242 }
0x231d   : > { %v6824_v58 = vcombine.low %v9241_v36, %v9243_v57 }
0x231f   : > { %6826 = vst [vmem:[%s899_s21] sm:$0xff] %v6824_v58 }
0x2320 PF: > { %s11633_s4 = sld [smem:[#allocation37_spill]]  ;;  %s11634_s18 = sld [smem:[#allocation35_spill]] }
0x2321   : > { %s11635_s8 = sld [smem:[#allocation41_spill]] }
0x2326   : > { %p8788_p7 = scmp.ge.s32.totalorder %s11633_s4, 2  ;;  %s6906_s3 = sand.u32 1, %s11634_s18  }
0x2327   : > { %p11636_p10 = scmp.ne.s32.totalorder %s11635_s8, 0  ;;  %s6907_s27 = scalar_lea.sflag [#allocation4], %s6906_s3 }
0x2329   : > { %p8755_p2 = pnand %p8788_p7, %p11636_p10 }
0x232b   : > { %9696 = dma.done.wait (!%p8755_p2), %s6907_s27, 16  }
0x232c   : > { %9698 = vsyncadd (!%p8755_p2), %s6907_s27, 4294967280  ;;  %s11637_s20 = sadd.s32 4294967294, %s11633_s4  }
0x232d   : > { %s6914_s13 = sand.u32 1, %s11637_s20  }
0x232e   : > { %s6915_s7 = scalar_lea.sflag [#allocation24], %s6914_s13 }
0x232f   : > { %9700 = dma.done.wait (!%p8755_p2), %s6915_s7, 32  }
0x2330   : > { %9702 = vsyncadd (!%p8755_p2), %s6915_s7, 4294967264  ;;  %s11638_s25 = sld [smem:[#allocation38_spill]]  ;;  %s11639_s1 = sld [smem:[#allocation36_spill]] }
0x2331   : > { %s11640_s24 = sld [smem:[#allocation39_spill]]  ;;  %s11641_s4 = smov %s9709_s30 }
0x2336   : > { %p44_p3 = scmp.ge.s32.totalorder %s11638_s25, 4   ;;  %s11642_s30 = smov %s11639_s1 }
0x2338   :  { %46 = sbr.rel (!%p44_p3) target bundleno = 30 (0x1e), region = 293 }
0x233f   :  { %6927 = vsyncpa [#allocation3], 1 }
0x2340   :  { %6929 = vsyncpa [#allocation3 + $0x1], 1 }
0x2341   :  { %6930 = vsyncpa [#allocation8], 1 }
0x2342   :  { %6931 = vsyncpa [#allocation11], 1 }
0x2343   :  { %6932 = vsyncpa [#allocation14], 1 }
0x2344   :  { %6933 = vsyncpa [#allocation17], 1 }
0x2345   :  { %6934 = vsyncpa [#allocation20], 1 }
0x2346   :  { %6935 = vsyncpa [#allocation4], 1 }
0x2347   :  { %6937 = vsyncpa [#allocation4 + $0x1], 1 }
0x2348   :  { %6938 = vsyncpa [#allocation24], 1 }
0x2349   :  { %6940 = vsyncpa [#allocation24 + $0x1], 1 }
0x234a   :  { %6941 = vsyncpa [#allocation5], 1 }
0x234b   :  { %6943 = vsyncpa [#allocation5 + $0x1], 1 }

</bundles_post_ra>
